<compile_context>
chip_gen: v7x
topology: tpu7x:2x2x1
jax: 0.10.0
libtpu: 0.0.40
codegen_flags: <defaults>
</compile_context>

<pallas_src>
import functools
import math

import jax
import jax.numpy as jnp
from jax.experimental import pallas as pl
from jax.experimental.pallas import tpu as pltpu

# ---------------- small synthetic BERT config ----------------
VOCAB = 100
MAX_POS = 16
TYPE_VOCAB = 2
HIDDEN = 32
HEADS = 4
HEAD_DIM = HIDDEN // HEADS
INTER = 64
LAYERS = 2
N_CLASSES = 3
NPAD = 128            # lane-dense padded classifier width
LN_EPS = 1e-12


# ---------------- fused model kernel ----------------
def _fused_bert_kernel(emb_ref, mask_ref, eg_ref, eb_ref,
                       wqkv_ref, bqkv_ref, wo_ref, bo_ref, ln1g_ref, ln1b_ref,
                       wi_ref, bi_ref, wo2_ref, bo2_ref, ln2g_ref, ln2b_ref,
                       pw_ref, pb_ref, cw_ref, cb_ref,
                       out_ref, *, batch, seq):
    def layer_norm(x, g, b):
        mean = jnp.mean(x, axis=-1, keepdims=True)
        cen = x - mean
        var = jnp.mean(cen * cen, axis=-1, keepdims=True)
        return cen * jax.lax.rsqrt(var + LN_EPS) * g + b

    def gelu(y):
        # TODO(synk): HF BERT default "gelu" is the exact erf form; tanh approx
        # is used here to keep the in-kernel math on the EUP (tanh) path.
        c = math.sqrt(2.0 / math.pi)
        return 0.5 * y * (1.0 + jnp.tanh(c * (y + 0.044715 * y * y * y)))

    scale = 1.0 / math.sqrt(HEAD_DIM)

    # Embedding LayerNorm (no residual).
    x = layer_norm(emb_ref[...], eg_ref[...], eb_ref[...])        # (B*S, H)
    mask = mask_ref[...]                                          # (B, S) additive

    for l in range(LAYERS):
        # ---- fused QKV projection: one (B*S, H) x (H, 3H) matmul ----
        wqkv = wqkv_ref[l]
        qkv = jnp.dot(x, wqkv, preferred_element_type=jnp.float32) + bqkv_ref[l]

        wo = wo_ref[l]
        attn_rows = []
        for b in range(batch):                                    # static unroll
            r0 = b * seq
            m_b = mask[b:b + 1, :]                                # (1, S)
            acc = jnp.zeros((seq, HIDDEN), jnp.float32)
            for h in range(HEADS):                                # static unroll
                c0 = h * HEAD_DIM
                q = qkv[r0:r0 + seq, c0:c0 + HEAD_DIM]
                k = qkv[r0:r0 + seq, HIDDEN + c0:HIDDEN + c0 + HEAD_DIM]
                v = qkv[r0:r0 + seq, 2 * HIDDEN + c0:2 * HIDDEN + c0 + HEAD_DIM]
                # scores = q @ k^T (contract last dims; avoids explicit transpose)
                s = jax.lax.dot_general(q, k, (((1,), (1,)), ((), ())),
                                        preferred_element_type=jnp.float32)
                s = s * scale + m_b
                s = s - jnp.max(s, axis=-1, keepdims=True)
                p = jnp.exp(s)
                p = p / jnp.sum(p, axis=-1, keepdims=True)
                ctx_h = jnp.dot(p, v, preferred_element_type=jnp.float32)  # (S, D)
                # fold this head's slice of the output projection into the loop
                acc = acc + jnp.dot(ctx_h, wo[c0:c0 + HEAD_DIM, :],
                                    preferred_element_type=jnp.float32)
            attn_rows.append(acc)
        attn_out = jnp.concatenate(attn_rows, axis=0) + bo_ref[l]  # (B*S, H)

        # residual + LN (fused epilogue)
        x = layer_norm(attn_out + x, ln1g_ref[l], ln1b_ref[l])

        # ---- FFN with fused bias + GELU + residual + LN ----
        h1 = jnp.dot(x, wi_ref[l], preferred_element_type=jnp.float32) + bi_ref[l]
        h1 = gelu(h1)
        h2 = jnp.dot(h1, wo2_ref[l], preferred_element_type=jnp.float32) + bo2_ref[l]
        x = layer_norm(h2 + x, ln2g_ref[l], ln2b_ref[l])

    # ---- pooler (tanh) + classifier, applied to all rows (CLS rows selected
    #      by the wrapper); classifier width padded to 128 lanes. ----
    pooled = jnp.tanh(jnp.dot(x, pw_ref[...], preferred_element_type=jnp.float32)
                      + pb_ref[...])
    # TODO(synk): nn.Dropout(p=0.3) is identity in eval/inference mode; not applied.
    logits = jnp.dot(pooled, cw_ref[...], preferred_element_type=jnp.float32) \
        + cb_ref[...]
    out_ref[...] = logits                                          # (B*S, 128)


def _full_spec(shape):
    nd = len(shape)
    return pl.BlockSpec(tuple(shape), lambda i, _nd=nd: (0,) * _nd)


# ---------------- parameters (deterministic synthetic init) ----------------
def init_params(key):
    def nrm(k, shape):
        return jax.random.normal(k, shape, jnp.float32) * 0.02

    keys = iter(jax.random.split(key, 16 + LAYERS * 8))
    p = {
        "word_emb": nrm(next(keys), (VOCAB, HIDDEN)),
        "pos_emb": nrm(next(keys), (MAX_POS, HIDDEN)),
        "type_emb": nrm(next(keys), (TYPE_VOCAB, HIDDEN)),
        "emb_ln_g": jnp.ones((1, HIDDEN), jnp.float32),
        "emb_ln_b": jnp.zeros((1, HIDDEN), jnp.float32),
        # fused QKV weights per layer: [wq | wk | wv] along output axis
        "wqkv": jnp.stack([nrm(next(keys), (HIDDEN, 3 * HIDDEN)) for _ in range(LAYERS)]),
        "bqkv": jnp.zeros((LAYERS, 1, 3 * HIDDEN), jnp.float32),
        "wo": jnp.stack([nrm(next(keys), (HIDDEN, HIDDEN)) for _ in range(LAYERS)]),
        "bo": jnp.zeros((LAYERS, 1, HIDDEN), jnp.float32),
        "ln1_g": jnp.ones((LAYERS, 1, HIDDEN), jnp.float32),
        "ln1_b": jnp.zeros((LAYERS, 1, HIDDEN), jnp.float32),
        "wi": jnp.stack([nrm(next(keys), (HIDDEN, INTER)) for _ in range(LAYERS)]),
        "bi": jnp.zeros((LAYERS, 1, INTER), jnp.float32),
        "wo2": jnp.stack([nrm(next(keys), (INTER, HIDDEN)) for _ in range(LAYERS)]),
        "bo2": jnp.zeros((LAYERS, 1, HIDDEN), jnp.float32),
        "ln2_g": jnp.ones((LAYERS, 1, HIDDEN), jnp.float32),
        "ln2_b": jnp.zeros((LAYERS, 1, HIDDEN), jnp.float32),
        "pool_w": nrm(next(keys), (HIDDEN, HIDDEN)),
        "pool_b": jnp.zeros((1, HIDDEN), jnp.float32),
        # classifier weight/bias padded to lane-dense width; real cols are [:N_CLASSES]
        "cls_w": jnp.pad(nrm(next(keys), (HIDDEN, N_CLASSES)),
                         ((0, 0), (0, NPAD - N_CLASSES))),
        "cls_b": jnp.zeros((1, NPAD), jnp.float32),
    }
    return p


# ---------------- forward (TextClsModel.forward semantics) ----------------
def text_cls_forward(params, input_ids, attention_mask):
    B, S = input_ids.shape
    BS = B * S

    # BERT embeddings: word + position + token_type (all-zero type ids). Gathers
    # are plain-JAX glue; the LayerNorm happens inside the fused kernel.
    tok = params["word_emb"][input_ids]                            # (B, S, H)
    pos = params["pos_emb"][jnp.arange(S)][None, :, :]
    typ = params["type_emb"][0][None, None, :]
    emb = (tok + pos + typ).reshape(BS, HIDDEN)

    # Extended additive attention mask: 0 where attended, -1e9 where padded.
    ext = (1.0 - attention_mask.astype(jnp.float32)) * -1e9        # (B, S)

    args = (emb, ext,
            params["emb_ln_g"], params["emb_ln_b"],
            params["wqkv"], params["bqkv"], params["wo"], params["bo"],
            params["ln1_g"], params["ln1_b"],
            params["wi"], params["bi"], params["wo2"], params["bo2"],
            params["ln2_g"], params["ln2_b"],
            params["pool_w"], params["pool_b"], params["cls_w"], params["cls_b"])

    # Advisory cost estimate for XLA scheduling around the custom call.
    mm_flops = (
        LAYERS * (2 * BS * HIDDEN * 3 * HIDDEN
                  + B * HEADS * (4 * S * S * HEAD_DIM + 2 * S * HEAD_DIM * HIDDEN)
                  + 2 * BS * HIDDEN * INTER + 2 * BS * INTER * HIDDEN)
        + 2 * BS * HIDDEN * HIDDEN + 2 * BS * HIDDEN * NPAD)
    transcendentals = LAYERS * (B * HEADS * S * S + BS * INTER) + BS * HIDDEN
    bytes_accessed = 4 * (sum(int(a.size) for a in args) + BS * NPAD)
    cost = pl.CostEstimate(flops=int(mm_flops),
                           transcendentals=int(transcendentals),
                           bytes_accessed=int(bytes_accessed))

    kern = functools.partial(_fused_bert_kernel, batch=B, seq=S)

    out = pl.pallas_call(
        kern,
        out_shape=jax.ShapeDtypeStruct((BS, NPAD), jnp.float32),
        grid=(1,),
        in_specs=[_full_spec(a.shape) for a in args],
        out_specs=_full_spec((BS, NPAD)),
        compiler_params=pltpu.CompilerParams(
            dimension_semantics=("arbitrary",),
            vmem_limit_bytes=32 * 1024 * 1024),
        cost_estimate=cost,
    )(*args)

    # CLS token of each sequence, real classifier columns only.
    return out[::S, :N_CLASSES]                                    # (B, N_CLASSES)


if __name__ == "__main__":
    key = jax.random.PRNGKey(0)
    pkey, ikey = jax.random.split(key)
    params = init_params(pkey)

    B, S = 2, 8
    input_ids = jax.random.randint(ikey, (B, S), 0, VOCAB, dtype=jnp.int32)
    attention_mask = jnp.array(
        [[1, 1, 1, 1, 1, 1, 1, 1],
         [1, 1, 1, 1, 1, 1, 0, 0]], dtype=jnp.int32)

    fwd = jax.jit(functools.partial(text_cls_forward, params))
    logits = fwd(input_ids, attention_mask)
    jax.block_until_ready(logits)

    assert logits.shape == (B, N_CLASSES)
    assert bool(jnp.all(jnp.isfinite(logits)))
    print("KERNEL_OK")
</pallas_src>

<mosaic_0001>
module attributes {stable_mosaic.version = 11 : i64} {
  func.func @_fused_bert_kernel(%arg0: i32, %arg1: memref<16x32xf32, #tpu.memory_space<vmem>>, %arg2: memref<2x8xf32, #tpu.memory_space<vmem>>, %arg3: memref<1x32xf32, #tpu.memory_space<vmem>>, %arg4: memref<1x32xf32, #tpu.memory_space<vmem>>, %arg5: memref<2x32x96xf32, #tpu.memory_space<vmem>>, %arg6: memref<2x1x96xf32, #tpu.memory_space<vmem>>, %arg7: memref<2x32x32xf32, #tpu.memory_space<vmem>>, %arg8: memref<2x1x32xf32, #tpu.memory_space<vmem>>, %arg9: memref<2x1x32xf32, #tpu.memory_space<vmem>>, %arg10: memref<2x1x32xf32, #tpu.memory_space<vmem>>, %arg11: memref<2x32x64xf32, #tpu.memory_space<vmem>>, %arg12: memref<2x1x64xf32, #tpu.memory_space<vmem>>, %arg13: memref<2x64x32xf32, #tpu.memory_space<vmem>>, %arg14: memref<2x1x32xf32, #tpu.memory_space<vmem>>, %arg15: memref<2x1x32xf32, #tpu.memory_space<vmem>>, %arg16: memref<2x1x32xf32, #tpu.memory_space<vmem>>, %arg17: memref<32x32xf32, #tpu.memory_space<vmem>>, %arg18: memref<1x32xf32, #tpu.memory_space<vmem>>, %arg19: memref<32x128xf32, #tpu.memory_space<vmem>>, %arg20: memref<1x128xf32, #tpu.memory_space<vmem>>, %arg21: memref<16x128xf32, #tpu.memory_space<vmem>>) attributes {dimension_semantics = [#tpu.dimension_semantics<arbitrary>], iteration_bounds = array<i64: 1>, scalar_prefetch = 0 : i64, scratch_operands = 0 : i64, tpu.core_type = #tpu.core_type<tc>, window_params = [{pipeline_mode = #tpu.pipeline_mode<synchronous>, transform_indices = @transform_0, window_bounds = array<i64: 16, 32>}, {pipeline_mode = #tpu.pipeline_mode<synchronous>, transform_indices = @transform_1, window_bounds = array<i64: 2, 8>}, {pipeline_mode = #tpu.pipeline_mode<synchronous>, transform_indices = @transform_2, window_bounds = array<i64: 1, 32>}, {pipeline_mode = #tpu.pipeline_mode<synchronous>, transform_indices = @transform_3, window_bounds = array<i64: 1, 32>}, {pipeline_mode = #tpu.pipeline_mode<synchronous>, transform_indices = @transform_4, window_bounds = array<i64: 2, 32, 96>}, {pipeline_mode = #tpu.pipeline_mode<synchronous>, transform_indices = @transform_5, window_bounds = array<i64: 2, 1, 96>}, {pipeline_mode = #tpu.pipeline_mode<synchronous>, transform_indices = @transform_6, window_bounds = array<i64: 2, 32, 32>}, {pipeline_mode = #tpu.pipeline_mode<synchronous>, transform_indices = @transform_7, window_bounds = array<i64: 2, 1, 32>}, {pipeline_mode = #tpu.pipeline_mode<synchronous>, transform_indices = @transform_8, window_bounds = array<i64: 2, 1, 32>}, {pipeline_mode = #tpu.pipeline_mode<synchronous>, transform_indices = @transform_9, window_bounds = array<i64: 2, 1, 32>}, {pipeline_mode = #tpu.pipeline_mode<synchronous>, transform_indices = @transform_10, window_bounds = array<i64: 2, 32, 64>}, {pipeline_mode = #tpu.pipeline_mode<synchronous>, transform_indices = @transform_11, window_bounds = array<i64: 2, 1, 64>}, {pipeline_mode = #tpu.pipeline_mode<synchronous>, transform_indices = @transform_12, window_bounds = array<i64: 2, 64, 32>}, {pipeline_mode = #tpu.pipeline_mode<synchronous>, transform_indices = @transform_13, window_bounds = array<i64: 2, 1, 32>}, {pipeline_mode = #tpu.pipeline_mode<synchronous>, transform_indices = @transform_14, window_bounds = array<i64: 2, 1, 32>}, {pipeline_mode = #tpu.pipeline_mode<synchronous>, transform_indices = @transform_15, window_bounds = array<i64: 2, 1, 32>}, {pipeline_mode = #tpu.pipeline_mode<synchronous>, transform_indices = @transform_16, window_bounds = array<i64: 32, 32>}, {pipeline_mode = #tpu.pipeline_mode<synchronous>, transform_indices = @transform_17, window_bounds = array<i64: 1, 32>}, {pipeline_mode = #tpu.pipeline_mode<synchronous>, transform_indices = @transform_18, window_bounds = array<i64: 32, 128>}, {pipeline_mode = #tpu.pipeline_mode<synchronous>, transform_indices = @transform_19, window_bounds = array<i64: 1, 128>}, {pipeline_mode = #tpu.pipeline_mode<synchronous>, transform_indices = @transform_20, window_bounds = array<i64: 16, 128>}]} {
    %c0 = arith.constant 0 : index
    %c0_0 = arith.constant 0 : index
    %0 = vector.load %arg1[%c0, %c0_0] : memref<16x32xf32, #tpu.memory_space<vmem>>, vector<16x32xf32>
    %c0_1 = arith.constant 0 : index
    %c0_2 = arith.constant 0 : index
    %1 = vector.load %arg3[%c0_1, %c0_2] : memref<1x32xf32, #tpu.memory_space<vmem>>, vector<1x32xf32>
    %c0_3 = arith.constant 0 : index
    %c0_4 = arith.constant 0 : index
    %2 = vector.load %arg4[%c0_3, %c0_4] : memref<1x32xf32, #tpu.memory_space<vmem>>, vector<1x32xf32>
    %cst = arith.constant dense<0.000000e+00> : vector<16xf32>
    %3 = vector.multi_reduction <add>, %0, %cst [1] : vector<16x32xf32> to vector<16xf32>
    %4 = vector.shape_cast %3 : vector<16xf32> to vector<16x1xf32>
    %cst_5 = arith.constant 3.200000e+01 : f32
    %5 = vector.broadcast %cst_5 : f32 to vector<16x1xf32>
    %6 = arith.divf %4, %5 : vector<16x1xf32>
    %7 = vector.broadcast %6 : vector<16x1xf32> to vector<16x32xf32>
    %8 = arith.subf %0, %7 : vector<16x32xf32>
    %9 = arith.mulf %8, %8 : vector<16x32xf32>
    %cst_6 = arith.constant dense<0.000000e+00> : vector<16xf32>
    %10 = vector.multi_reduction <add>, %9, %cst_6 [1] : vector<16x32xf32> to vector<16xf32>
    %11 = vector.shape_cast %10 : vector<16xf32> to vector<16x1xf32>
    %cst_7 = arith.constant 3.200000e+01 : f32
    %12 = vector.broadcast %cst_7 : f32 to vector<16x1xf32>
    %13 = arith.divf %11, %12 : vector<16x1xf32>
    %cst_8 = arith.constant 9.99999996E-13 : f32
    %14 = vector.broadcast %cst_8 : f32 to vector<16x1xf32>
    %15 = arith.addf %13, %14 : vector<16x1xf32>
    %16 = math.rsqrt %15 : vector<16x1xf32>
    %17 = vector.broadcast %16 : vector<16x1xf32> to vector<16x32xf32>
    %18 = arith.mulf %8, %17 : vector<16x32xf32>
    %19 = vector.broadcast %1 : vector<1x32xf32> to vector<16x32xf32>
    %20 = arith.mulf %18, %19 : vector<16x32xf32>
    %21 = vector.broadcast %2 : vector<1x32xf32> to vector<16x32xf32>
    %22 = arith.addf %20, %21 : vector<16x32xf32>
    %c0_9 = arith.constant 0 : index
    %c0_10 = arith.constant 0 : index
    %23 = vector.load %arg2[%c0_9, %c0_10] : memref<2x8xf32, #tpu.memory_space<vmem>>, vector<2x8xf32>
    %c0_11 = arith.constant 0 : index
    %c0_12 = arith.constant 0 : index
    %c0_13 = arith.constant 0 : index
    %24 = vector.load %arg5[%c0_11, %c0_12, %c0_13] : memref<2x32x96xf32, #tpu.memory_space<vmem>>, vector<1x32x96xf32>
    %25 = vector.shape_cast %24 : vector<1x32x96xf32> to vector<32x96xf32>
    %cst_14 = arith.constant dense<0.000000e+00> : vector<16x96xf32>
    %26 = tpu.matmul %22, %25, %cst_14 {dimension_numbers = #tpu.dot_dimension_numbers<[1], [0], [0], [1], [0, 0, 1, 1], [], []>} : vector<16x32xf32>, vector<32x96xf32>, vector<16x96xf32> -> vector<16x96xf32>
    %c0_15 = arith.constant 0 : index
    %c0_16 = arith.constant 0 : index
    %c0_17 = arith.constant 0 : index
    %27 = vector.load %arg6[%c0_15, %c0_16, %c0_17] : memref<2x1x96xf32, #tpu.memory_space<vmem>>, vector<1x1x96xf32>
    %28 = vector.shape_cast %27 : vector<1x1x96xf32> to vector<1x96xf32>
    %29 = vector.broadcast %28 : vector<1x96xf32> to vector<16x96xf32>
    %30 = arith.addf %26, %29 : vector<16x96xf32>
    %c0_18 = arith.constant 0 : index
    %c0_19 = arith.constant 0 : index
    %c0_20 = arith.constant 0 : index
    %31 = vector.load %arg7[%c0_18, %c0_19, %c0_20] : memref<2x32x32xf32, #tpu.memory_space<vmem>>, vector<1x32x32xf32>
    %32 = vector.shape_cast %31 : vector<1x32x32xf32> to vector<32x32xf32>
    %33 = vector.extract_strided_slice %23 {offsets = [0, 0], sizes = [1, 8], strides = [1, 1]} : vector<2x8xf32> to vector<1x8xf32>
    %cst_21 = arith.constant 0.000000e+00 : f32
    %34 = vector.broadcast %cst_21 : f32 to vector<8x32xf32>
    %35 = vector.extract_strided_slice %30 {offsets = [0, 0], sizes = [8, 8], strides = [1, 1]} : vector<16x96xf32> to vector<8x8xf32>
    %36 = vector.extract_strided_slice %30 {offsets = [0, 32], sizes = [8, 8], strides = [1, 1]} : vector<16x96xf32> to vector<8x8xf32>
    %37 = vector.extract_strided_slice %30 {offsets = [0, 64], sizes = [8, 8], strides = [1, 1]} : vector<16x96xf32> to vector<8x8xf32>
    %cst_22 = arith.constant dense<0.000000e+00> : vector<8x8xf32>
    %38 = tpu.matmul %35, %36, %cst_22 {dimension_numbers = #tpu.dot_dimension_numbers<[1], [1], [0], [0], [0, 0, 1, 0], [], []>} : vector<8x8xf32>, vector<8x8xf32>, vector<8x8xf32> -> vector<8x8xf32>
    %cst_23 = arith.constant 0.353553385 : f32
    %39 = vector.broadcast %cst_23 : f32 to vector<8x8xf32>
    %40 = arith.mulf %38, %39 : vector<8x8xf32>
    %41 = vector.broadcast %33 : vector<1x8xf32> to vector<8x8xf32>
    %42 = arith.addf %40, %41 : vector<8x8xf32>
    %cst_24 = arith.constant dense<0xFF800000> : vector<8xf32>
    %43 = vector.multi_reduction <maximumf>, %42, %cst_24 [1] : vector<8x8xf32> to vector<8xf32>
    %44 = vector.shape_cast %43 : vector<8xf32> to vector<8x1xf32>
    %45 = vector.broadcast %44 : vector<8x1xf32> to vector<8x8xf32>
    %46 = arith.subf %42, %45 : vector<8x8xf32>
    %47 = math.exp %46 : vector<8x8xf32>
    %cst_25 = arith.constant dense<0.000000e+00> : vector<8xf32>
    %48 = vector.multi_reduction <add>, %47, %cst_25 [1] : vector<8x8xf32> to vector<8xf32>
    %49 = vector.shape_cast %48 : vector<8xf32> to vector<8x1xf32>
    %50 = vector.broadcast %49 : vector<8x1xf32> to vector<8x8xf32>
    %51 = arith.divf %47, %50 : vector<8x8xf32>
    %cst_26 = arith.constant dense<0.000000e+00> : vector<8x8xf32>
    %52 = tpu.matmul %51, %37, %cst_26 {dimension_numbers = #tpu.dot_dimension_numbers<[1], [0], [0], [1], [0, 0, 1, 1], [], []>} : vector<8x8xf32>, vector<8x8xf32>, vector<8x8xf32> -> vector<8x8xf32>
    %53 = vector.extract_strided_slice %32 {offsets = [0, 0], sizes = [8, 32], strides = [1, 1]} : vector<32x32xf32> to vector<8x32xf32>
    %cst_27 = arith.constant dense<0.000000e+00> : vector<8x32xf32>
    %54 = tpu.matmul %52, %53, %cst_27 {dimension_numbers = #tpu.dot_dimension_numbers<[1], [0], [0], [1], [0, 0, 1, 1], [], []>} : vector<8x8xf32>, vector<8x32xf32>, vector<8x32xf32> -> vector<8x32xf32>
    %55 = arith.addf %34, %54 : vector<8x32xf32>
    %56 = vector.extract_strided_slice %30 {offsets = [0, 8], sizes = [8, 8], strides = [1, 1]} : vector<16x96xf32> to vector<8x8xf32>
    %57 = vector.extract_strided_slice %30 {offsets = [0, 40], sizes = [8, 8], strides = [1, 1]} : vector<16x96xf32> to vector<8x8xf32>
    %58 = vector.extract_strided_slice %30 {offsets = [0, 72], sizes = [8, 8], strides = [1, 1]} : vector<16x96xf32> to vector<8x8xf32>
    %cst_28 = arith.constant dense<0.000000e+00> : vector<8x8xf32>
    %59 = tpu.matmul %56, %57, %cst_28 {dimension_numbers = #tpu.dot_dimension_numbers<[1], [1], [0], [0], [0, 0, 1, 0], [], []>} : vector<8x8xf32>, vector<8x8xf32>, vector<8x8xf32> -> vector<8x8xf32>
    %cst_29 = arith.constant 0.353553385 : f32
    %60 = vector.broadcast %cst_29 : f32 to vector<8x8xf32>
    %61 = arith.mulf %59, %60 : vector<8x8xf32>
    %62 = vector.broadcast %33 : vector<1x8xf32> to vector<8x8xf32>
    %63 = arith.addf %61, %62 : vector<8x8xf32>
    %cst_30 = arith.constant dense<0xFF800000> : vector<8xf32>
    %64 = vector.multi_reduction <maximumf>, %63, %cst_30 [1] : vector<8x8xf32> to vector<8xf32>
    %65 = vector.shape_cast %64 : vector<8xf32> to vector<8x1xf32>
    %66 = vector.broadcast %65 : vector<8x1xf32> to vector<8x8xf32>
    %67 = arith.subf %63, %66 : vector<8x8xf32>
    %68 = math.exp %67 : vector<8x8xf32>
    %cst_31 = arith.constant dense<0.000000e+00> : vector<8xf32>
    %69 = vector.multi_reduction <add>, %68, %cst_31 [1] : vector<8x8xf32> to vector<8xf32>
    %70 = vector.shape_cast %69 : vector<8xf32> to vector<8x1xf32>
    %71 = vector.broadcast %70 : vector<8x1xf32> to vector<8x8xf32>
    %72 = arith.divf %68, %71 : vector<8x8xf32>
    %cst_32 = arith.constant dense<0.000000e+00> : vector<8x8xf32>
    %73 = tpu.matmul %72, %58, %cst_32 {dimension_numbers = #tpu.dot_dimension_numbers<[1], [0], [0], [1], [0, 0, 1, 1], [], []>} : vector<8x8xf32>, vector<8x8xf32>, vector<8x8xf32> -> vector<8x8xf32>
    %74 = vector.extract_strided_slice %32 {offsets = [8, 0], sizes = [8, 32], strides = [1, 1]} : vector<32x32xf32> to vector<8x32xf32>
    %cst_33 = arith.constant dense<0.000000e+00> : vector<8x32xf32>
    %75 = tpu.matmul %73, %74, %cst_33 {dimension_numbers = #tpu.dot_dimension_numbers<[1], [0], [0], [1], [0, 0, 1, 1], [], []>} : vector<8x8xf32>, vector<8x32xf32>, vector<8x32xf32> -> vector<8x32xf32>
    %76 = arith.addf %55, %75 : vector<8x32xf32>
    %77 = vector.extract_strided_slice %30 {offsets = [0, 16], sizes = [8, 8], strides = [1, 1]} : vector<16x96xf32> to vector<8x8xf32>
    %78 = vector.extract_strided_slice %30 {offsets = [0, 48], sizes = [8, 8], strides = [1, 1]} : vector<16x96xf32> to vector<8x8xf32>
    %79 = vector.extract_strided_slice %30 {offsets = [0, 80], sizes = [8, 8], strides = [1, 1]} : vector<16x96xf32> to vector<8x8xf32>
    %cst_34 = arith.constant dense<0.000000e+00> : vector<8x8xf32>
    %80 = tpu.matmul %77, %78, %cst_34 {dimension_numbers = #tpu.dot_dimension_numbers<[1], [1], [0], [0], [0, 0, 1, 0], [], []>} : vector<8x8xf32>, vector<8x8xf32>, vector<8x8xf32> -> vector<8x8xf32>
    %cst_35 = arith.constant 0.353553385 : f32
    %81 = vector.broadcast %cst_35 : f32 to vector<8x8xf32>
    %82 = arith.mulf %80, %81 : vector<8x8xf32>
    %83 = vector.broadcast %33 : vector<1x8xf32> to vector<8x8xf32>
    %84 = arith.addf %82, %83 : vector<8x8xf32>
    %cst_36 = arith.constant dense<0xFF800000> : vector<8xf32>
    %85 = vector.multi_reduction <maximumf>, %84, %cst_36 [1] : vector<8x8xf32> to vector<8xf32>
    %86 = vector.shape_cast %85 : vector<8xf32> to vector<8x1xf32>
    %87 = vector.broadcast %86 : vector<8x1xf32> to vector<8x8xf32>
    %88 = arith.subf %84, %87 : vector<8x8xf32>
    %89 = math.exp %88 : vector<8x8xf32>
    %cst_37 = arith.constant dense<0.000000e+00> : vector<8xf32>
    %90 = vector.multi_reduction <add>, %89, %cst_37 [1] : vector<8x8xf32> to vector<8xf32>
    %91 = vector.shape_cast %90 : vector<8xf32> to vector<8x1xf32>
    %92 = vector.broadcast %91 : vector<8x1xf32> to vector<8x8xf32>
    %93 = arith.divf %89, %92 : vector<8x8xf32>
    %cst_38 = arith.constant dense<0.000000e+00> : vector<8x8xf32>
    %94 = tpu.matmul %93, %79, %cst_38 {dimension_numbers = #tpu.dot_dimension_numbers<[1], [0], [0], [1], [0, 0, 1, 1], [], []>} : vector<8x8xf32>, vector<8x8xf32>, vector<8x8xf32> -> vector<8x8xf32>
    %95 = vector.extract_strided_slice %32 {offsets = [16, 0], sizes = [8, 32], strides = [1, 1]} : vector<32x32xf32> to vector<8x32xf32>
    %cst_39 = arith.constant dense<0.000000e+00> : vector<8x32xf32>
    %96 = tpu.matmul %94, %95, %cst_39 {dimension_numbers = #tpu.dot_dimension_numbers<[1], [0], [0], [1], [0, 0, 1, 1], [], []>} : vector<8x8xf32>, vector<8x32xf32>, vector<8x32xf32> -> vector<8x32xf32>
    %97 = arith.addf %76, %96 : vector<8x32xf32>
    %98 = vector.extract_strided_slice %30 {offsets = [0, 24], sizes = [8, 8], strides = [1, 1]} : vector<16x96xf32> to vector<8x8xf32>
    %99 = vector.extract_strided_slice %30 {offsets = [0, 56], sizes = [8, 8], strides = [1, 1]} : vector<16x96xf32> to vector<8x8xf32>
    %100 = vector.extract_strided_slice %30 {offsets = [0, 88], sizes = [8, 8], strides = [1, 1]} : vector<16x96xf32> to vector<8x8xf32>
    %cst_40 = arith.constant dense<0.000000e+00> : vector<8x8xf32>
    %101 = tpu.matmul %98, %99, %cst_40 {dimension_numbers = #tpu.dot_dimension_numbers<[1], [1], [0], [0], [0, 0, 1, 0], [], []>} : vector<8x8xf32>, vector<8x8xf32>, vector<8x8xf32> -> vector<8x8xf32>
    %cst_41 = arith.constant 0.353553385 : f32
    %102 = vector.broadcast %cst_41 : f32 to vector<8x8xf32>
    %103 = arith.mulf %101, %102 : vector<8x8xf32>
    %104 = vector.broadcast %33 : vector<1x8xf32> to vector<8x8xf32>
    %105 = arith.addf %103, %104 : vector<8x8xf32>
    %cst_42 = arith.constant dense<0xFF800000> : vector<8xf32>
    %106 = vector.multi_reduction <maximumf>, %105, %cst_42 [1] : vector<8x8xf32> to vector<8xf32>
    %107 = vector.shape_cast %106 : vector<8xf32> to vector<8x1xf32>
    %108 = vector.broadcast %107 : vector<8x1xf32> to vector<8x8xf32>
    %109 = arith.subf %105, %108 : vector<8x8xf32>
    %110 = math.exp %109 : vector<8x8xf32>
    %cst_43 = arith.constant dense<0.000000e+00> : vector<8xf32>
    %111 = vector.multi_reduction <add>, %110, %cst_43 [1] : vector<8x8xf32> to vector<8xf32>
    %112 = vector.shape_cast %111 : vector<8xf32> to vector<8x1xf32>
    %113 = vector.broadcast %112 : vector<8x1xf32> to vector<8x8xf32>
    %114 = arith.divf %110, %113 : vector<8x8xf32>
    %cst_44 = arith.constant dense<0.000000e+00> : vector<8x8xf32>
    %115 = tpu.matmul %114, %100, %cst_44 {dimension_numbers = #tpu.dot_dimension_numbers<[1], [0], [0], [1], [0, 0, 1, 1], [], []>} : vector<8x8xf32>, vector<8x8xf32>, vector<8x8xf32> -> vector<8x8xf32>
    %116 = vector.extract_strided_slice %32 {offsets = [24, 0], sizes = [8, 32], strides = [1, 1]} : vector<32x32xf32> to vector<8x32xf32>
    %cst_45 = arith.constant dense<0.000000e+00> : vector<8x32xf32>
    %117 = tpu.matmul %115, %116, %cst_45 {dimension_numbers = #tpu.dot_dimension_numbers<[1], [0], [0], [1], [0, 0, 1, 1], [], []>} : vector<8x8xf32>, vector<8x32xf32>, vector<8x32xf32> -> vector<8x32xf32>
    %118 = arith.addf %97, %117 : vector<8x32xf32>
    %119 = vector.extract_strided_slice %23 {offsets = [1, 0], sizes = [1, 8], strides = [1, 1]} : vector<2x8xf32> to vector<1x8xf32>
    %cst_46 = arith.constant 0.000000e+00 : f32
    %120 = vector.broadcast %cst_46 : f32 to vector<8x32xf32>
    %121 = vector.extract_strided_slice %30 {offsets = [8, 0], sizes = [8, 8], strides = [1, 1]} : vector<16x96xf32> to vector<8x8xf32>
    %122 = vector.extract_strided_slice %30 {offsets = [8, 32], sizes = [8, 8], strides = [1, 1]} : vector<16x96xf32> to vector<8x8xf32>
    %123 = vector.extract_strided_slice %30 {offsets = [8, 64], sizes = [8, 8], strides = [1, 1]} : vector<16x96xf32> to vector<8x8xf32>
    %cst_47 = arith.constant dense<0.000000e+00> : vector<8x8xf32>
    %124 = tpu.matmul %121, %122, %cst_47 {dimension_numbers = #tpu.dot_dimension_numbers<[1], [1], [0], [0], [0, 0, 1, 0], [], []>} : vector<8x8xf32>, vector<8x8xf32>, vector<8x8xf32> -> vector<8x8xf32>
    %cst_48 = arith.constant 0.353553385 : f32
    %125 = vector.broadcast %cst_48 : f32 to vector<8x8xf32>
    %126 = arith.mulf %124, %125 : vector<8x8xf32>
    %127 = vector.broadcast %119 : vector<1x8xf32> to vector<8x8xf32>
    %128 = arith.addf %126, %127 : vector<8x8xf32>
    %cst_49 = arith.constant dense<0xFF800000> : vector<8xf32>
    %129 = vector.multi_reduction <maximumf>, %128, %cst_49 [1] : vector<8x8xf32> to vector<8xf32>
    %130 = vector.shape_cast %129 : vector<8xf32> to vector<8x1xf32>
    %131 = vector.broadcast %130 : vector<8x1xf32> to vector<8x8xf32>
    %132 = arith.subf %128, %131 : vector<8x8xf32>
    %133 = math.exp %132 : vector<8x8xf32>
    %cst_50 = arith.constant dense<0.000000e+00> : vector<8xf32>
    %134 = vector.multi_reduction <add>, %133, %cst_50 [1] : vector<8x8xf32> to vector<8xf32>
    %135 = vector.shape_cast %134 : vector<8xf32> to vector<8x1xf32>
    %136 = vector.broadcast %135 : vector<8x1xf32> to vector<8x8xf32>
    %137 = arith.divf %133, %136 : vector<8x8xf32>
    %cst_51 = arith.constant dense<0.000000e+00> : vector<8x8xf32>
    %138 = tpu.matmul %137, %123, %cst_51 {dimension_numbers = #tpu.dot_dimension_numbers<[1], [0], [0], [1], [0, 0, 1, 1], [], []>} : vector<8x8xf32>, vector<8x8xf32>, vector<8x8xf32> -> vector<8x8xf32>
    %139 = vector.extract_strided_slice %32 {offsets = [0, 0], sizes = [8, 32], strides = [1, 1]} : vector<32x32xf32> to vector<8x32xf32>
    %cst_52 = arith.constant dense<0.000000e+00> : vector<8x32xf32>
    %140 = tpu.matmul %138, %139, %cst_52 {dimension_numbers = #tpu.dot_dimension_numbers<[1], [0], [0], [1], [0, 0, 1, 1], [], []>} : vector<8x8xf32>, vector<8x32xf32>, vector<8x32xf32> -> vector<8x32xf32>
    %141 = arith.addf %120, %140 : vector<8x32xf32>
    %142 = vector.extract_strided_slice %30 {offsets = [8, 8], sizes = [8, 8], strides = [1, 1]} : vector<16x96xf32> to vector<8x8xf32>
    %143 = vector.extract_strided_slice %30 {offsets = [8, 40], sizes = [8, 8], strides = [1, 1]} : vector<16x96xf32> to vector<8x8xf32>
    %144 = vector.extract_strided_slice %30 {offsets = [8, 72], sizes = [8, 8], strides = [1, 1]} : vector<16x96xf32> to vector<8x8xf32>
    %cst_53 = arith.constant dense<0.000000e+00> : vector<8x8xf32>
    %145 = tpu.matmul %142, %143, %cst_53 {dimension_numbers = #tpu.dot_dimension_numbers<[1], [1], [0], [0], [0, 0, 1, 0], [], []>} : vector<8x8xf32>, vector<8x8xf32>, vector<8x8xf32> -> vector<8x8xf32>
    %cst_54 = arith.constant 0.353553385 : f32
    %146 = vector.broadcast %cst_54 : f32 to vector<8x8xf32>
    %147 = arith.mulf %145, %146 : vector<8x8xf32>
    %148 = vector.broadcast %119 : vector<1x8xf32> to vector<8x8xf32>
    %149 = arith.addf %147, %148 : vector<8x8xf32>
    %cst_55 = arith.constant dense<0xFF800000> : vector<8xf32>
    %150 = vector.multi_reduction <maximumf>, %149, %cst_55 [1] : vector<8x8xf32> to vector<8xf32>
    %151 = vector.shape_cast %150 : vector<8xf32> to vector<8x1xf32>
    %152 = vector.broadcast %151 : vector<8x1xf32> to vector<8x8xf32>
    %153 = arith.subf %149, %152 : vector<8x8xf32>
    %154 = math.exp %153 : vector<8x8xf32>
    %cst_56 = arith.constant dense<0.000000e+00> : vector<8xf32>
    %155 = vector.multi_reduction <add>, %154, %cst_56 [1] : vector<8x8xf32> to vector<8xf32>
    %156 = vector.shape_cast %155 : vector<8xf32> to vector<8x1xf32>
    %157 = vector.broadcast %156 : vector<8x1xf32> to vector<8x8xf32>
    %158 = arith.divf %154, %157 : vector<8x8xf32>
    %cst_57 = arith.constant dense<0.000000e+00> : vector<8x8xf32>
    %159 = tpu.matmul %158, %144, %cst_57 {dimension_numbers = #tpu.dot_dimension_numbers<[1], [0], [0], [1], [0, 0, 1, 1], [], []>} : vector<8x8xf32>, vector<8x8xf32>, vector<8x8xf32> -> vector<8x8xf32>
    %160 = vector.extract_strided_slice %32 {offsets = [8, 0], sizes = [8, 32], strides = [1, 1]} : vector<32x32xf32> to vector<8x32xf32>
    %cst_58 = arith.constant dense<0.000000e+00> : vector<8x32xf32>
    %161 = tpu.matmul %159, %160, %cst_58 {dimension_numbers = #tpu.dot_dimension_numbers<[1], [0], [0], [1], [0, 0, 1, 1], [], []>} : vector<8x8xf32>, vector<8x32xf32>, vector<8x32xf32> -> vector<8x32xf32>
    %162 = arith.addf %141, %161 : vector<8x32xf32>
    %163 = vector.extract_strided_slice %30 {offsets = [8, 16], sizes = [8, 8], strides = [1, 1]} : vector<16x96xf32> to vector<8x8xf32>
    %164 = vector.extract_strided_slice %30 {offsets = [8, 48], sizes = [8, 8], strides = [1, 1]} : vector<16x96xf32> to vector<8x8xf32>
    %165 = vector.extract_strided_slice %30 {offsets = [8, 80], sizes = [8, 8], strides = [1, 1]} : vector<16x96xf32> to vector<8x8xf32>
    %cst_59 = arith.constant dense<0.000000e+00> : vector<8x8xf32>
    %166 = tpu.matmul %163, %164, %cst_59 {dimension_numbers = #tpu.dot_dimension_numbers<[1], [1], [0], [0], [0, 0, 1, 0], [], []>} : vector<8x8xf32>, vector<8x8xf32>, vector<8x8xf32> -> vector<8x8xf32>
    %cst_60 = arith.constant 0.353553385 : f32
    %167 = vector.broadcast %cst_60 : f32 to vector<8x8xf32>
    %168 = arith.mulf %166, %167 : vector<8x8xf32>
    %169 = vector.broadcast %119 : vector<1x8xf32> to vector<8x8xf32>
    %170 = arith.addf %168, %169 : vector<8x8xf32>
    %cst_61 = arith.constant dense<0xFF800000> : vector<8xf32>
    %171 = vector.multi_reduction <maximumf>, %170, %cst_61 [1] : vector<8x8xf32> to vector<8xf32>
    %172 = vector.shape_cast %171 : vector<8xf32> to vector<8x1xf32>
    %173 = vector.broadcast %172 : vector<8x1xf32> to vector<8x8xf32>
    %174 = arith.subf %170, %173 : vector<8x8xf32>
    %175 = math.exp %174 : vector<8x8xf32>
    %cst_62 = arith.constant dense<0.000000e+00> : vector<8xf32>
    %176 = vector.multi_reduction <add>, %175, %cst_62 [1] : vector<8x8xf32> to vector<8xf32>
    %177 = vector.shape_cast %176 : vector<8xf32> to vector<8x1xf32>
    %178 = vector.broadcast %177 : vector<8x1xf32> to vector<8x8xf32>
    %179 = arith.divf %175, %178 : vector<8x8xf32>
    %cst_63 = arith.constant dense<0.000000e+00> : vector<8x8xf32>
    %180 = tpu.matmul %179, %165, %cst_63 {dimension_numbers = #tpu.dot_dimension_numbers<[1], [0], [0], [1], [0, 0, 1, 1], [], []>} : vector<8x8xf32>, vector<8x8xf32>, vector<8x8xf32> -> vector<8x8xf32>
    %181 = vector.extract_strided_slice %32 {offsets = [16, 0], sizes = [8, 32], strides = [1, 1]} : vector<32x32xf32> to vector<8x32xf32>
    %cst_64 = arith.constant dense<0.000000e+00> : vector<8x32xf32>
    %182 = tpu.matmul %180, %181, %cst_64 {dimension_numbers = #tpu.dot_dimension_numbers<[1], [0], [0], [1], [0, 0, 1, 1], [], []>} : vector<8x8xf32>, vector<8x32xf32>, vector<8x32xf32> -> vector<8x32xf32>
    %183 = arith.addf %162, %182 : vector<8x32xf32>
    %184 = vector.extract_strided_slice %30 {offsets = [8, 24], sizes = [8, 8], strides = [1, 1]} : vector<16x96xf32> to vector<8x8xf32>
    %185 = vector.extract_strided_slice %30 {offsets = [8, 56], sizes = [8, 8], strides = [1, 1]} : vector<16x96xf32> to vector<8x8xf32>
    %186 = vector.extract_strided_slice %30 {offsets = [8, 88], sizes = [8, 8], strides = [1, 1]} : vector<16x96xf32> to vector<8x8xf32>
    %cst_65 = arith.constant dense<0.000000e+00> : vector<8x8xf32>
    %187 = tpu.matmul %184, %185, %cst_65 {dimension_numbers = #tpu.dot_dimension_numbers<[1], [1], [0], [0], [0, 0, 1, 0], [], []>} : vector<8x8xf32>, vector<8x8xf32>, vector<8x8xf32> -> vector<8x8xf32>
    %cst_66 = arith.constant 0.353553385 : f32
    %188 = vector.broadcast %cst_66 : f32 to vector<8x8xf32>
    %189 = arith.mulf %187, %188 : vector<8x8xf32>
    %190 = vector.broadcast %119 : vector<1x8xf32> to vector<8x8xf32>
    %191 = arith.addf %189, %190 : vector<8x8xf32>
    %cst_67 = arith.constant dense<0xFF800000> : vector<8xf32>
    %192 = vector.multi_reduction <maximumf>, %191, %cst_67 [1] : vector<8x8xf32> to vector<8xf32>
    %193 = vector.shape_cast %192 : vector<8xf32> to vector<8x1xf32>
    %194 = vector.broadcast %193 : vector<8x1xf32> to vector<8x8xf32>
    %195 = arith.subf %191, %194 : vector<8x8xf32>
    %196 = math.exp %195 : vector<8x8xf32>
    %cst_68 = arith.constant dense<0.000000e+00> : vector<8xf32>
    %197 = vector.multi_reduction <add>, %196, %cst_68 [1] : vector<8x8xf32> to vector<8xf32>
    %198 = vector.shape_cast %197 : vector<8xf32> to vector<8x1xf32>
    %199 = vector.broadcast %198 : vector<8x1xf32> to vector<8x8xf32>
    %200 = arith.divf %196, %199 : vector<8x8xf32>
    %cst_69 = arith.constant dense<0.000000e+00> : vector<8x8xf32>
    %201 = tpu.matmul %200, %186, %cst_69 {dimension_numbers = #tpu.dot_dimension_numbers<[1], [0], [0], [1], [0, 0, 1, 1], [], []>} : vector<8x8xf32>, vector<8x8xf32>, vector<8x8xf32> -> vector<8x8xf32>
    %202 = vector.extract_strided_slice %32 {offsets = [24, 0], sizes = [8, 32], strides = [1, 1]} : vector<32x32xf32> to vector<8x32xf32>
    %cst_70 = arith.constant dense<0.000000e+00> : vector<8x32xf32>
    %203 = tpu.matmul %201, %202, %cst_70 {dimension_numbers = #tpu.dot_dimension_numbers<[1], [0], [0], [1], [0, 0, 1, 1], [], []>} : vector<8x8xf32>, vector<8x32xf32>, vector<8x32xf32> -> vector<8x32xf32>
    %204 = arith.addf %183, %203 : vector<8x32xf32>
    %205 = tpu.concatenate %118, %204 in 0 : vector<8x32xf32>, vector<8x32xf32> -> vector<16x32xf32>
    %c0_71 = arith.constant 0 : index
    %c0_72 = arith.constant 0 : index
    %c0_73 = arith.constant 0 : index
    %206 = vector.load %arg8[%c0_71, %c0_72, %c0_73] : memref<2x1x32xf32, #tpu.memory_space<vmem>>, vector<1x1x32xf32>
    %207 = vector.shape_cast %206 : vector<1x1x32xf32> to vector<1x32xf32>
    %208 = vector.broadcast %207 : vector<1x32xf32> to vector<16x32xf32>
    %209 = arith.addf %205, %208 : vector<16x32xf32>
    %210 = arith.addf %209, %22 : vector<16x32xf32>
    %c0_74 = arith.constant 0 : index
    %c0_75 = arith.constant 0 : index
    %c0_76 = arith.constant 0 : index
    %211 = vector.load %arg9[%c0_74, %c0_75, %c0_76] : memref<2x1x32xf32, #tpu.memory_space<vmem>>, vector<1x1x32xf32>
    %212 = vector.shape_cast %211 : vector<1x1x32xf32> to vector<1x32xf32>
    %c0_77 = arith.constant 0 : index
    %c0_78 = arith.constant 0 : index
    %c0_79 = arith.constant 0 : index
    %213 = vector.load %arg10[%c0_77, %c0_78, %c0_79] : memref<2x1x32xf32, #tpu.memory_space<vmem>>, vector<1x1x32xf32>
    %214 = vector.shape_cast %213 : vector<1x1x32xf32> to vector<1x32xf32>
    %cst_80 = arith.constant dense<0.000000e+00> : vector<16xf32>
    %215 = vector.multi_reduction <add>, %210, %cst_80 [1] : vector<16x32xf32> to vector<16xf32>
    %216 = vector.shape_cast %215 : vector<16xf32> to vector<16x1xf32>
    %cst_81 = arith.constant 3.200000e+01 : f32
    %217 = vector.broadcast %cst_81 : f32 to vector<16x1xf32>
    %218 = arith.divf %216, %217 : vector<16x1xf32>
    %219 = vector.broadcast %218 : vector<16x1xf32> to vector<16x32xf32>
    %220 = arith.subf %210, %219 : vector<16x32xf32>
    %221 = arith.mulf %220, %220 : vector<16x32xf32>
    %cst_82 = arith.constant dense<0.000000e+00> : vector<16xf32>
    %222 = vector.multi_reduction <add>, %221, %cst_82 [1] : vector<16x32xf32> to vector<16xf32>
    %223 = vector.shape_cast %222 : vector<16xf32> to vector<16x1xf32>
    %cst_83 = arith.constant 3.200000e+01 : f32
    %224 = vector.broadcast %cst_83 : f32 to vector<16x1xf32>
    %225 = arith.divf %223, %224 : vector<16x1xf32>
    %cst_84 = arith.constant 9.99999996E-13 : f32
    %226 = vector.broadcast %cst_84 : f32 to vector<16x1xf32>
    %227 = arith.addf %225, %226 : vector<16x1xf32>
    %228 = math.rsqrt %227 : vector<16x1xf32>
    %229 = vector.broadcast %228 : vector<16x1xf32> to vector<16x32xf32>
    %230 = arith.mulf %220, %229 : vector<16x32xf32>
    %231 = vector.broadcast %212 : vector<1x32xf32> to vector<16x32xf32>
    %232 = arith.mulf %230, %231 : vector<16x32xf32>
    %233 = vector.broadcast %214 : vector<1x32xf32> to vector<16x32xf32>
    %234 = arith.addf %232, %233 : vector<16x32xf32>
    %c0_85 = arith.constant 0 : index
    %c0_86 = arith.constant 0 : index
    %c0_87 = arith.constant 0 : index
    %235 = vector.load %arg11[%c0_85, %c0_86, %c0_87] : memref<2x32x64xf32, #tpu.memory_space<vmem>>, vector<1x32x64xf32>
    %236 = vector.shape_cast %235 : vector<1x32x64xf32> to vector<32x64xf32>
    %cst_88 = arith.constant dense<0.000000e+00> : vector<16x64xf32>
    %237 = tpu.matmul %234, %236, %cst_88 {dimension_numbers = #tpu.dot_dimension_numbers<[1], [0], [0], [1], [0, 0, 1, 1], [], []>} : vector<16x32xf32>, vector<32x64xf32>, vector<16x64xf32> -> vector<16x64xf32>
    %c0_89 = arith.constant 0 : index
    %c0_90 = arith.constant 0 : index
    %c0_91 = arith.constant 0 : index
    %238 = vector.load %arg12[%c0_89, %c0_90, %c0_91] : memref<2x1x64xf32, #tpu.memory_space<vmem>>, vector<1x1x64xf32>
    %239 = vector.shape_cast %238 : vector<1x1x64xf32> to vector<1x64xf32>
    %240 = vector.broadcast %239 : vector<1x64xf32> to vector<16x64xf32>
    %241 = arith.addf %237, %240 : vector<16x64xf32>
    %cst_92 = arith.constant 5.000000e-01 : f32
    %242 = vector.broadcast %cst_92 : f32 to vector<16x64xf32>
    %243 = arith.mulf %242, %241 : vector<16x64xf32>
    %cst_93 = arith.constant 4.471500e-02 : f32
    %244 = vector.broadcast %cst_93 : f32 to vector<16x64xf32>
    %245 = arith.mulf %244, %241 : vector<16x64xf32>
    %246 = arith.mulf %245, %241 : vector<16x64xf32>
    %247 = arith.mulf %246, %241 : vector<16x64xf32>
    %248 = arith.addf %241, %247 : vector<16x64xf32>
    %cst_94 = arith.constant 0.797884583 : f32
    %249 = vector.broadcast %cst_94 : f32 to vector<16x64xf32>
    %250 = arith.mulf %249, %248 : vector<16x64xf32>
    %251 = math.tanh %250 : vector<16x64xf32>
    %cst_95 = arith.constant 1.000000e+00 : f32
    %252 = vector.broadcast %cst_95 : f32 to vector<16x64xf32>
    %253 = arith.addf %252, %251 : vector<16x64xf32>
    %254 = arith.mulf %243, %253 : vector<16x64xf32>
    %c0_96 = arith.constant 0 : index
    %c0_97 = arith.constant 0 : index
    %c0_98 = arith.constant 0 : index
    %255 = vector.load %arg13[%c0_96, %c0_97, %c0_98] : memref<2x64x32xf32, #tpu.memory_space<vmem>>, vector<1x64x32xf32>
    %256 = vector.shape_cast %255 : vector<1x64x32xf32> to vector<64x32xf32>
    %cst_99 = arith.constant dense<0.000000e+00> : vector<16x32xf32>
    %257 = tpu.matmul %254, %256, %cst_99 {dimension_numbers = #tpu.dot_dimension_numbers<[1], [0], [0], [1], [0, 0, 1, 1], [], []>} : vector<16x64xf32>, vector<64x32xf32>, vector<16x32xf32> -> vector<16x32xf32>
    %c0_100 = arith.constant 0 : index
    %c0_101 = arith.constant 0 : index
    %c0_102 = arith.constant 0 : index
    %258 = vector.load %arg14[%c0_100, %c0_101, %c0_102] : memref<2x1x32xf32, #tpu.memory_space<vmem>>, vector<1x1x32xf32>
    %259 = vector.shape_cast %258 : vector<1x1x32xf32> to vector<1x32xf32>
    %260 = vector.broadcast %259 : vector<1x32xf32> to vector<16x32xf32>
    %261 = arith.addf %257, %260 : vector<16x32xf32>
    %262 = arith.addf %261, %234 : vector<16x32xf32>
    %c0_103 = arith.constant 0 : index
    %c0_104 = arith.constant 0 : index
    %c0_105 = arith.constant 0 : index
    %263 = vector.load %arg15[%c0_103, %c0_104, %c0_105] : memref<2x1x32xf32, #tpu.memory_space<vmem>>, vector<1x1x32xf32>
    %264 = vector.shape_cast %263 : vector<1x1x32xf32> to vector<1x32xf32>
    %c0_106 = arith.constant 0 : index
    %c0_107 = arith.constant 0 : index
    %c0_108 = arith.constant 0 : index
    %265 = vector.load %arg16[%c0_106, %c0_107, %c0_108] : memref<2x1x32xf32, #tpu.memory_space<vmem>>, vector<1x1x32xf32>
    %266 = vector.shape_cast %265 : vector<1x1x32xf32> to vector<1x32xf32>
    %cst_109 = arith.constant dense<0.000000e+00> : vector<16xf32>
    %267 = vector.multi_reduction <add>, %262, %cst_109 [1] : vector<16x32xf32> to vector<16xf32>
    %268 = vector.shape_cast %267 : vector<16xf32> to vector<16x1xf32>
    %cst_110 = arith.constant 3.200000e+01 : f32
    %269 = vector.broadcast %cst_110 : f32 to vector<16x1xf32>
    %270 = arith.divf %268, %269 : vector<16x1xf32>
    %271 = vector.broadcast %270 : vector<16x1xf32> to vector<16x32xf32>
    %272 = arith.subf %262, %271 : vector<16x32xf32>
    %273 = arith.mulf %272, %272 : vector<16x32xf32>
    %cst_111 = arith.constant dense<0.000000e+00> : vector<16xf32>
    %274 = vector.multi_reduction <add>, %273, %cst_111 [1] : vector<16x32xf32> to vector<16xf32>
    %275 = vector.shape_cast %274 : vector<16xf32> to vector<16x1xf32>
    %cst_112 = arith.constant 3.200000e+01 : f32
    %276 = vector.broadcast %cst_112 : f32 to vector<16x1xf32>
    %277 = arith.divf %275, %276 : vector<16x1xf32>
    %cst_113 = arith.constant 9.99999996E-13 : f32
    %278 = vector.broadcast %cst_113 : f32 to vector<16x1xf32>
    %279 = arith.addf %277, %278 : vector<16x1xf32>
    %280 = math.rsqrt %279 : vector<16x1xf32>
    %281 = vector.broadcast %280 : vector<16x1xf32> to vector<16x32xf32>
    %282 = arith.mulf %272, %281 : vector<16x32xf32>
    %283 = vector.broadcast %264 : vector<1x32xf32> to vector<16x32xf32>
    %284 = arith.mulf %282, %283 : vector<16x32xf32>
    %285 = vector.broadcast %266 : vector<1x32xf32> to vector<16x32xf32>
    %286 = arith.addf %284, %285 : vector<16x32xf32>
    %c1 = arith.constant 1 : index
    %c0_114 = arith.constant 0 : index
    %c0_115 = arith.constant 0 : index
    %287 = vector.load %arg5[%c1, %c0_114, %c0_115] : memref<2x32x96xf32, #tpu.memory_space<vmem>>, vector<1x32x96xf32>
    %288 = vector.shape_cast %287 : vector<1x32x96xf32> to vector<32x96xf32>
    %cst_116 = arith.constant dense<0.000000e+00> : vector<16x96xf32>
    %289 = tpu.matmul %286, %288, %cst_116 {dimension_numbers = #tpu.dot_dimension_numbers<[1], [0], [0], [1], [0, 0, 1, 1], [], []>} : vector<16x32xf32>, vector<32x96xf32>, vector<16x96xf32> -> vector<16x96xf32>
    %c1_117 = arith.constant 1 : index
    %c0_118 = arith.constant 0 : index
    %c0_119 = arith.constant 0 : index
    %290 = vector.load %arg6[%c1_117, %c0_118, %c0_119] : memref<2x1x96xf32, #tpu.memory_space<vmem>>, vector<1x1x96xf32>
    %291 = vector.shape_cast %290 : vector<1x1x96xf32> to vector<1x96xf32>
    %292 = vector.broadcast %291 : vector<1x96xf32> to vector<16x96xf32>
    %293 = arith.addf %289, %292 : vector<16x96xf32>
    %c1_120 = arith.constant 1 : index
    %c0_121 = arith.constant 0 : index
    %c0_122 = arith.constant 0 : index
    %294 = vector.load %arg7[%c1_120, %c0_121, %c0_122] : memref<2x32x32xf32, #tpu.memory_space<vmem>>, vector<1x32x32xf32>
    %295 = vector.shape_cast %294 : vector<1x32x32xf32> to vector<32x32xf32>
    %296 = vector.extract_strided_slice %23 {offsets = [0, 0], sizes = [1, 8], strides = [1, 1]} : vector<2x8xf32> to vector<1x8xf32>
    %cst_123 = arith.constant 0.000000e+00 : f32
    %297 = vector.broadcast %cst_123 : f32 to vector<8x32xf32>
    %298 = vector.extract_strided_slice %293 {offsets = [0, 0], sizes = [8, 8], strides = [1, 1]} : vector<16x96xf32> to vector<8x8xf32>
    %299 = vector.extract_strided_slice %293 {offsets = [0, 32], sizes = [8, 8], strides = [1, 1]} : vector<16x96xf32> to vector<8x8xf32>
    %300 = vector.extract_strided_slice %293 {offsets = [0, 64], sizes = [8, 8], strides = [1, 1]} : vector<16x96xf32> to vector<8x8xf32>
    %cst_124 = arith.constant dense<0.000000e+00> : vector<8x8xf32>
    %301 = tpu.matmul %298, %299, %cst_124 {dimension_numbers = #tpu.dot_dimension_numbers<[1], [1], [0], [0], [0, 0, 1, 0], [], []>} : vector<8x8xf32>, vector<8x8xf32>, vector<8x8xf32> -> vector<8x8xf32>
    %cst_125 = arith.constant 0.353553385 : f32
    %302 = vector.broadcast %cst_125 : f32 to vector<8x8xf32>
    %303 = arith.mulf %301, %302 : vector<8x8xf32>
    %304 = vector.broadcast %296 : vector<1x8xf32> to vector<8x8xf32>
    %305 = arith.addf %303, %304 : vector<8x8xf32>
    %cst_126 = arith.constant dense<0xFF800000> : vector<8xf32>
    %306 = vector.multi_reduction <maximumf>, %305, %cst_126 [1] : vector<8x8xf32> to vector<8xf32>
    %307 = vector.shape_cast %306 : vector<8xf32> to vector<8x1xf32>
    %308 = vector.broadcast %307 : vector<8x1xf32> to vector<8x8xf32>
    %309 = arith.subf %305, %308 : vector<8x8xf32>
    %310 = math.exp %309 : vector<8x8xf32>
    %cst_127 = arith.constant dense<0.000000e+00> : vector<8xf32>
    %311 = vector.multi_reduction <add>, %310, %cst_127 [1] : vector<8x8xf32> to vector<8xf32>
    %312 = vector.shape_cast %311 : vector<8xf32> to vector<8x1xf32>
    %313 = vector.broadcast %312 : vector<8x1xf32> to vector<8x8xf32>
    %314 = arith.divf %310, %313 : vector<8x8xf32>
    %cst_128 = arith.constant dense<0.000000e+00> : vector<8x8xf32>
    %315 = tpu.matmul %314, %300, %cst_128 {dimension_numbers = #tpu.dot_dimension_numbers<[1], [0], [0], [1], [0, 0, 1, 1], [], []>} : vector<8x8xf32>, vector<8x8xf32>, vector<8x8xf32> -> vector<8x8xf32>
    %316 = vector.extract_strided_slice %295 {offsets = [0, 0], sizes = [8, 32], strides = [1, 1]} : vector<32x32xf32> to vector<8x32xf32>
    %cst_129 = arith.constant dense<0.000000e+00> : vector<8x32xf32>
    %317 = tpu.matmul %315, %316, %cst_129 {dimension_numbers = #tpu.dot_dimension_numbers<[1], [0], [0], [1], [0, 0, 1, 1], [], []>} : vector<8x8xf32>, vector<8x32xf32>, vector<8x32xf32> -> vector<8x32xf32>
    %318 = arith.addf %297, %317 : vector<8x32xf32>
    %319 = vector.extract_strided_slice %293 {offsets = [0, 8], sizes = [8, 8], strides = [1, 1]} : vector<16x96xf32> to vector<8x8xf32>
    %320 = vector.extract_strided_slice %293 {offsets = [0, 40], sizes = [8, 8], strides = [1, 1]} : vector<16x96xf32> to vector<8x8xf32>
    %321 = vector.extract_strided_slice %293 {offsets = [0, 72], sizes = [8, 8], strides = [1, 1]} : vector<16x96xf32> to vector<8x8xf32>
    %cst_130 = arith.constant dense<0.000000e+00> : vector<8x8xf32>
    %322 = tpu.matmul %319, %320, %cst_130 {dimension_numbers = #tpu.dot_dimension_numbers<[1], [1], [0], [0], [0, 0, 1, 0], [], []>} : vector<8x8xf32>, vector<8x8xf32>, vector<8x8xf32> -> vector<8x8xf32>
    %cst_131 = arith.constant 0.353553385 : f32
    %323 = vector.broadcast %cst_131 : f32 to vector<8x8xf32>
    %324 = arith.mulf %322, %323 : vector<8x8xf32>
    %325 = vector.broadcast %296 : vector<1x8xf32> to vector<8x8xf32>
    %326 = arith.addf %324, %325 : vector<8x8xf32>
    %cst_132 = arith.constant dense<0xFF800000> : vector<8xf32>
    %327 = vector.multi_reduction <maximumf>, %326, %cst_132 [1] : vector<8x8xf32> to vector<8xf32>
    %328 = vector.shape_cast %327 : vector<8xf32> to vector<8x1xf32>
    %329 = vector.broadcast %328 : vector<8x1xf32> to vector<8x8xf32>
    %330 = arith.subf %326, %329 : vector<8x8xf32>
    %331 = math.exp %330 : vector<8x8xf32>
    %cst_133 = arith.constant dense<0.000000e+00> : vector<8xf32>
    %332 = vector.multi_reduction <add>, %331, %cst_133 [1] : vector<8x8xf32> to vector<8xf32>
    %333 = vector.shape_cast %332 : vector<8xf32> to vector<8x1xf32>
    %334 = vector.broadcast %333 : vector<8x1xf32> to vector<8x8xf32>
    %335 = arith.divf %331, %334 : vector<8x8xf32>
    %cst_134 = arith.constant dense<0.000000e+00> : vector<8x8xf32>
    %336 = tpu.matmul %335, %321, %cst_134 {dimension_numbers = #tpu.dot_dimension_numbers<[1], [0], [0], [1], [0, 0, 1, 1], [], []>} : vector<8x8xf32>, vector<8x8xf32>, vector<8x8xf32> -> vector<8x8xf32>
    %337 = vector.extract_strided_slice %295 {offsets = [8, 0], sizes = [8, 32], strides = [1, 1]} : vector<32x32xf32> to vector<8x32xf32>
    %cst_135 = arith.constant dense<0.000000e+00> : vector<8x32xf32>
    %338 = tpu.matmul %336, %337, %cst_135 {dimension_numbers = #tpu.dot_dimension_numbers<[1], [0], [0], [1], [0, 0, 1, 1], [], []>} : vector<8x8xf32>, vector<8x32xf32>, vector<8x32xf32> -> vector<8x32xf32>
    %339 = arith.addf %318, %338 : vector<8x32xf32>
    %340 = vector.extract_strided_slice %293 {offsets = [0, 16], sizes = [8, 8], strides = [1, 1]} : vector<16x96xf32> to vector<8x8xf32>
    %341 = vector.extract_strided_slice %293 {offsets = [0, 48], sizes = [8, 8], strides = [1, 1]} : vector<16x96xf32> to vector<8x8xf32>
    %342 = vector.extract_strided_slice %293 {offsets = [0, 80], sizes = [8, 8], strides = [1, 1]} : vector<16x96xf32> to vector<8x8xf32>
    %cst_136 = arith.constant dense<0.000000e+00> : vector<8x8xf32>
    %343 = tpu.matmul %340, %341, %cst_136 {dimension_numbers = #tpu.dot_dimension_numbers<[1], [1], [0], [0], [0, 0, 1, 0], [], []>} : vector<8x8xf32>, vector<8x8xf32>, vector<8x8xf32> -> vector<8x8xf32>
    %cst_137 = arith.constant 0.353553385 : f32
    %344 = vector.broadcast %cst_137 : f32 to vector<8x8xf32>
    %345 = arith.mulf %343, %344 : vector<8x8xf32>
    %346 = vector.broadcast %296 : vector<1x8xf32> to vector<8x8xf32>
    %347 = arith.addf %345, %346 : vector<8x8xf32>
    %cst_138 = arith.constant dense<0xFF800000> : vector<8xf32>
    %348 = vector.multi_reduction <maximumf>, %347, %cst_138 [1] : vector<8x8xf32> to vector<8xf32>
    %349 = vector.shape_cast %348 : vector<8xf32> to vector<8x1xf32>
    %350 = vector.broadcast %349 : vector<8x1xf32> to vector<8x8xf32>
    %351 = arith.subf %347, %350 : vector<8x8xf32>
    %352 = math.exp %351 : vector<8x8xf32>
    %cst_139 = arith.constant dense<0.000000e+00> : vector<8xf32>
    %353 = vector.multi_reduction <add>, %352, %cst_139 [1] : vector<8x8xf32> to vector<8xf32>
    %354 = vector.shape_cast %353 : vector<8xf32> to vector<8x1xf32>
    %355 = vector.broadcast %354 : vector<8x1xf32> to vector<8x8xf32>
    %356 = arith.divf %352, %355 : vector<8x8xf32>
    %cst_140 = arith.constant dense<0.000000e+00> : vector<8x8xf32>
    %357 = tpu.matmul %356, %342, %cst_140 {dimension_numbers = #tpu.dot_dimension_numbers<[1], [0], [0], [1], [0, 0, 1, 1], [], []>} : vector<8x8xf32>, vector<8x8xf32>, vector<8x8xf32> -> vector<8x8xf32>
    %358 = vector.extract_strided_slice %295 {offsets = [16, 0], sizes = [8, 32], strides = [1, 1]} : vector<32x32xf32> to vector<8x32xf32>
    %cst_141 = arith.constant dense<0.000000e+00> : vector<8x32xf32>
    %359 = tpu.matmul %357, %358, %cst_141 {dimension_numbers = #tpu.dot_dimension_numbers<[1], [0], [0], [1], [0, 0, 1, 1], [], []>} : vector<8x8xf32>, vector<8x32xf32>, vector<8x32xf32> -> vector<8x32xf32>
    %360 = arith.addf %339, %359 : vector<8x32xf32>
    %361 = vector.extract_strided_slice %293 {offsets = [0, 24], sizes = [8, 8], strides = [1, 1]} : vector<16x96xf32> to vector<8x8xf32>
    %362 = vector.extract_strided_slice %293 {offsets = [0, 56], sizes = [8, 8], strides = [1, 1]} : vector<16x96xf32> to vector<8x8xf32>
    %363 = vector.extract_strided_slice %293 {offsets = [0, 88], sizes = [8, 8], strides = [1, 1]} : vector<16x96xf32> to vector<8x8xf32>
    %cst_142 = arith.constant dense<0.000000e+00> : vector<8x8xf32>
    %364 = tpu.matmul %361, %362, %cst_142 {dimension_numbers = #tpu.dot_dimension_numbers<[1], [1], [0], [0], [0, 0, 1, 0], [], []>} : vector<8x8xf32>, vector<8x8xf32>, vector<8x8xf32> -> vector<8x8xf32>
    %cst_143 = arith.constant 0.353553385 : f32
    %365 = vector.broadcast %cst_143 : f32 to vector<8x8xf32>
    %366 = arith.mulf %364, %365 : vector<8x8xf32>
    %367 = vector.broadcast %296 : vector<1x8xf32> to vector<8x8xf32>
    %368 = arith.addf %366, %367 : vector<8x8xf32>
    %cst_144 = arith.constant dense<0xFF800000> : vector<8xf32>
    %369 = vector.multi_reduction <maximumf>, %368, %cst_144 [1] : vector<8x8xf32> to vector<8xf32>
    %370 = vector.shape_cast %369 : vector<8xf32> to vector<8x1xf32>
    %371 = vector.broadcast %370 : vector<8x1xf32> to vector<8x8xf32>
    %372 = arith.subf %368, %371 : vector<8x8xf32>
    %373 = math.exp %372 : vector<8x8xf32>
    %cst_145 = arith.constant dense<0.000000e+00> : vector<8xf32>
    %374 = vector.multi_reduction <add>, %373, %cst_145 [1] : vector<8x8xf32> to vector<8xf32>
    %375 = vector.shape_cast %374 : vector<8xf32> to vector<8x1xf32>
    %376 = vector.broadcast %375 : vector<8x1xf32> to vector<8x8xf32>
    %377 = arith.divf %373, %376 : vector<8x8xf32>
    %cst_146 = arith.constant dense<0.000000e+00> : vector<8x8xf32>
    %378 = tpu.matmul %377, %363, %cst_146 {dimension_numbers = #tpu.dot_dimension_numbers<[1], [0], [0], [1], [0, 0, 1, 1], [], []>} : vector<8x8xf32>, vector<8x8xf32>, vector<8x8xf32> -> vector<8x8xf32>
    %379 = vector.extract_strided_slice %295 {offsets = [24, 0], sizes = [8, 32], strides = [1, 1]} : vector<32x32xf32> to vector<8x32xf32>
    %cst_147 = arith.constant dense<0.000000e+00> : vector<8x32xf32>
    %380 = tpu.matmul %378, %379, %cst_147 {dimension_numbers = #tpu.dot_dimension_numbers<[1], [0], [0], [1], [0, 0, 1, 1], [], []>} : vector<8x8xf32>, vector<8x32xf32>, vector<8x32xf32> -> vector<8x32xf32>
    %381 = arith.addf %360, %380 : vector<8x32xf32>
    %382 = vector.extract_strided_slice %23 {offsets = [1, 0], sizes = [1, 8], strides = [1, 1]} : vector<2x8xf32> to vector<1x8xf32>
    %cst_148 = arith.constant 0.000000e+00 : f32
    %383 = vector.broadcast %cst_148 : f32 to vector<8x32xf32>
    %384 = vector.extract_strided_slice %293 {offsets = [8, 0], sizes = [8, 8], strides = [1, 1]} : vector<16x96xf32> to vector<8x8xf32>
    %385 = vector.extract_strided_slice %293 {offsets = [8, 32], sizes = [8, 8], strides = [1, 1]} : vector<16x96xf32> to vector<8x8xf32>
    %386 = vector.extract_strided_slice %293 {offsets = [8, 64], sizes = [8, 8], strides = [1, 1]} : vector<16x96xf32> to vector<8x8xf32>
    %cst_149 = arith.constant dense<0.000000e+00> : vector<8x8xf32>
    %387 = tpu.matmul %384, %385, %cst_149 {dimension_numbers = #tpu.dot_dimension_numbers<[1], [1], [0], [0], [0, 0, 1, 0], [], []>} : vector<8x8xf32>, vector<8x8xf32>, vector<8x8xf32> -> vector<8x8xf32>
    %cst_150 = arith.constant 0.353553385 : f32
    %388 = vector.broadcast %cst_150 : f32 to vector<8x8xf32>
    %389 = arith.mulf %387, %388 : vector<8x8xf32>
    %390 = vector.broadcast %382 : vector<1x8xf32> to vector<8x8xf32>
    %391 = arith.addf %389, %390 : vector<8x8xf32>
    %cst_151 = arith.constant dense<0xFF800000> : vector<8xf32>
    %392 = vector.multi_reduction <maximumf>, %391, %cst_151 [1] : vector<8x8xf32> to vector<8xf32>
    %393 = vector.shape_cast %392 : vector<8xf32> to vector<8x1xf32>
    %394 = vector.broadcast %393 : vector<8x1xf32> to vector<8x8xf32>
    %395 = arith.subf %391, %394 : vector<8x8xf32>
    %396 = math.exp %395 : vector<8x8xf32>
    %cst_152 = arith.constant dense<0.000000e+00> : vector<8xf32>
    %397 = vector.multi_reduction <add>, %396, %cst_152 [1] : vector<8x8xf32> to vector<8xf32>
    %398 = vector.shape_cast %397 : vector<8xf32> to vector<8x1xf32>
    %399 = vector.broadcast %398 : vector<8x1xf32> to vector<8x8xf32>
    %400 = arith.divf %396, %399 : vector<8x8xf32>
    %cst_153 = arith.constant dense<0.000000e+00> : vector<8x8xf32>
    %401 = tpu.matmul %400, %386, %cst_153 {dimension_numbers = #tpu.dot_dimension_numbers<[1], [0], [0], [1], [0, 0, 1, 1], [], []>} : vector<8x8xf32>, vector<8x8xf32>, vector<8x8xf32> -> vector<8x8xf32>
    %402 = vector.extract_strided_slice %295 {offsets = [0, 0], sizes = [8, 32], strides = [1, 1]} : vector<32x32xf32> to vector<8x32xf32>
    %cst_154 = arith.constant dense<0.000000e+00> : vector<8x32xf32>
    %403 = tpu.matmul %401, %402, %cst_154 {dimension_numbers = #tpu.dot_dimension_numbers<[1], [0], [0], [1], [0, 0, 1, 1], [], []>} : vector<8x8xf32>, vector<8x32xf32>, vector<8x32xf32> -> vector<8x32xf32>
    %404 = arith.addf %383, %403 : vector<8x32xf32>
    %405 = vector.extract_strided_slice %293 {offsets = [8, 8], sizes = [8, 8], strides = [1, 1]} : vector<16x96xf32> to vector<8x8xf32>
    %406 = vector.extract_strided_slice %293 {offsets = [8, 40], sizes = [8, 8], strides = [1, 1]} : vector<16x96xf32> to vector<8x8xf32>
    %407 = vector.extract_strided_slice %293 {offsets = [8, 72], sizes = [8, 8], strides = [1, 1]} : vector<16x96xf32> to vector<8x8xf32>
    %cst_155 = arith.constant dense<0.000000e+00> : vector<8x8xf32>
    %408 = tpu.matmul %405, %406, %cst_155 {dimension_numbers = #tpu.dot_dimension_numbers<[1], [1], [0], [0], [0, 0, 1, 0], [], []>} : vector<8x8xf32>, vector<8x8xf32>, vector<8x8xf32> -> vector<8x8xf32>
    %cst_156 = arith.constant 0.353553385 : f32
    %409 = vector.broadcast %cst_156 : f32 to vector<8x8xf32>
    %410 = arith.mulf %408, %409 : vector<8x8xf32>
    %411 = vector.broadcast %382 : vector<1x8xf32> to vector<8x8xf32>
    %412 = arith.addf %410, %411 : vector<8x8xf32>
    %cst_157 = arith.constant dense<0xFF800000> : vector<8xf32>
    %413 = vector.multi_reduction <maximumf>, %412, %cst_157 [1] : vector<8x8xf32> to vector<8xf32>
    %414 = vector.shape_cast %413 : vector<8xf32> to vector<8x1xf32>
    %415 = vector.broadcast %414 : vector<8x1xf32> to vector<8x8xf32>
    %416 = arith.subf %412, %415 : vector<8x8xf32>
    %417 = math.exp %416 : vector<8x8xf32>
    %cst_158 = arith.constant dense<0.000000e+00> : vector<8xf32>
    %418 = vector.multi_reduction <add>, %417, %cst_158 [1] : vector<8x8xf32> to vector<8xf32>
    %419 = vector.shape_cast %418 : vector<8xf32> to vector<8x1xf32>
    %420 = vector.broadcast %419 : vector<8x1xf32> to vector<8x8xf32>
    %421 = arith.divf %417, %420 : vector<8x8xf32>
    %cst_159 = arith.constant dense<0.000000e+00> : vector<8x8xf32>
    %422 = tpu.matmul %421, %407, %cst_159 {dimension_numbers = #tpu.dot_dimension_numbers<[1], [0], [0], [1], [0, 0, 1, 1], [], []>} : vector<8x8xf32>, vector<8x8xf32>, vector<8x8xf32> -> vector<8x8xf32>
    %423 = vector.extract_strided_slice %295 {offsets = [8, 0], sizes = [8, 32], strides = [1, 1]} : vector<32x32xf32> to vector<8x32xf32>
    %cst_160 = arith.constant dense<0.000000e+00> : vector<8x32xf32>
    %424 = tpu.matmul %422, %423, %cst_160 {dimension_numbers = #tpu.dot_dimension_numbers<[1], [0], [0], [1], [0, 0, 1, 1], [], []>} : vector<8x8xf32>, vector<8x32xf32>, vector<8x32xf32> -> vector<8x32xf32>
    %425 = arith.addf %404, %424 : vector<8x32xf32>
    %426 = vector.extract_strided_slice %293 {offsets = [8, 16], sizes = [8, 8], strides = [1, 1]} : vector<16x96xf32> to vector<8x8xf32>
    %427 = vector.extract_strided_slice %293 {offsets = [8, 48], sizes = [8, 8], strides = [1, 1]} : vector<16x96xf32> to vector<8x8xf32>
    %428 = vector.extract_strided_slice %293 {offsets = [8, 80], sizes = [8, 8], strides = [1, 1]} : vector<16x96xf32> to vector<8x8xf32>
    %cst_161 = arith.constant dense<0.000000e+00> : vector<8x8xf32>
    %429 = tpu.matmul %426, %427, %cst_161 {dimension_numbers = #tpu.dot_dimension_numbers<[1], [1], [0], [0], [0, 0, 1, 0], [], []>} : vector<8x8xf32>, vector<8x8xf32>, vector<8x8xf32> -> vector<8x8xf32>
    %cst_162 = arith.constant 0.353553385 : f32
    %430 = vector.broadcast %cst_162 : f32 to vector<8x8xf32>
    %431 = arith.mulf %429, %430 : vector<8x8xf32>
    %432 = vector.broadcast %382 : vector<1x8xf32> to vector<8x8xf32>
    %433 = arith.addf %431, %432 : vector<8x8xf32>
    %cst_163 = arith.constant dense<0xFF800000> : vector<8xf32>
    %434 = vector.multi_reduction <maximumf>, %433, %cst_163 [1] : vector<8x8xf32> to vector<8xf32>
    %435 = vector.shape_cast %434 : vector<8xf32> to vector<8x1xf32>
    %436 = vector.broadcast %435 : vector<8x1xf32> to vector<8x8xf32>
    %437 = arith.subf %433, %436 : vector<8x8xf32>
    %438 = math.exp %437 : vector<8x8xf32>
    %cst_164 = arith.constant dense<0.000000e+00> : vector<8xf32>
    %439 = vector.multi_reduction <add>, %438, %cst_164 [1] : vector<8x8xf32> to vector<8xf32>
    %440 = vector.shape_cast %439 : vector<8xf32> to vector<8x1xf32>
    %441 = vector.broadcast %440 : vector<8x1xf32> to vector<8x8xf32>
    %442 = arith.divf %438, %441 : vector<8x8xf32>
    %cst_165 = arith.constant dense<0.000000e+00> : vector<8x8xf32>
    %443 = tpu.matmul %442, %428, %cst_165 {dimension_numbers = #tpu.dot_dimension_numbers<[1], [0], [0], [1], [0, 0, 1, 1], [], []>} : vector<8x8xf32>, vector<8x8xf32>, vector<8x8xf32> -> vector<8x8xf32>
    %444 = vector.extract_strided_slice %295 {offsets = [16, 0], sizes = [8, 32], strides = [1, 1]} : vector<32x32xf32> to vector<8x32xf32>
    %cst_166 = arith.constant dense<0.000000e+00> : vector<8x32xf32>
    %445 = tpu.matmul %443, %444, %cst_166 {dimension_numbers = #tpu.dot_dimension_numbers<[1], [0], [0], [1], [0, 0, 1, 1], [], []>} : vector<8x8xf32>, vector<8x32xf32>, vector<8x32xf32> -> vector<8x32xf32>
    %446 = arith.addf %425, %445 : vector<8x32xf32>
    %447 = vector.extract_strided_slice %293 {offsets = [8, 24], sizes = [8, 8], strides = [1, 1]} : vector<16x96xf32> to vector<8x8xf32>
    %448 = vector.extract_strided_slice %293 {offsets = [8, 56], sizes = [8, 8], strides = [1, 1]} : vector<16x96xf32> to vector<8x8xf32>
    %449 = vector.extract_strided_slice %293 {offsets = [8, 88], sizes = [8, 8], strides = [1, 1]} : vector<16x96xf32> to vector<8x8xf32>
    %cst_167 = arith.constant dense<0.000000e+00> : vector<8x8xf32>
    %450 = tpu.matmul %447, %448, %cst_167 {dimension_numbers = #tpu.dot_dimension_numbers<[1], [1], [0], [0], [0, 0, 1, 0], [], []>} : vector<8x8xf32>, vector<8x8xf32>, vector<8x8xf32> -> vector<8x8xf32>
    %cst_168 = arith.constant 0.353553385 : f32
    %451 = vector.broadcast %cst_168 : f32 to vector<8x8xf32>
    %452 = arith.mulf %450, %451 : vector<8x8xf32>
    %453 = vector.broadcast %382 : vector<1x8xf32> to vector<8x8xf32>
    %454 = arith.addf %452, %453 : vector<8x8xf32>
    %cst_169 = arith.constant dense<0xFF800000> : vector<8xf32>
    %455 = vector.multi_reduction <maximumf>, %454, %cst_169 [1] : vector<8x8xf32> to vector<8xf32>
    %456 = vector.shape_cast %455 : vector<8xf32> to vector<8x1xf32>
    %457 = vector.broadcast %456 : vector<8x1xf32> to vector<8x8xf32>
    %458 = arith.subf %454, %457 : vector<8x8xf32>
    %459 = math.exp %458 : vector<8x8xf32>
    %cst_170 = arith.constant dense<0.000000e+00> : vector<8xf32>
    %460 = vector.multi_reduction <add>, %459, %cst_170 [1] : vector<8x8xf32> to vector<8xf32>
    %461 = vector.shape_cast %460 : vector<8xf32> to vector<8x1xf32>
    %462 = vector.broadcast %461 : vector<8x1xf32> to vector<8x8xf32>
    %463 = arith.divf %459, %462 : vector<8x8xf32>
    %cst_171 = arith.constant dense<0.000000e+00> : vector<8x8xf32>
    %464 = tpu.matmul %463, %449, %cst_171 {dimension_numbers = #tpu.dot_dimension_numbers<[1], [0], [0], [1], [0, 0, 1, 1], [], []>} : vector<8x8xf32>, vector<8x8xf32>, vector<8x8xf32> -> vector<8x8xf32>
    %465 = vector.extract_strided_slice %295 {offsets = [24, 0], sizes = [8, 32], strides = [1, 1]} : vector<32x32xf32> to vector<8x32xf32>
    %cst_172 = arith.constant dense<0.000000e+00> : vector<8x32xf32>
    %466 = tpu.matmul %464, %465, %cst_172 {dimension_numbers = #tpu.dot_dimension_numbers<[1], [0], [0], [1], [0, 0, 1, 1], [], []>} : vector<8x8xf32>, vector<8x32xf32>, vector<8x32xf32> -> vector<8x32xf32>
    %467 = arith.addf %446, %466 : vector<8x32xf32>
    %468 = tpu.concatenate %381, %467 in 0 : vector<8x32xf32>, vector<8x32xf32> -> vector<16x32xf32>
    %c1_173 = arith.constant 1 : index
    %c0_174 = arith.constant 0 : index
    %c0_175 = arith.constant 0 : index
    %469 = vector.load %arg8[%c1_173, %c0_174, %c0_175] : memref<2x1x32xf32, #tpu.memory_space<vmem>>, vector<1x1x32xf32>
    %470 = vector.shape_cast %469 : vector<1x1x32xf32> to vector<1x32xf32>
    %471 = vector.broadcast %470 : vector<1x32xf32> to vector<16x32xf32>
    %472 = arith.addf %468, %471 : vector<16x32xf32>
    %473 = arith.addf %472, %286 : vector<16x32xf32>
    %c1_176 = arith.constant 1 : index
    %c0_177 = arith.constant 0 : index
    %c0_178 = arith.constant 0 : index
    %474 = vector.load %arg9[%c1_176, %c0_177, %c0_178] : memref<2x1x32xf32, #tpu.memory_space<vmem>>, vector<1x1x32xf32>
    %475 = vector.shape_cast %474 : vector<1x1x32xf32> to vector<1x32xf32>
    %c1_179 = arith.constant 1 : index
    %c0_180 = arith.constant 0 : index
    %c0_181 = arith.constant 0 : index
    %476 = vector.load %arg10[%c1_179, %c0_180, %c0_181] : memref<2x1x32xf32, #tpu.memory_space<vmem>>, vector<1x1x32xf32>
    %477 = vector.shape_cast %476 : vector<1x1x32xf32> to vector<1x32xf32>
    %cst_182 = arith.constant dense<0.000000e+00> : vector<16xf32>
    %478 = vector.multi_reduction <add>, %473, %cst_182 [1] : vector<16x32xf32> to vector<16xf32>
    %479 = vector.shape_cast %478 : vector<16xf32> to vector<16x1xf32>
    %cst_183 = arith.constant 3.200000e+01 : f32
    %480 = vector.broadcast %cst_183 : f32 to vector<16x1xf32>
    %481 = arith.divf %479, %480 : vector<16x1xf32>
    %482 = vector.broadcast %481 : vector<16x1xf32> to vector<16x32xf32>
    %483 = arith.subf %473, %482 : vector<16x32xf32>
    %484 = arith.mulf %483, %483 : vector<16x32xf32>
    %cst_184 = arith.constant dense<0.000000e+00> : vector<16xf32>
    %485 = vector.multi_reduction <add>, %484, %cst_184 [1] : vector<16x32xf32> to vector<16xf32>
    %486 = vector.shape_cast %485 : vector<16xf32> to vector<16x1xf32>
    %cst_185 = arith.constant 3.200000e+01 : f32
    %487 = vector.broadcast %cst_185 : f32 to vector<16x1xf32>
    %488 = arith.divf %486, %487 : vector<16x1xf32>
    %cst_186 = arith.constant 9.99999996E-13 : f32
    %489 = vector.broadcast %cst_186 : f32 to vector<16x1xf32>
    %490 = arith.addf %488, %489 : vector<16x1xf32>
    %491 = math.rsqrt %490 : vector<16x1xf32>
    %492 = vector.broadcast %491 : vector<16x1xf32> to vector<16x32xf32>
    %493 = arith.mulf %483, %492 : vector<16x32xf32>
    %494 = vector.broadcast %475 : vector<1x32xf32> to vector<16x32xf32>
    %495 = arith.mulf %493, %494 : vector<16x32xf32>
    %496 = vector.broadcast %477 : vector<1x32xf32> to vector<16x32xf32>
    %497 = arith.addf %495, %496 : vector<16x32xf32>
    %c1_187 = arith.constant 1 : index
    %c0_188 = arith.constant 0 : index
    %c0_189 = arith.constant 0 : index
    %498 = vector.load %arg11[%c1_187, %c0_188, %c0_189] : memref<2x32x64xf32, #tpu.memory_space<vmem>>, vector<1x32x64xf32>
    %499 = vector.shape_cast %498 : vector<1x32x64xf32> to vector<32x64xf32>
    %cst_190 = arith.constant dense<0.000000e+00> : vector<16x64xf32>
    %500 = tpu.matmul %497, %499, %cst_190 {dimension_numbers = #tpu.dot_dimension_numbers<[1], [0], [0], [1], [0, 0, 1, 1], [], []>} : vector<16x32xf32>, vector<32x64xf32>, vector<16x64xf32> -> vector<16x64xf32>
    %c1_191 = arith.constant 1 : index
    %c0_192 = arith.constant 0 : index
    %c0_193 = arith.constant 0 : index
    %501 = vector.load %arg12[%c1_191, %c0_192, %c0_193] : memref<2x1x64xf32, #tpu.memory_space<vmem>>, vector<1x1x64xf32>
    %502 = vector.shape_cast %501 : vector<1x1x64xf32> to vector<1x64xf32>
    %503 = vector.broadcast %502 : vector<1x64xf32> to vector<16x64xf32>
    %504 = arith.addf %500, %503 : vector<16x64xf32>
    %cst_194 = arith.constant 5.000000e-01 : f32
    %505 = vector.broadcast %cst_194 : f32 to vector<16x64xf32>
    %506 = arith.mulf %505, %504 : vector<16x64xf32>
    %cst_195 = arith.constant 4.471500e-02 : f32
    %507 = vector.broadcast %cst_195 : f32 to vector<16x64xf32>
    %508 = arith.mulf %507, %504 : vector<16x64xf32>
    %509 = arith.mulf %508, %504 : vector<16x64xf32>
    %510 = arith.mulf %509, %504 : vector<16x64xf32>
    %511 = arith.addf %504, %510 : vector<16x64xf32>
    %cst_196 = arith.constant 0.797884583 : f32
    %512 = vector.broadcast %cst_196 : f32 to vector<16x64xf32>
    %513 = arith.mulf %512, %511 : vector<16x64xf32>
    %514 = math.tanh %513 : vector<16x64xf32>
    %cst_197 = arith.constant 1.000000e+00 : f32
    %515 = vector.broadcast %cst_197 : f32 to vector<16x64xf32>
    %516 = arith.addf %515, %514 : vector<16x64xf32>
    %517 = arith.mulf %506, %516 : vector<16x64xf32>
    %c1_198 = arith.constant 1 : index
    %c0_199 = arith.constant 0 : index
    %c0_200 = arith.constant 0 : index
    %518 = vector.load %arg13[%c1_198, %c0_199, %c0_200] : memref<2x64x32xf32, #tpu.memory_space<vmem>>, vector<1x64x32xf32>
    %519 = vector.shape_cast %518 : vector<1x64x32xf32> to vector<64x32xf32>
    %cst_201 = arith.constant dense<0.000000e+00> : vector<16x32xf32>
    %520 = tpu.matmul %517, %519, %cst_201 {dimension_numbers = #tpu.dot_dimension_numbers<[1], [0], [0], [1], [0, 0, 1, 1], [], []>} : vector<16x64xf32>, vector<64x32xf32>, vector<16x32xf32> -> vector<16x32xf32>
    %c1_202 = arith.constant 1 : index
    %c0_203 = arith.constant 0 : index
    %c0_204 = arith.constant 0 : index
    %521 = vector.load %arg14[%c1_202, %c0_203, %c0_204] : memref<2x1x32xf32, #tpu.memory_space<vmem>>, vector<1x1x32xf32>
    %522 = vector.shape_cast %521 : vector<1x1x32xf32> to vector<1x32xf32>
    %523 = vector.broadcast %522 : vector<1x32xf32> to vector<16x32xf32>
    %524 = arith.addf %520, %523 : vector<16x32xf32>
    %525 = arith.addf %524, %497 : vector<16x32xf32>
    %c1_205 = arith.constant 1 : index
    %c0_206 = arith.constant 0 : index
    %c0_207 = arith.constant 0 : index
    %526 = vector.load %arg15[%c1_205, %c0_206, %c0_207] : memref<2x1x32xf32, #tpu.memory_space<vmem>>, vector<1x1x32xf32>
    %527 = vector.shape_cast %526 : vector<1x1x32xf32> to vector<1x32xf32>
    %c1_208 = arith.constant 1 : index
    %c0_209 = arith.constant 0 : index
    %c0_210 = arith.constant 0 : index
    %528 = vector.load %arg16[%c1_208, %c0_209, %c0_210] : memref<2x1x32xf32, #tpu.memory_space<vmem>>, vector<1x1x32xf32>
    %529 = vector.shape_cast %528 : vector<1x1x32xf32> to vector<1x32xf32>
    %cst_211 = arith.constant dense<0.000000e+00> : vector<16xf32>
    %530 = vector.multi_reduction <add>, %525, %cst_211 [1] : vector<16x32xf32> to vector<16xf32>
    %531 = vector.shape_cast %530 : vector<16xf32> to vector<16x1xf32>
    %cst_212 = arith.constant 3.200000e+01 : f32
    %532 = vector.broadcast %cst_212 : f32 to vector<16x1xf32>
    %533 = arith.divf %531, %532 : vector<16x1xf32>
    %534 = vector.broadcast %533 : vector<16x1xf32> to vector<16x32xf32>
    %535 = arith.subf %525, %534 : vector<16x32xf32>
    %536 = arith.mulf %535, %535 : vector<16x32xf32>
    %cst_213 = arith.constant dense<0.000000e+00> : vector<16xf32>
    %537 = vector.multi_reduction <add>, %536, %cst_213 [1] : vector<16x32xf32> to vector<16xf32>
    %538 = vector.shape_cast %537 : vector<16xf32> to vector<16x1xf32>
    %cst_214 = arith.constant 3.200000e+01 : f32
    %539 = vector.broadcast %cst_214 : f32 to vector<16x1xf32>
    %540 = arith.divf %538, %539 : vector<16x1xf32>
    %cst_215 = arith.constant 9.99999996E-13 : f32
    %541 = vector.broadcast %cst_215 : f32 to vector<16x1xf32>
    %542 = arith.addf %540, %541 : vector<16x1xf32>
    %543 = math.rsqrt %542 : vector<16x1xf32>
    %544 = vector.broadcast %543 : vector<16x1xf32> to vector<16x32xf32>
    %545 = arith.mulf %535, %544 : vector<16x32xf32>
    %546 = vector.broadcast %527 : vector<1x32xf32> to vector<16x32xf32>
    %547 = arith.mulf %545, %546 : vector<16x32xf32>
    %548 = vector.broadcast %529 : vector<1x32xf32> to vector<16x32xf32>
    %549 = arith.addf %547, %548 : vector<16x32xf32>
    %c0_216 = arith.constant 0 : index
    %c0_217 = arith.constant 0 : index
    %550 = vector.load %arg17[%c0_216, %c0_217] : memref<32x32xf32, #tpu.memory_space<vmem>>, vector<32x32xf32>
    %cst_218 = arith.constant dense<0.000000e+00> : vector<16x32xf32>
    %551 = tpu.matmul %549, %550, %cst_218 {dimension_numbers = #tpu.dot_dimension_numbers<[1], [0], [0], [1], [0, 0, 1, 1], [], []>} : vector<16x32xf32>, vector<32x32xf32>, vector<16x32xf32> -> vector<16x32xf32>
    %c0_219 = arith.constant 0 : index
    %c0_220 = arith.constant 0 : index
    %552 = vector.load %arg18[%c0_219, %c0_220] : memref<1x32xf32, #tpu.memory_space<vmem>>, vector<1x32xf32>
    %553 = vector.broadcast %552 : vector<1x32xf32> to vector<16x32xf32>
    %554 = arith.addf %551, %553 : vector<16x32xf32>
    %555 = math.tanh %554 : vector<16x32xf32>
    %c0_221 = arith.constant 0 : index
    %c0_222 = arith.constant 0 : index
    %556 = vector.load %arg19[%c0_221, %c0_222] : memref<32x128xf32, #tpu.memory_space<vmem>>, vector<32x128xf32>
    %cst_223 = arith.constant dense<0.000000e+00> : vector<16x128xf32>
    %557 = tpu.matmul %555, %556, %cst_223 {dimension_numbers = #tpu.dot_dimension_numbers<[1], [0], [0], [1], [0, 0, 1, 1], [], []>} : vector<16x32xf32>, vector<32x128xf32>, vector<16x128xf32> -> vector<16x128xf32>
    %c0_224 = arith.constant 0 : index
    %c0_225 = arith.constant 0 : index
    %558 = vector.load %arg20[%c0_224, %c0_225] : memref<1x128xf32, #tpu.memory_space<vmem>>, vector<1x128xf32>
    %559 = vector.broadcast %558 : vector<1x128xf32> to vector<16x128xf32>
    %560 = arith.addf %557, %559 : vector<16x128xf32>
    %c0_226 = arith.constant 0 : index
    %c0_227 = arith.constant 0 : index
    %561 = vector.load %arg21[%c0_226, %c0_227] : memref<16x128xf32, #tpu.memory_space<vmem>>, vector<16x128xf32>
    tpu.vector_store %arg21[%c0_226, %c0_227], %560 {strides = array<i32>} : memref<16x128xf32, #tpu.memory_space<vmem>>, vector<16x128xf32>,
    return
  }
  func.func @transform_0(%arg0: i32) -> (i32, i32) {
    %c0_i32 = arith.constant 0 : i32
    %c0_i32_0 = arith.constant 0 : i32
    %c0_i32_1 = arith.constant 0 : i32
    return %c0_i32, %c0_i32_0 : i32, i32
  }
  func.func @transform_1(%arg0: i32) -> (i32, i32) {
    %c0_i32 = arith.constant 0 : i32
    %c0_i32_0 = arith.constant 0 : i32
    %c0_i32_1 = arith.constant 0 : i32
    return %c0_i32, %c0_i32_0 : i32, i32
  }
  func.func @transform_2(%arg0: i32) -> (i32, i32) {
    %c0_i32 = arith.constant 0 : i32
    %c0_i32_0 = arith.constant 0 : i32
    %c0_i32_1 = arith.constant 0 : i32
    return %c0_i32, %c0_i32_0 : i32, i32
  }
  func.func @transform_3(%arg0: i32) -> (i32, i32) {
    %c0_i32 = arith.constant 0 : i32
    %c0_i32_0 = arith.constant 0 : i32
    %c0_i32_1 = arith.constant 0 : i32
    return %c0_i32, %c0_i32_0 : i32, i32
  }
  func.func @transform_4(%arg0: i32) -> (i32, i32, i32) {
    %c0_i32 = arith.constant 0 : i32
    %c0_i32_0 = arith.constant 0 : i32
    %c0_i32_1 = arith.constant 0 : i32
    %c0_i32_2 = arith.constant 0 : i32
    return %c0_i32, %c0_i32_0, %c0_i32_1 : i32, i32, i32
  }
  func.func @transform_5(%arg0: i32) -> (i32, i32, i32) {
    %c0_i32 = arith.constant 0 : i32
    %c0_i32_0 = arith.constant 0 : i32
    %c0_i32_1 = arith.constant 0 : i32
    %c0_i32_2 = arith.constant 0 : i32
    return %c0_i32, %c0_i32_0, %c0_i32_1 : i32, i32, i32
  }
  func.func @transform_6(%arg0: i32) -> (i32, i32, i32) {
    %c0_i32 = arith.constant 0 : i32
    %c0_i32_0 = arith.constant 0 : i32
    %c0_i32_1 = arith.constant 0 : i32
    %c0_i32_2 = arith.constant 0 : i32
    return %c0_i32, %c0_i32_0, %c0_i32_1 : i32, i32, i32
  }
  func.func @transform_7(%arg0: i32) -> (i32, i32, i32) {
    %c0_i32 = arith.constant 0 : i32
    %c0_i32_0 = arith.constant 0 : i32
    %c0_i32_1 = arith.constant 0 : i32
    %c0_i32_2 = arith.constant 0 : i32
    return %c0_i32, %c0_i32_0, %c0_i32_1 : i32, i32, i32
  }
  func.func @transform_8(%arg0: i32) -> (i32, i32, i32) {
    %c0_i32 = arith.constant 0 : i32
    %c0_i32_0 = arith.constant 0 : i32
    %c0_i32_1 = arith.constant 0 : i32
    %c0_i32_2 = arith.constant 0 : i32
    return %c0_i32, %c0_i32_0, %c0_i32_1 : i32, i32, i32
  }
  func.func @transform_9(%arg0: i32) -> (i32, i32, i32) {
    %c0_i32 = arith.constant 0 : i32
    %c0_i32_0 = arith.constant 0 : i32
    %c0_i32_1 = arith.constant 0 : i32
    %c0_i32_2 = arith.constant 0 : i32
    return %c0_i32, %c0_i32_0, %c0_i32_1 : i32, i32, i32
  }
  func.func @transform_10(%arg0: i32) -> (i32, i32, i32) {
    %c0_i32 = arith.constant 0 : i32
    %c0_i32_0 = arith.constant 0 : i32
    %c0_i32_1 = arith.constant 0 : i32
    %c0_i32_2 = arith.constant 0 : i32
    return %c0_i32, %c0_i32_0, %c0_i32_1 : i32, i32, i32
  }
  func.func @transform_11(%arg0: i32) -> (i32, i32, i32) {
    %c0_i32 = arith.constant 0 : i32
    %c0_i32_0 = arith.constant 0 : i32
    %c0_i32_1 = arith.constant 0 : i32
    %c0_i32_2 = arith.constant 0 : i32
    return %c0_i32, %c0_i32_0, %c0_i32_1 : i32, i32, i32
  }
  func.func @transform_12(%arg0: i32) -> (i32, i32, i32) {
    %c0_i32 = arith.constant 0 : i32
    %c0_i32_0 = arith.constant 0 : i32
    %c0_i32_1 = arith.constant 0 : i32
    %c0_i32_2 = arith.constant 0 : i32
    return %c0_i32, %c0_i32_0, %c0_i32_1 : i32, i32, i32
  }
  func.func @transform_13(%arg0: i32) -> (i32, i32, i32) {
    %c0_i32 = arith.constant 0 : i32
    %c0_i32_0 = arith.constant 0 : i32
    %c0_i32_1 = arith.constant 0 : i32
    %c0_i32_2 = arith.constant 0 : i32
    return %c0_i32, %c0_i32_0, %c0_i32_1 : i32, i32, i32
  }
  func.func @transform_14(%arg0: i32) -> (i32, i32, i32) {
    %c0_i32 = arith.constant 0 : i32
    %c0_i32_0 = arith.constant 0 : i32
    %c0_i32_1 = arith.constant 0 : i32
    %c0_i32_2 = arith.constant 0 : i32
    return %c0_i32, %c0_i32_0, %c0_i32_1 : i32, i32, i32
  }
  func.func @transform_15(%arg0: i32) -> (i32, i32, i32) {
    %c0_i32 = arith.constant 0 : i32
    %c0_i32_0 = arith.constant 0 : i32
    %c0_i32_1 = arith.constant 0 : i32
    %c0_i32_2 = arith.constant 0 : i32
    return %c0_i32, %c0_i32_0, %c0_i32_1 : i32, i32, i32
  }
  func.func @transform_16(%arg0: i32) -> (i32, i32) {
    %c0_i32 = arith.constant 0 : i32
    %c0_i32_0 = arith.constant 0 : i32
    %c0_i32_1 = arith.constant 0 : i32
    return %c0_i32, %c0_i32_0 : i32, i32
  }
  func.func @transform_17(%arg0: i32) -> (i32, i32) {
    %c0_i32 = arith.constant 0 : i32
    %c0_i32_0 = arith.constant 0 : i32
    %c0_i32_1 = arith.constant 0 : i32
    return %c0_i32, %c0_i32_0 : i32, i32
  }
  func.func @transform_18(%arg0: i32) -> (i32, i32) {
    %c0_i32 = arith.constant 0 : i32
    %c0_i32_0 = arith.constant 0 : i32
    %c0_i32_1 = arith.constant 0 : i32
    return %c0_i32, %c0_i32_0 : i32, i32
  }
  func.func @transform_19(%arg0: i32) -> (i32, i32) {
    %c0_i32 = arith.constant 0 : i32
    %c0_i32_0 = arith.constant 0 : i32
    %c0_i32_1 = arith.constant 0 : i32
    return %c0_i32, %c0_i32_0 : i32, i32
  }
  func.func @transform_20(%arg0: i32) -> (i32, i32) {
    %c0_i32 = arith.constant 0 : i32
    %c0_i32_0 = arith.constant 0 : i32
    %c0_i32_1 = arith.constant 0 : i32
    return %c0_i32, %c0_i32_0 : i32, i32
  }
}

</mosaic_0001>

<bundles_post_ra>
// kernel: text_cls_forward.1
= control target key start
LH: loop header
LB: loop body
LE: loop exit
PB: predicated region body
PF: predicated region fallthrough
CT: control target
= control target key end

     0   :  { %s6720_s0 = inlined_call_operand.vmem [shape: f32[16,32], index: 0, kind: input, shape index: {}]   ;;  %s6721_s1 = inlined_call_operand.vmem [shape: f32[2,8], index: 1, kind: input, shape index: {}]   ;;  %s6722_s2 = inlined_call_operand.vmem [shape: f32[1,32], index: 2, kind: input, shape index: {}]   ;;  %s6723_s3 = inlined_call_operand.vmem [shape: f32[1,32], index: 3, kind: input, shape index: {}, may-alias: {3,17}]   ;;  %s6724_s4 = inlined_call_operand.hbm [shape: f32[2,32,96], index: 4, kind: input, shape index: {}]   ;;  %s6725_s5 = inlined_call_operand.vmem [shape: f32[2,1,96], index: 5, kind: input, shape index: {}]   ;;  %s6726_s6 = inlined_call_operand.vmem [shape: f32[2,32,32], index: 6, kind: input, shape index: {}]   ;;  %s6727_s7 = inlined_call_operand.vmem [shape: f32[2,1,32], index: 7, kind: input, shape index: {}, may-alias: {7,9,13,15}]   ;;  %s6728_s8 = inlined_call_operand.vmem [shape: f32[2,1,32], index: 8, kind: input, shape index: {}, may-alias: {8,14}]   ;;  %s6729_s9 = inlined_call_operand.vmem [shape: f32[2,1,32], index: 9, kind: input, shape index: {}, may-alias: {7,9,13,15}]   ;;  %s6730_s10 = inlined_call_operand.vmem [shape: f32[2,32,64], index: 10, kind: input, shape index: {}]   ;;  %s6731_s11 = inlined_call_operand.vmem [shape: f32[2,1,64], index: 11, kind: input, shape index: {}]   ;;  %s6732_s12 = inlined_call_operand.vmem [shape: f32[2,64,32], index: 12, kind: input, shape index: {}]   ;;  %s6733_s13 = inlined_call_operand.vmem [shape: f32[2,1,32], index: 13, kind: input, shape index: {}, may-alias: {7,9,13,15}]   ;;  %s6734_s14 = inlined_call_operand.vmem [shape: f32[2,1,32], index: 14, kind: input, shape index: {}, may-alias: {8,14}]   ;;  %s6735_s15 = inlined_call_operand.vmem [shape: f32[2,1,32], index: 15, kind: input, shape index: {}, may-alias: {7,9,13,15}]   ;;  %s6736_s16 = inlined_call_operand.hbm [shape: f32[32,32], index: 16, kind: input, shape index: {}]   ;;  %s6737_s17 = inlined_call_operand.vmem [shape: f32[1,32], index: 17, kind: input, shape index: {}, may-alias: {3,17}]   ;;  %s6738_s18 = inlined_call_operand.hbm [shape: f32[32,128], index: 18, kind: input, shape index: {}]   ;;  %s6739_s19 = inlined_call_operand.vmem [shape: f32[1,128], index: 19, kind: input, shape index: {}]   ;;  %s6740_s20 = inlined_call_operand.vmem [shape: f32[16,128], index: 20, kind: output, shape index: {}]  }
   0x1   :  { %6751 = sst [smem:[#allocation9_spill]] %s6720_s0 }
   0x2   :  { %6752 = sst [smem:[#allocation10_spill]] %s6721_s1 }
   0x3   :  { %6753 = sst [smem:[#allocation11_spill]] %s6722_s2 }
   0x4   :  { %6754 = sst [smem:[#allocation12_spill]] %s6723_s3 }
   0x5   :  { %6755 = sst [smem:[#allocation13_spill]] %s6724_s4 }
   0x6   :  { %25 = vsyncpa [#allocation3], 0 }
   0x7   :  { %26 = vsyncpa [#allocation5], 0  ;;  %s5905_s1 = smov [#allocation4]   ;;  %s5906_s23 = smov [#allocation2]  }
   0x8   :  { %s74_s22 = sshll.u32 %s5905_s1, 4  ;;  %s40_s24 = sshll.u32 %s5906_s23, 4  ;;  %s75_s22 = int_to_ptr.vmem [resolvable:$true] %s74_s22  ;;  %s6028_s24 = int_to_ptr.vmem [resolvable:$true] %s40_s24 }
   0x9   :  { %s5835_s3 = scalar_lea.hbm %s6736_s16, 512 }
   0xa   :  { %p5836_p0 = scmp.ne.s32.totalorder %s6736_s16, %s5835_s3  ;;  %p5839_p1 = scmp.lt.u32.totalorder %s5835_s3, %s6736_s16 }
   0xc   :  { %p5841_p2 = pnand %p5839_p1, %p5836_p0 }
   0xe   :  { %5844 = shalt.err (!%p5841_p2)
}
   0xf   :  { %s5845_s29 = scalar_lea.vmem %s75_s22, 512  ;;  %p5850_p4 = scmp.lt.s32.totalorder %s75_s22, %s75_s22 }
  0x10   :  { %p5846_p3 = scmp.ne.s32.totalorder %s75_s22, %s5845_s29  ;;  %p5851_p5 = scmp.lt.s32.totalorder %s5845_s29, %s5845_s29 }
  0x12   :  { %p5852_p6 = por %p5851_p5, %p5850_p4 }
  0x14   :  { %p5853_p7 = pnand %p5852_p6, %p5846_p3 }
  0x16   :  { %5856 = shalt.err (!%p5853_p7)
}
  0x17   :  { %s5907_s30 = smov 128   ;;  %s5908_s0 = smov 8  }
  0x18   :  { %80 = dma.hbm_to_vmem [thread:$0]  %s6736_s16, 512, %s75_s22, [#allocation5], %s5907_s30, %s5907_s30, %s5908_s0  }
  0x19   :  { %s6756_s25 = sld [smem:[#allocation13_spill]] }
  0x1f   :  { %s5857_s3 = scalar_lea.hbm %s6756_s25, 1024 }
  0x20   :  { %p5858_p8 = scmp.ne.s32.totalorder %s6756_s25, %s5857_s3  ;;  %p5861_p9 = scmp.lt.u32.totalorder %s5857_s3, %s6756_s25 }
  0x22   :  { %p5863_p10 = pnand %p5861_p9, %p5858_p8 }
  0x24   :  { %5866 = shalt.err (!%p5863_p10)
}
  0x25   :  { %s5867_s29 = scalar_lea.vmem %s6028_s24, 1024  ;;  %p5872_p12 = scmp.lt.s32.totalorder %s6028_s24, %s6028_s24 }
  0x26   :  { %p5868_p11 = scmp.ne.s32.totalorder %s6028_s24, %s5867_s29  ;;  %p5873_p13 = scmp.lt.s32.totalorder %s5867_s29, %s5867_s29 }
  0x28   :  { %p5874_p0 = por %p5873_p13, %p5872_p12 }
  0x2a   :  { %p5875_p1 = pnand %p5874_p0, %p5868_p11 }
  0x2c   :  { %5878 = shalt.err (!%p5875_p1)
}
  0x2d   :  { %46 = dma.hbm_to_vmem [thread:$0]  %s6756_s25, 1024, %s6028_s24, [#allocation3], %s5907_s30, %s5907_s30, %s5908_s0  }
  0x2e   :  { %s5909_s21 = smov [#allocation6]   ;;  %s5879_s3 = scalar_lea.hbm %s6738_s18, 512 }
  0x2f   :  { %s88_s1 = sshll.u32 %s5909_s21, 4  ;;  %p5880_p2 = scmp.ne.s32.totalorder %s6738_s18, %s5879_s3  ;;  %s89_s1 = int_to_ptr.vmem [resolvable:$true] %s88_s1 }
  0x30   :  { %p5883_p3 = scmp.lt.u32.totalorder %s5879_s3, %s6738_s18 }
  0x32   :  { %p5885_p4 = pnand %p5883_p3, %p5880_p2 }
  0x34   :  { %5888 = shalt.err (!%p5885_p4)
}
  0x35   :  { %s5889_s29 = scalar_lea.vmem %s89_s1, 512  ;;  %p5894_p6 = scmp.lt.s32.totalorder %s89_s1, %s89_s1 }
  0x36   :  { %p5890_p5 = scmp.ne.s32.totalorder %s89_s1, %s5889_s29  ;;  %p5895_p7 = scmp.lt.s32.totalorder %s5889_s29, %s5889_s29 }
  0x38   :  { %p5896_p8 = por %p5895_p7, %p5894_p6 }
  0x3a   :  { %p5897_p9 = pnand %p5896_p8, %p5890_p5 }
  0x3c   :  { %5900 = shalt.err (!%p5897_p9)
}
  0x3d   :  { %94 = dma.hbm_to_vmem [thread:$0]  %s6738_s18, 512, %s89_s1, [#allocation5], %s5907_s30, %s5907_s30, %s5908_s0  }
  0x3e   :  { %5901 = dma.done.wait [#allocation3], 1024  }
  0x3f   :  { %5902 = vsyncadd [#allocation3], 4294966272 }
  0x40   :  { %5903 = dma.done.wait [#allocation5], 1024  }
  0x41   :  { %5904 = vsyncadd [#allocation5], 4294966272  ;;  %vm110_vm0 = vcmask 261120   ;;  %s6757_s21 = sld [smem:[#allocation9_spill]]  ;;  %v155_v14 = vld [vmem:[#allocation2] sm:$0xff]  ;;  %v156_v15 = vld [vmem:[#allocation2 + $0x8] sm:$0xff]  ;;  %v330_v43 = vlaneseq }
  0x42   :  { %v157_v16 = vld [vmem:[#allocation2 + $0x10] sm:$0xff]  ;;  %v5641_v17 = vpack.c.bf16 %v156_v15, %v155_v14  ;;  %v158_v18 = vld [vmem:[#allocation2 + $0x18] sm:$0xff]  ;;  %s6758_s0 = sld [smem:[#allocation11_spill]]  ;;  %s6759_s26 = sld [smem:[#allocation12_spill]]  ;;  %v5910_v36 = vmov 0.0   ;;  %vm5911_vm1 = vmmov 0  }
  0x43   :  { %v5645_v19 = vpack.c.bf16 %v158_v18, %v157_v16  ;;  %5308 = vmatprep.subr.mxu1 %v5910_v36  ;;  %5310 = vmatprep.mubr.msk.f32.mxu1 %vm5911_vm1, %v5910_v36  ;;  %v5023_v37 = vld [vmem:[%s6725_s5] ss:$0 sm:$0xff]  ;;  %s5912_s4 = smov 96   ;;  %s5913_s29 = smov 88   ;;  %vm254_vm2 = vcmask 64512   ;;  %v6127_v44 = vshrl.u32 %v330_v43, 7 }
  0x44   :  { %5642 = vmatprep.subr.bf16.mxu0 %v5641_v17  ;;  %s6760_s16 = sld [smem:[#allocation10_spill]]  ;;  %s5914_s22 = smov 64   ;;  %vm2362_vm3 = vcmask 523264  }
  0x45   :  { %5644 = vmatpush3.bf16.msra.mxu0 %v5641_v17  ;;  %v332_v45 = vsub.s32 0, %v6127_v44  ;;  %s5916_s23 = smov 56   ;;  %s5917_s2 = smov 112   ;;  %v6174_v17 = vld [vmem:[%s6726_s6] sm:$0xff] }
  0x46   :  { %5646 = vmatprep.subr.bf16.mxu0 %v5645_v19  ;;  %s5918_s18 = smov 80   ;;  %s6747_s27 = smov 104  }
  0x47   :  { %v106_v0 = vld [vmem:[%s6757_s21] sm:$0xff]  ;;  %v107_v1 = vld [vmem:[%s6757_s21 + $0x8] sm:$0xff]  ;;  %s5915_s21 = smov 120   ;;  %s6749_s28 = smov 48  }
  0x48   :  { %v111_v2 = vsel %vm110_vm0, %v106_v0, 0.0  ;;  %v114_v3 = vsel %vm110_vm0, %v107_v1, 0.0  ;;  %v5021_v27 = vld [vmem:[%s6758_s0] ss:$0 sm:$0xff]  ;;  %s6761_s0 = smov 48   ;;  %s6764_s24 = smov 40  }
  0x49   :  { %112 = vadd.xlane.f32.xlu0 %v111_v2  ;;  %5648 = vmatpush3.bf16.msra.mxu0 %v5645_v19  ;;  %v5022_v29 = vld [vmem:[%s6759_s26] ss:$0 sm:$0xff]  ;;  %s6745_s26 = smov 72  }
  0x4a   :  { %5328 = vmatprep.subr.mxu0 %v5910_v36  ;;  %v6133_v46 = vld [vmem:[%s6760_s16] sm:$0x3]  ;;  %s6743_s16 = smov 40  }
  0x4b   :  { %v6136_v47 = vrot.slane %v6133_v46, %v332_v45 }
  0x4d   :  { %115 = vadd.xlane.f32.xlu0 %v114_v3 }
  0xd6   :  { %v113_v4 = vpop.xlane.xlu0 %112 }
  0xd7   :  { %v118_v5 = vmul.f32 0.03125, %v113_v4 }
  0xd9   :  { %v120_v6 = vsub.f32 %v106_v0, %v118_v5 }
  0xda   :  { %v116_v7 = vpop.xlane.xlu0 %115 }
  0xdb   :  { %v119_v8 = vmul.f32 0.03125, %v116_v7  ;;  %v122_v9 = vmul.f32 %v120_v6, %v120_v6 }
  0xdd   :  { %v121_v10 = vsub.f32 %v107_v1, %v119_v8  ;;  %v124_v11 = vsel %vm110_vm0, %v122_v9, 0.0 }
  0xde   :  { %125 = vadd.xlane.f32.xlu1 %v124_v11 }
  0xdf   :  { %v123_v12 = vmul.f32 %v121_v10, %v121_v10 }
  0xe1   :  { %v127_v13 = vsel %vm110_vm0, %v123_v12, 0.0 }
  0xe2   :  { %128 = vadd.xlane.f32.xlu1 %v127_v13  ;;  %v6167_v13 = vld [vmem:[%s6726_s6 + $0x8] sm:$0xff] }
 0x16b   :  { %v126_v20 = vpop.xlane.xlu1 %125 }
 0x16c   :  { %v130_v21 = vmul.f32 0.03125, %v126_v20 }
 0x16e   :  { %v132_v22 = vadd.f32 1e-12, %v130_v21 }
 0x16f   :  { %v129_v23 = vpop.xlane.xlu1 %128 }
 0x170   :  { %5739 = vrsqrt.f32 %v132_v22  ;;  %v131_v24 = vmul.f32 0.03125, %v129_v23 }
 0x172   :  { %v133_v25 = vadd.f32 1e-12, %v131_v24 }
 0x174   :  { %5741 = vrsqrt.f32 %v133_v25 }
 0x17a   :  { %v5740_v26 = vpop.eup %5739 }
 0x17b   :  { %v136_v28 = vmul.f32 %v5740_v26, %v120_v6 }
 0x17d   :  { %v144_v30 = vmul.f32 %v5021_v27, %v136_v28 }
 0x17e   :  { %v5742_v31 = vpop.eup %5741 }
 0x17f   :  { %v137_v32 = vmul.f32 %v5742_v31, %v121_v10  ;;  %v6096_v33 = vadd.f32 %v5022_v29, %v144_v30 }
 0x181   :  { %v145_v34 = vmul.f32 %v5021_v27, %v137_v32  ;;  %5305 = vmatprep.mubr.msk.f32.mxu0 %vm110_vm0, %v6096_v33 }
 0x183   :  { %v6100_v35 = vadd.f32 %v5022_v29, %v145_v34 }
 0x185   :  { %5306 = vmatmul.mubr.msk.f32.vlgmr.msra.gmra.mrb[0].mxu0 %vm110_vm0, %v6100_v35 }
 0x186   :  { %5330 = vmatprep.mubr.msk.f32.mxu0 %vm5911_vm1, %v5910_v36  ;;  %5329 = vmatpush3.msra.mxu0 %v6167_v13 }
 0x187   :  { %5338 = vmatprep.subr.mxu0 %v5910_v36 }
 0x258   :  { %v5307_v38 = vpop.f32.mrb[0].mxu0 }
 0x259   :  { %v6113_v39 = vadd.f32 %v5307_v38, %v5023_v37  ;;  %v238_v40 = vpop.f32.mrb[1].mxu0 }
 0x25a   :  { %v6115_v41 = vadd.f32 %v5023_v37, %v238_v40 }
 0x25c   :  { %252 = vrot.lane.b32.xlu0 %v6115_v41, %s5912_s4 }
 0x260   :  { %424 = vrot.lane.b32.xlu0 %v6115_v41, %s5913_s29 }
 0x2ce   :  { %v253_v42 = vpop.permute.xlu0 %252 }
 0x2cf   :  { %5309 = vmatpush3.xpose.msk.msra.mxu1 %vm254_vm2, %v253_v42 }
 0x2d0   :  { %5313 = vmatprep.subr.mxu1 %v5910_v36 }
 0x2d2   :  { %5311 = vmatmul.mubr.msk.f32.vlgmr.msra.gmra.mrb[0].mxu1 %vm254_vm2, %v6115_v41  ;;  %v425_v62 = vpop.permute.xlu0 %424 }
 0x2d3   :  { %5315 = vmatprep.mubr.msk.f32.mxu1 %vm5911_vm1, %v5910_v36 }
 0x3a5   :  { %v325_v48 = vpop.f32.mrb[0].mxu1 }
 0x3a6   :  { %v329_v49 = vmul.f32 0.35355338, %v325_v48  ;;  %v5312_v50 = vpop.f32.mrb[1].mxu1 }
 0x3a8   :  { %v334_v51 = vadd.f32 %v6136_v47, %v329_v49 }
 0x3aa   :  { %v335_v52 = vsel %vm254_vm2, %v334_v51, -inf }
 0x3ab   :  { %336 = vmax.xlane.f32.xlu1 %v335_v52 }
 0x3bc   :  { %346 = vrot.lane.b32.xlu1 %v6115_v41, %s5914_s22 }
 0x438   :  { %v337_v53 = vpop.xlane.xlu1 %336 }
 0x439   :  { %v338_v54 = vsub.f32 %v334_v51, %v337_v53  ;;  %v6217_v51 = vld [vmem:[%s6726_s6 + $0x10] sm:$0xff] }
 0x43b   :  { %v339_v55 = vmul.f32 1.442695, %v338_v54 }
 0x43c   :  { %v347_v56 = vpop.permute.xlu1 %346 }
 0x43d   :  { %5743 = vpow2.f32 %v339_v55  ;;  %5314 = vmatpush3.msra.mxu1 %v347_v56 }
 0x43e   :  { %5318 = vmatprep.subr.mxu1 %v5910_v36 }
 0x447   :  { %v5744_v57 = vpop.eup %5743 }
 0x448   :  { %v341_v58 = vsel %vm254_vm2, %v5744_v57, 0.0 }
 0x449   :  { %342 = vadd.xlane.f32.xlu1 %v341_v58 }
 0x45a   :  { %422 = vrot.lane.b32.xlu1 %v6115_v41, %s5915_s21 }
 0x4d6   :  { %v343_v59 = vpop.xlane.xlu1 %342 }
 0x4d7   :  { %5745 = vrcp.f32 %v343_v59 }
 0x4da   :  { %v423_v63 = vpop.permute.xlu1 %422 }
 0x4e1   :  { %v5746_v60 = vpop.eup %5745 }
 0x4e2   :  { %v345_v61 = vmul.f32 %v5746_v60, %v5744_v57 }
 0x4e4   :  { %5316 = vmatmul.mubr.msk.f32.vlgmr.msra.gmra.mrb[2].mxu1 %vm254_vm2, %v345_v61 }
 0x4e5   :  { %5319 = vmatpush3.xpose.msk.msra.mxu1 %vm254_vm2, %v425_v62  ;;  %5320 = vmatprep.mubr.msk.f32.mxu1 %vm5911_vm1, %v5910_v36 }
 0x4e6   :  { %5323 = vmatprep.subr.mxu1 %v5910_v36 }
 0x4e8   :  { %5321 = vmatmul.mubr.msk.f32.vlgmr.msra.gmra.mrb[4].mxu1 %vm254_vm2, %v423_v63 }
 0x4e9   :  { %5325 = vmatprep.mubr.msk.f32.mxu1 %vm5911_vm1, %v5910_v36 }
 0x5b7   :  { %v418_v0 = vpop.f32.mrb[2].mxu1 }
 0x5b8   :  { %v5317_v1 = vpop.f32.mrb[3].mxu1 }
 0x5bb   :  { %v496_v2 = vpop.f32.mrb[4].mxu1 }
 0x5bc   :  { %v500_v3 = vmul.f32 0.35355338, %v496_v2  ;;  %v5322_v4 = vpop.f32.mrb[5].mxu1 }
 0x5be   :  { %v501_v5 = vadd.f32 %v500_v3, %v6136_v47 }
 0x5c0   :  { %v502_v6 = vsel %vm254_vm2, %v501_v5, -inf }
 0x5c1   :  { %503 = vmax.xlane.f32.xlu0 %v502_v6 }
 0x5d7   :  { %513 = vrot.lane.b32.xlu0 %v6115_v41, %s5916_s23 }
 0x5db   :  { %735 = vrot.lane.b32.xlu0 %v6115_v41, %s5917_s2 }
 0x64e   :  { %v504_v7 = vpop.xlane.xlu0 %503 }
 0x64f   :  { %v505_v8 = vsub.f32 %v501_v5, %v504_v7 }
 0x651   :  { %v506_v9 = vmul.f32 1.442695, %v505_v8 }
 0x652   :  { %v514_v10 = vpop.permute.xlu0 %513 }
 0x653   :  { %5747 = vpow2.f32 %v506_v9  ;;  %5324 = vmatpush3.msra.mxu1 %v514_v10  ;;  %v6254_v9 = vld [vmem:[%s6726_s6 + $0x18] sm:$0xff]  ;;  %v1297_v10 = vsub.s32 1, %v6127_v44 }
 0x654   :  { %5333 = vmatprep.subr.mxu1 %v5910_v36 }
 0x656   :  { %v736_v21 = vpop.permute.xlu0 %735 }
 0x65d   :  { %v5748_v11 = vpop.eup %5747 }
 0x65e   :  { %v508_v12 = vsel %vm254_vm2, %v5748_v11, 0.0 }
 0x65f   :  { %509 = vadd.xlane.f32.xlu1 %v508_v12 }
 0x670   :  { %737 = vrot.lane.b32.xlu1 %v6115_v41, %s5918_s18 }
 0x6ec   :  { %v510_v14 = vpop.xlane.xlu1 %509 }
 0x6ed   :  { %5749 = vrcp.f32 %v510_v14 }
 0x6f0   :  { %v738_v19 = vpop.permute.xlu1 %737 }
 0x6f7   :  { %v5750_v15 = vpop.eup %5749 }
 0x6f8   :  { %v512_v16 = vmul.f32 %v5750_v15, %v5748_v11 }
 0x6fa   :  { %5326 = vmatmul.mubr.msk.f32.vlgmr.msra.gmra.mrb[6].mxu1 %vm254_vm2, %v512_v16 }
 0x6fb   :  { %5334 = vmatpush3.msra.mxu1 %v6174_v17  ;;  %5335 = vmatprep.mubr.msk.f32.mxu1 %vm5911_vm1, %v5910_v36 }
 0x6fc   :  { %5343 = vmatprep.subr.mxu1 %v5910_v36 }
 0x6fe   :  { %5336 = vmatmul.mubr.msk.f32.vlgmr.msra.gmra.mrb[8].mxu1 %vm254_vm2, %v418_v0 }
 0x6ff   :  { %5345 = vmatprep.mubr.msk.f32.mxu1 %vm5911_vm1, %v5910_v36 }
 0x7cd   :  { %v585_v18 = vpop.f32.mrb[6].mxu1 }
 0x7ce   :  { %v5327_v20 = vpop.f32.mrb[7].mxu1  ;;  %5331 = vmatmul.mubr.msk.f32.vlgmr.msra.gmra.mrb[2].mxu0 %vm254_vm2, %v585_v18 }
 0x7cf   :  { %5339 = vmatpush3.xpose.msk.msra.mxu0 %vm254_vm2, %v738_v19  ;;  %5340 = vmatprep.mubr.msk.f32.mxu0 %vm5911_vm1, %v5910_v36 }
 0x7d0   :  { %5348 = vmatprep.subr.mxu0 %v5910_v36 }
 0x7d1   :  { %v731_v22 = vpop.f32.mrb[8].mxu1 }
 0x7d2   :  { %v5337_v23 = vpop.f32.mrb[9].mxu1  ;;  %5341 = vmatmul.mubr.msk.f32.vlgmr.msra.gmra.mrb[4].mxu0 %vm254_vm2, %v736_v21 }
 0x7d3   :  { %5350 = vmatprep.mubr.msk.f32.mxu0 %vm5911_vm1, %v5910_v36  ;;  %5349 = vmatpush3.msra.mxu0 %v6217_v51 }
 0x7d4   :  { %5358 = vmatprep.subr.mxu0 %v5910_v36 }
 0x8a1   :  { %v658_v24 = vpop.f32.mrb[2].mxu0 }
 0x8a2   :  { %v6192_v25 = vadd.f32 %v731_v22, %v658_v24  ;;  %v5332_v26 = vpop.f32.mrb[3].mxu0 }
 0x8a5   :  { %v809_v27 = vpop.f32.mrb[4].mxu0 }
 0x8a6   :  { %v813_v28 = vmul.f32 0.35355338, %v809_v27  ;;  %v5342_v29 = vpop.f32.mrb[5].mxu0 }
 0x8a8   :  { %v814_v30 = vadd.f32 %v813_v28, %v6136_v47 }
 0x8aa   :  { %v815_v31 = vsel %vm254_vm2, %v814_v30, -inf }
 0x8ab   :  { %816 = vmax.xlane.f32.xlu1 %v815_v31 }
 0x8bc   :  { %978 = vrot.lane.b32.xlu1 %v6115_v41, %s6745_s26 }
 0x8c0   :  { %976 = vrot.lane.b32.xlu1 %v6115_v41, %s6747_s27 }
 0x8c4   :  { %1218 = vrot.lane.b32.xlu1 %v6113_v39, %s5912_s4 }
 0x938   :  { %v817_v32 = vpop.xlane.xlu1 %816 }
 0x939   :  { %v818_v34 = vsub.f32 %v814_v30, %v817_v32 }
 0x93b   :  { %v819_v37 = vmul.f32 1.442695, %v818_v34 }
 0x93c   :  { %v979_v48 = vpop.permute.xlu1 %978 }
 0x93d   :  { %5751 = vpow2.f32 %v819_v37 }
 0x940   :  { %v977_v50 = vpop.permute.xlu1 %976 }
 0x944   :  { %v1219_v3 = vpop.permute.xlu1 %1218 }
 0x947   :  { %v5752_v38 = vpop.eup %5751 }
 0x948   :  { %v821_v40 = vsel %vm254_vm2, %v5752_v38, 0.0 }
 0x949   :  { %822 = vadd.xlane.f32.xlu0 %v821_v40 }
 0x95f   :  { %826 = vrot.lane.b32.xlu0 %v6115_v41, %s6749_s28 }
 0x9d6   :  { %v823_v42 = vpop.xlane.xlu0 %822 }
 0x9d7   :  { %5753 = vrcp.f32 %v823_v42 }
 0x9da   :  { %v827_v43 = vpop.permute.xlu0 %826 }
 0x9db   :  { %5344 = vmatpush3.msra.mxu1 %v827_v43 }
 0x9dc   :  { %5353 = vmatprep.subr.mxu1 %v5910_v36 }
 0x9e1   :  { %v5754_v45 = vpop.eup %5753 }
 0x9e2   :  { %v825_v49 = vmul.f32 %v5754_v45, %v5752_v38 }
 0x9e4   :  { %5346 = vmatmul.mubr.msk.f32.vlgmr.msra.gmra.mrb[10].mxu1 %vm254_vm2, %v825_v49 }
 0x9e5   :  { %5354 = vmatpush3.xpose.msk.msra.mxu1 %vm254_vm2, %v979_v48  ;;  %5355 = vmatprep.mubr.msk.f32.mxu1 %vm5911_vm1, %v5910_v36 }
 0x9e6   :  { %5363 = vmatprep.subr.mxu1 %v5910_v36 }
 0x9e8   :  { %5356 = vmatmul.mubr.msk.f32.vlgmr.msra.gmra.mrb[12].mxu1 %vm254_vm2, %v977_v50 }
 0x9e9   :  { %5365 = vmatprep.mubr.msk.f32.mxu1 %vm5911_vm1, %v5910_v36  ;;  %5364 = vmatpush3.msra.mxu1 %v6254_v9 }
 0x9ea   :  { %5373 = vmatprep.subr.mxu1 %v5910_v36 }
 0xab7   :  { %v898_v52 = vpop.f32.mrb[10].mxu1 }
 0xab8   :  { %v5347_v53 = vpop.f32.mrb[11].mxu1  ;;  %5351 = vmatmul.mubr.msk.f32.vlgmr.msra.gmra.mrb[6].mxu0 %vm254_vm2, %v898_v52 }
 0xab9   :  { %5360 = vmatprep.mubr.msk.f32.mxu0 %vm5911_vm1, %v5910_v36 }
 0xabb   :  { %v1050_v54 = vpop.f32.mrb[12].mxu1 }
 0xabc   :  { %v1054_v55 = vmul.f32 0.35355338, %v1050_v54  ;;  %v5357_v56 = vpop.f32.mrb[13].mxu1 }
 0xabe   :  { %v1055_v57 = vadd.f32 %v1054_v55, %v6136_v47 }
 0xac0   :  { %v1056_v58 = vsel %vm254_vm2, %v1055_v57, -inf }
 0xac1   :  { %1057 = vmax.xlane.f32.xlu0 %v1056_v58 }
 0xad7   :  { %1067 = vrot.lane.b32.xlu0 %v6115_v41, %s6743_s16 }
 0xadb   :  { %1389 = vrot.lane.b32.xlu0 %v6113_v39, %s5913_s29 }
 0xb4e   :  { %v1058_v59 = vpop.xlane.xlu0 %1057 }
 0xb4f   :  { %v1059_v60 = vsub.f32 %v1055_v57, %v1058_v59 }
 0xb51   :  { %v1060_v61 = vmul.f32 1.442695, %v1059_v60 }
 0xb52   :  { %v1068_v62 = vpop.permute.xlu0 %1067 }
 0xb53   :  { %5755 = vpow2.f32 %v1060_v61  ;;  %5359 = vmatpush3.msra.mxu0 %v1068_v62 }
 0xb54   :  { %5368 = vmatprep.subr.mxu0 %v5910_v36 }
 0xb56   :  { %v1390_v7 = vpop.permute.xlu0 %1389 }
 0xb5d   :  { %v5756_v63 = vpop.eup %5755 }
 0xb5e   :  { %v1062_v0 = vsel %vm254_vm2, %v5756_v63, 0.0 }
 0xb5f   :  { %1063 = vadd.xlane.f32.xlu1 %v1062_v0 }
 0xb70   :  { %1387 = vrot.lane.b32.xlu1 %v6113_v39, %s5915_s21 }
 0xb8b   :  { %v971_v1 = vpop.f32.mrb[6].mxu0 }
 0xb8c   :  { %v975_v41 = vadd.f32 %v971_v1, %v6192_v25  ;;  %v5352_v2 = vpop.f32.mrb[7].mxu0 }
 0xbec   :  { %v1064_v4 = vpop.xlane.xlu1 %1063 }
 0xbed   :  { %5757 = vrcp.f32 %v1064_v4 }
 0xbf0   :  { %v1388_v8 = vpop.permute.xlu1 %1387 }
 0xbf7   :  { %v5758_v5 = vpop.eup %5757 }
 0xbf8   :  { %v1066_v6 = vmul.f32 %v5758_v5, %v5756_v63 }
 0xbfa   :  { %5361 = vmatmul.mubr.msk.f32.vlgmr.msra.gmra.mrb[8].mxu0 %vm254_vm2, %v1066_v6 }
 0xbfb   :  { %5369 = vmatpush3.xpose.msk.msra.mxu0 %vm254_vm2, %v1219_v3  ;;  %5370 = vmatprep.mubr.msk.f32.mxu0 %vm5911_vm1, %v5910_v36 }
 0xbfc   :  { %5378 = vmatprep.subr.mxu0 %v5910_v36 }
 0xbfe   :  { %5371 = vmatmul.mubr.msk.f32.vlgmr.msra.gmra.mrb[10].mxu0 %vm254_vm2, %v6113_v39 }
 0xbff   :  { %5379 = vmatpush3.xpose.msk.msra.mxu0 %vm254_vm2, %v1390_v7  ;;  %5380 = vmatprep.mubr.msk.f32.mxu0 %vm5911_vm1, %v5910_v36 }
 0xc00   :  { %5388 = vmatprep.subr.mxu0 %v5910_v36 }
 0xc02   :  { %5381 = vmatmul.mubr.msk.f32.vlgmr.msra.gmra.mrb[12].mxu0 %vm254_vm2, %v1388_v8 }
 0xc03   :  { %5389 = vmatpush3.msra.mxu0 %v6167_v13  ;;  %5390 = vmatprep.mubr.msk.f32.mxu0 %vm5911_vm1, %v5910_v36  ;;  %v6263_v13 = vrot.slane %v6133_v46, %v1297_v10 }
 0xc04   :  { %5398 = vmatprep.subr.mxu0 %v5910_v36 }
 0xccd   :  { %v1139_v11 = vpop.f32.mrb[8].mxu0 }
 0xcce   :  { %v5362_v12 = vpop.f32.mrb[9].mxu0  ;;  %5366 = vmatmul.mubr.msk.f32.vlgmr.msra.gmra.mrb[14].mxu1 %vm254_vm2, %v1139_v11 }
 0xccf   :  { %5375 = vmatprep.mubr.msk.f32.mxu1 %vm5911_vm1, %v5910_v36 }
 0xcd1   :  { %v1290_v14 = vpop.f32.mrb[10].mxu0 }
 0xcd2   :  { %v1294_v15 = vmul.f32 0.35355338, %v1290_v14  ;;  %v5372_v16 = vpop.f32.mrb[11].mxu0 }
 0xcd4   :  { %v1299_v18 = vadd.f32 %v6263_v13, %v1294_v15 }
 0xcd5   :  { %v1461_v19 = vpop.f32.mrb[12].mxu0 }
 0xcd6   :  { %v1465_v20 = vmul.f32 0.35355338, %v1461_v19  ;;  %v5382_v21 = vpop.f32.mrb[13].mxu0  ;;  %v1300_v44 = vsel %vm254_vm2, %v1299_v18, -inf }
 0xcd7   :  { %1301 = vmax.xlane.f32.xlu0 %v1300_v44 }
 0xcd8   :  { %v1466_v22 = vadd.f32 %v1465_v20, %v6263_v13 }
 0xcda   :  { %v1467_v23 = vsel %vm254_vm2, %v1466_v22, -inf }
 0xcdb   :  { %1468 = vmax.xlane.f32.xlu1 %v1467_v23 }
 0xcec   :  { %1478 = vrot.lane.b32.xlu1 %v6113_v39, %s5916_s23 }
 0xcf0   :  { %1702 = vrot.lane.b32.xlu1 %v6113_v39, %s5918_s18 }
 0xcf4   :  { %1700 = vrot.lane.b32.xlu1 %v6113_v39, %s5917_s2 }
 0xd64   :  { %v1302_v46 = vpop.xlane.xlu0 %1301 }
 0xd65   :  { %v1303_v24 = vsub.f32 %v1299_v18, %v1302_v46  ;;  %v5058_v18 = vld [vmem:[%s6727_s7] ss:$0 sm:$0xff] }
 0xd67   :  { %v1304_v25 = vmul.f32 1.442695, %v1303_v24 }
 0xd68   :  { %v1469_v26 = vpop.xlane.xlu1 %1468 }
 0xd69   :  { %5759 = vpow2.f32 %v1304_v25  ;;  %v1470_v27 = vsub.f32 %v1466_v22, %v1469_v26 }
 0xd6b   :  { %v1471_v28 = vmul.f32 1.442695, %v1470_v27 }
 0xd6c   :  { %v1479_v49 = vpop.permute.xlu1 %1478 }
 0xd6d   :  { %5761 = vpow2.f32 %v1471_v28 }
 0xd70   :  { %v1703_v55 = vpop.permute.xlu1 %1702 }
 0xd73   :  { %v5760_v29 = vpop.eup %5759 }
 0xd74   :  { %v1306_v30 = vsel %vm254_vm2, %v5760_v29, 0.0 }
 0xd75   :  { %1307 = vadd.xlane.f32.xlu0 %v1306_v30 }
 0xd77   :  { %v5762_v31 = vpop.eup %5761 }
 0xd78   :  { %v1473_v32 = vsel %vm254_vm2, %v5762_v31, 0.0 }
 0xd79   :  { %1474 = vadd.xlane.f32.xlu0 %v1473_v32 }
 0xd8f   :  { %1311 = vrot.lane.b32.xlu0 %v6113_v39, %s5914_s22 }
 0xda1   :  { %v1212_v34 = vpop.f32.mrb[14].mxu1 }
 0xda2   :  { %v6279_v37 = vadd.f32 %v1212_v34, %v975_v41  ;;  %v5367_v38 = vpop.f32.mrb[15].mxu1 }
 0xda4   :  { %v2189_v20 = vadd.f32 %v5058_v18, %v6279_v37 }
 0xda6   :  { %v2191_v23 = vadd.f32 %v2189_v20, %v6096_v33 }
 0xda8   :  { %v2195_v46 = vsel %vm110_vm0, %v2191_v23, 0.0 }
 0xe02   :  { %v1308_v40 = vpop.xlane.xlu0 %1307 }
 0xe03   :  { %5763 = vrcp.f32 %v1308_v40 }
 0xe06   :  { %v1475_v42 = vpop.xlane.xlu0 %1474 }
 0xe07   :  { %5765 = vrcp.f32 %v1475_v42 }
 0xe0a   :  { %v1312_v43 = vpop.permute.xlu0 %1311 }
 0xe0b   :  { %5374 = vmatpush3.msra.mxu1 %v1312_v43 }
 0xe0c   :  { %5383 = vmatprep.subr.mxu1 %v5910_v36 }
 0xe0d   :  { %v5764_v45 = vpop.eup %5763 }
 0xe0e   :  { %v1310_v48 = vmul.f32 %v5764_v45, %v5760_v29 }
 0xe10   :  { %5376 = vmatmul.mubr.msk.f32.vlgmr.msra.gmra.mrb[16].mxu1 %vm254_vm2, %v1310_v48 }
 0xe11   :  { %v5766_v50 = vpop.eup %5765  ;;  %5384 = vmatpush3.msra.mxu1 %v1479_v49  ;;  %5385 = vmatprep.mubr.msk.f32.mxu1 %vm5911_vm1, %v5910_v36 }
 0xe12   :  { %v1477_v52 = vmul.f32 %v5766_v50, %v5762_v31  ;;  %5393 = vmatprep.subr.mxu1 %v5910_v36 }
 0xe14   :  { %5386 = vmatmul.mubr.msk.f32.vlgmr.msra.gmra.mrb[18].mxu1 %vm254_vm2, %v1477_v52 }
 0xe15   :  { %5394 = vmatpush3.msra.mxu1 %v6174_v17  ;;  %5395 = vmatprep.mubr.msk.f32.mxu1 %vm5911_vm1, %v5910_v36  ;;  %v1701_v17 = vpop.permute.xlu1 %1700 }
 0xe16   :  { %5403 = vmatprep.subr.mxu1 %v5910_v36 }
 0xee3   :  { %v1383_v53 = vpop.f32.mrb[16].mxu1 }
 0xee4   :  { %v5377_v54 = vpop.f32.mrb[17].mxu1  ;;  %5396 = vmatmul.mubr.msk.f32.vlgmr.msra.gmra.mrb[20].mxu1 %vm254_vm2, %v1383_v53 }
 0xee5   :  { %5405 = vmatprep.mubr.msk.f32.mxu1 %vm5911_vm1, %v5910_v36 }
 0xee7   :  { %v1550_v56 = vpop.f32.mrb[18].mxu1 }
 0xee8   :  { %v5387_v57 = vpop.f32.mrb[19].mxu1  ;;  %5391 = vmatmul.mubr.msk.f32.vlgmr.msra.gmra.mrb[14].mxu0 %vm254_vm2, %v1550_v56 }
 0xee9   :  { %5399 = vmatpush3.xpose.msk.msra.mxu0 %vm254_vm2, %v1703_v55  ;;  %5400 = vmatprep.mubr.msk.f32.mxu0 %vm5911_vm1, %v5910_v36 }
 0xeea   :  { %5408 = vmatprep.subr.mxu0 %v5910_v36 }
 0xeec   :  { %5401 = vmatmul.mubr.msk.f32.vlgmr.msra.gmra.mrb[16].mxu0 %vm254_vm2, %v1701_v17 }
 0xeed   :  { %5409 = vmatpush3.msra.mxu0 %v6217_v51  ;;  %5410 = vmatprep.mubr.msk.f32.mxu0 %vm5911_vm1, %v5910_v36 }
 0xeee   :  { %5418 = vmatprep.subr.mxu0 %v5910_v36 }
 0xfb7   :  { %v1696_v58 = vpop.f32.mrb[20].mxu1 }
 0xfb8   :  { %v5397_v59 = vpop.f32.mrb[21].mxu1 }
 0xfbb   :  { %v1623_v60 = vpop.f32.mrb[14].mxu0 }
 0xfbc   :  { %v1697_v61 = vadd.f32 %v1696_v58, %v1623_v60  ;;  %v5392_v62 = vpop.f32.mrb[15].mxu0 }
 0xfbf   :  { %v1774_v63 = vpop.f32.mrb[16].mxu0 }
 0xfc0   :  { %v1778_v0 = vmul.f32 0.35355338, %v1774_v63  ;;  %v5402_v1 = vpop.f32.mrb[17].mxu0 }
 0xfc1   :  { %v5060_v1 = vld [vmem:[%s6729_s9] ss:$0 sm:$0xff] }
 0xfc2   :  { %v1779_v41 = vadd.f32 %v1778_v0, %v6263_v13 }
 0xfc4   :  { %v1780_v2 = vsel %vm254_vm2, %v1779_v41, -inf }
 0xfc5   :  { %1781 = vmax.xlane.f32.xlu0 %v1780_v2 }
 0xfdb   :  { %1791 = vrot.lane.b32.xlu0 %v6113_v39, %s6749_s28 }
 0xfdf   :  { %1941 = vrot.lane.b32.xlu0 %v6113_v39, %s6747_s27 }
0x1052   :  { %v1782_v51 = vpop.xlane.xlu0 %1781 }
0x1053   :  { %v1783_v3 = vsub.f32 %v1779_v41, %v1782_v51  ;;  %v2237_v51 = vld [vmem:[%s6730_s10] sm:$0xff] }
0x1055   :  { %v1784_v4 = vmul.f32 1.442695, %v1783_v3  ;;  %v2238_v3 = vld [vmem:[%s6730_s10 + $0x8] sm:$0xff] }
0x1056   :  { %v1792_v5 = vpop.permute.xlu0 %1791 }
0x1057   :  { %5767 = vpow2.f32 %v1784_v4  ;;  %5404 = vmatpush3.msra.mxu1 %v1792_v5  ;;  %v5649_v4 = vpack.c.bf16 %v2238_v3, %v2237_v51  ;;  %v2239_v5 = vld [vmem:[%s6730_s10 + $0x10] sm:$0xff] }
0x1058   :  { %5413 = vmatprep.subr.mxu1 %v5910_v36 }
0x105a   :  { %v1942_v14 = vpop.permute.xlu0 %1941 }
0x1061   :  { %v5768_v6 = vpop.eup %5767 }
0x1062   :  { %v1786_v7 = vsel %vm254_vm2, %v5768_v6, 0.0 }
0x1063   :  { %1787 = vadd.xlane.f32.xlu1 %v1786_v7 }
0x1074   :  { %1943 = vrot.lane.b32.xlu1 %v6113_v39, %s6745_s26  ;;  %s6762_s26 = smov 104  }
0x10f0   :  { %v1788_v8 = vpop.xlane.xlu1 %1787 }
0x10f1   :  { %5769 = vrcp.f32 %v1788_v8 }
0x10f4   :  { %v1944_v12 = vpop.permute.xlu1 %1943 }
0x10fb   :  { %v5770_v10 = vpop.eup %5769 }
0x10fc   :  { %v1790_v11 = vmul.f32 %v5770_v10, %v5768_v6  ;;  %v2240_v6 = vld [vmem:[%s6730_s10 + $0x18] sm:$0xff] }
0x10fd   :  { %v5653_v7 = vpack.c.bf16 %v2240_v6, %v2239_v5 }
0x10fe   :  { %5406 = vmatmul.mubr.msk.f32.vlgmr.msra.gmra.mrb[22].mxu1 %vm254_vm2, %v1790_v11 }
0x10ff   :  { %5414 = vmatpush3.xpose.msk.msra.mxu1 %vm254_vm2, %v1944_v12  ;;  %5415 = vmatprep.mubr.msk.f32.mxu1 %vm5911_vm1, %v5910_v36 }
0x1100   :  { %5423 = vmatprep.subr.mxu1 %v5910_v36 }
0x1102   :  { %5416 = vmatmul.mubr.msk.f32.vlgmr.msra.gmra.mrb[24].mxu1 %vm254_vm2, %v1942_v14 }
0x1103   :  { %5424 = vmatpush3.msra.mxu1 %v6254_v9  ;;  %5425 = vmatprep.mubr.msk.f32.mxu1 %vm5911_vm1, %v5910_v36 }
0x11d1   :  { %v1863_v15 = vpop.f32.mrb[22].mxu1 }
0x11d2   :  { %v5407_v16 = vpop.f32.mrb[23].mxu1  ;;  %5411 = vmatmul.mubr.msk.f32.vlgmr.msra.gmra.mrb[18].mxu0 %vm254_vm2, %v1863_v15 }
0x11d3   :  { %5420 = vmatprep.mubr.msk.f32.mxu0 %vm5911_vm1, %v5910_v36 }
0x11d5   :  { %v2015_v19 = vpop.f32.mrb[24].mxu1 }
0x11d6   :  { %v2019_v21 = vmul.f32 0.35355338, %v2015_v19  ;;  %v5417_v44 = vpop.f32.mrb[25].mxu1  ;;  %v2348_v19 = vld [vmem:[%s6732_s12 + $0x8] sm:$0xff] }
0x11d7   :  { %v2350_v44 = vld [vmem:[%s6732_s12 + $0x18] sm:$0xff] }
0x11d8   :  { %v2020_v9 = vadd.f32 %v2019_v21, %v6263_v13  ;;  %v2349_v21 = vld [vmem:[%s6732_s12 + $0x10] sm:$0xff] }
0x11da   :  { %v2021_v22 = vsel %vm254_vm2, %v2020_v9, -inf }
0x11db   :  { %2022 = vmax.xlane.f32.xlu1 %v2021_v22  ;;  %v2351_v22 = vld [vmem:[%s6732_s12 + $0x20] sm:$0xff] }
0x11df   :  { %2196 = vadd.xlane.f32.xlu1 %v2195_v46 }
0x1268   :  { %v2023_v24 = vpop.xlane.xlu1 %2022 }
0x1269   :  { %v2024_v25 = vsub.f32 %v2020_v9, %v2023_v24  ;;  %v5661_v9 = vpack.c.bf16 %v2350_v44, %v2349_v21  ;;  %v2353_v24 = vld [vmem:[%s6732_s12 + $0x30] sm:$0xff] }
0x126b   :  { %v2025_v26 = vmul.f32 1.442695, %v2024_v25  ;;  %v2354_v25 = vld [vmem:[%s6732_s12 + $0x38] sm:$0xff] }
0x126c   :  { %v2197_v42 = vpop.xlane.xlu1 %2196 }
0x126d   :  { %5771 = vpow2.f32 %v2025_v26  ;;  %v2201_v43 = vmul.f32 0.03125, %v2197_v42  ;;  %v5669_v26 = vpack.c.bf16 %v2354_v25, %v2353_v24 }
0x126f   :  { %v2203_v49 = vsub.f32 %v2191_v23, %v2201_v43  ;;  %v2352_v23 = vld [vmem:[%s6732_s12 + $0x28] sm:$0xff] }
0x1270   :  { %v5665_v46 = vpack.c.bf16 %v2352_v23, %v2351_v22  ;;  %v5067_v22 = vld [vmem:[%s6734_s14] ss:$0 sm:$0xff] }
0x1271   :  { %v2205_v54 = vmul.f32 %v2203_v49, %v2203_v49 }
0x1273   :  { %v2207_v55 = vsel %vm110_vm0, %v2205_v54, 0.0 }
0x1277   :  { %v5772_v27 = vpop.eup %5771 }
0x1278   :  { %v2027_v28 = vsel %vm254_vm2, %v5772_v27, 0.0 }
0x1279   :  { %2028 = vadd.xlane.f32.xlu0 %v2027_v28 }
0x128f   :  { %2032 = vrot.lane.b32.xlu0 %v6113_v39, %s6743_s16  ;;  %s6763_s16 = smov 72  }
0x12a5   :  { %v1936_v29 = vpop.f32.mrb[18].mxu0 }
0x12a6   :  { %v1940_v30 = vadd.f32 %v1936_v29, %v1697_v61  ;;  %v5412_v31 = vpop.f32.mrb[19].mxu0 }
0x1306   :  { %v2029_v32 = vpop.xlane.xlu0 %2028 }
0x1307   :  { %5773 = vrcp.f32 %v2029_v32 }
0x130a   :  { %v2033_v33 = vpop.permute.xlu0 %2032 }
0x130b   :  { %5419 = vmatpush3.msra.mxu0 %v2033_v33 }
0x130c   :  { %5650 = vmatprep.subr.bf16.mxu0 %v5649_v4 }
0x1311   :  { %v5774_v34 = vpop.eup %5773 }
0x1312   :  { %v2031_v37 = vmul.f32 %v5774_v34, %v5772_v27  ;;  %v5061_v27 = vld [vmem:[%s6731_s11] ss:$0 sm:$0xff] }
0x1314   :  { %5421 = vmatmul.mubr.msk.f32.vlgmr.msra.gmra.mrb[20].mxu0 %vm254_vm2, %v2031_v37 }
0x1315   :  { %5652 = vmatpush3.bf16.msra.mxu0 %v5649_v4 }
0x1316   :  { %5654 = vmatprep.subr.bf16.mxu0 %v5653_v7 }
0x1319   :  { %5656 = vmatpush3.bf16.msra.mxu0 %v5653_v7 }
0x13e7   :  { %v2104_v38 = vpop.f32.mrb[20].mxu0 }
0x13e8   :  { %v5422_v40 = vpop.f32.mrb[21].mxu0  ;;  %5426 = vmatmul.mubr.msk.f32.vlgmr.msra.gmra.mrb[26].mxu1 %vm254_vm2, %v2104_v38 }
0x14bb   :  { %v2177_v45 = vpop.f32.mrb[26].mxu1 }
0x14bc   :  { %v2181_v48 = vadd.f32 %v2177_v45, %v1940_v30  ;;  %v5427_v39 = vpop.f32.mrb[27].mxu1 }
0x14be   :  { %v2190_v50 = vadd.f32 %v5058_v18, %v2181_v48  ;;  %v2347_v18 = vld [vmem:[%s6732_s12] sm:$0xff] }
0x14bf   :  { %v5657_v20 = vpack.c.bf16 %v2348_v19, %v2347_v18 }
0x14c0   :  { %v2192_v52 = vadd.f32 %v2190_v50, %v6100_v35  ;;  %v5059_v35 = vld [vmem:[%s6728_s8] ss:$0 sm:$0xff] }
0x14c1   :  { %5658 = vmatprep.subr.bf16.mxu1 %v5657_v20 }
0x14c2   :  { %v2198_v53 = vsel %vm110_vm0, %v2192_v52, 0.0  ;;  %5660 = vmatpush3.bf16.msra.mxu1 %v5657_v20 }
0x14c3   :  { %2199 = vadd.xlane.f32.xlu1 %v2198_v53  ;;  %5662 = vmatprep.subr.bf16.mxu1 %v5661_v9 }
0x14c6   :  { %5664 = vmatpush3.bf16.msra.mxu1 %v5661_v9 }
0x14c7   :  { %2208 = vadd.xlane.f32.xlu1 %v2207_v55  ;;  %5666 = vmatprep.subr.bf16.mxu1 %v5665_v46 }
0x14ca   :  { %5668 = vmatpush3.bf16.msra.mxu1 %v5665_v46  ;;  %v5068_v46 = vld [vmem:[%s6735_s15] ss:$0 sm:$0xff] }
0x14cb   :  { %5670 = vmatprep.subr.bf16.mxu1 %v5669_v26 }
0x14ce   :  { %5672 = vmatpush3.bf16.msra.mxu1 %v5669_v26 }
0x14cf   :  { %5474 = vmatprep.subr.mxu1 %v5910_v36 }
0x1550   :  { %v2200_v56 = vpop.xlane.xlu1 %2199 }
0x1551   :  { %v2202_v57 = vmul.f32 0.03125, %v2200_v56 }
0x1553   :  { %v2204_v17 = vsub.f32 %v2192_v52, %v2202_v57  ;;  %v5064_v57 = vld [vmem:[%s6733_s13] ss:$0 sm:$0xff] }
0x1554   :  { %v2209_v58 = vpop.xlane.xlu1 %2208 }
0x1555   :  { %v2213_v59 = vmul.f32 0.03125, %v2209_v58  ;;  %v2206_v60 = vmul.f32 %v2204_v17, %v2204_v17 }
0x1557   :  { %v2215_v61 = vadd.f32 1e-12, %v2213_v59  ;;  %v2210_v62 = vsel %vm110_vm0, %v2206_v60, 0.0 }
0x1558   :  { %2211 = vadd.xlane.f32.xlu1 %v2210_v62 }
0x1559   :  { %5775 = vrsqrt.f32 %v2215_v61 }
0x1563   :  { %v5776_v63 = vpop.eup %5775 }
0x1564   :  { %v2219_v0 = vmul.f32 %v5776_v63, %v2203_v49 }
0x1566   :  { %v2227_v41 = vmul.f32 %v5059_v35, %v2219_v0 }
0x1568   :  { %v6349_v2 = vadd.f32 %v5060_v1, %v2227_v41 }
0x156a   :  { %5436 = vmatprep.mubr.msk.f32.mxu0 %vm110_vm0, %v6349_v2 }
0x15e5   :  { %v2212_v8 = vpop.xlane.xlu1 %2211 }
0x15e6   :  { %v2214_v10 = vmul.f32 0.03125, %v2212_v8 }
0x15e8   :  { %v2216_v11 = vadd.f32 1e-12, %v2214_v10  ;;  %v2492_v10 = vld [vmem:[#allocation2 + $0x28] sm:$0xff] }
0x15ea   :  { %5777 = vrsqrt.f32 %v2216_v11 }
0x15f4   :  { %v5778_v12 = vpop.eup %5777 }
0x15f5   :  { %v2220_v14 = vmul.f32 %v5778_v12, %v2204_v17  ;;  %v2493_v12 = vld [vmem:[#allocation2 + $0x30] sm:$0xff] }
0x15f7   :  { %v2228_v15 = vmul.f32 %v5059_v35, %v2220_v14  ;;  %v2494_v14 = vld [vmem:[#allocation2 + $0x38] sm:$0xff] }
0x15f9   :  { %v2236_v16 = vadd.f32 %v5060_v1, %v2228_v15  ;;  %v5677_v15 = vpack.c.bf16 %v2494_v14, %v2493_v12 }
0x15fb   :  { %5437 = vmatmul.mubr.msk.f32.vlgmr.msra.gmra.mrb[22].mxu0 %vm110_vm0, %v2236_v16 }
0x16ce   :  { %v5438_v28 = vpop.f32.mrb[22].mxu0 }
0x16cf   :  { %v2326_v29 = vadd.f32 %v5438_v28, %v5061_v27  ;;  %v2320_v30 = vpop.f32.mrb[23].mxu0 }
0x16d0   :  { %v2321_v31 = vadd.f32 %v5061_v27, %v2320_v30  ;;  %v5070_v30 = vld [vmem:[%s6725_s5 + $0x1] ss:$0 sm:$0xff] }
0x16d1   :  { %v2332_v32 = vmul.f32 0.044715, %v2326_v29  ;;  %v2330_v54 = vmul.f32 0.5, %v2326_v29 }
0x16d2   :  { %v2331_v33 = vmul.f32 0.044715, %v2321_v31  ;;  %v2329_v52 = vmul.f32 0.5, %v2321_v31 }
0x16d3   :  { %v2334_v34 = vmul.f32 %v2332_v32, %v2326_v29 }
0x16d4   :  { %v2333_v37 = vmul.f32 %v2331_v33, %v2321_v31 }
0x16d5   :  { %v2336_v38 = vmul.f32 %v2334_v34, %v2326_v29 }
0x16d6   :  { %v2335_v40 = vmul.f32 %v2333_v37, %v2321_v31 }
0x16d7   :  { %v2338_v42 = vadd.f32 %v2336_v38, %v2326_v29 }
0x16d8   :  { %v2337_v43 = vadd.f32 %v2335_v40, %v2321_v31 }
0x16d9   :  { %v2340_v45 = vmul.f32 0.7978846, %v2338_v42 }
0x16da   :  { %v2339_v48 = vmul.f32 0.7978846, %v2337_v43 }
0x16db   :  { %5779 = vtanh.f32 %v2340_v45 }
0x16dc   :  { %5781 = vtanh.f32 %v2339_v48 }
0x16e5   :  { %v5780_v39 = vpop.eup %5779 }
0x16e6   :  { %v5782_v49 = vpop.eup %5781  ;;  %v2344_v50 = vadd.f32 1.0, %v5780_v39 }
0x16e7   :  { %v2343_v53 = vadd.f32 1.0, %v5782_v49 }
0x16e8   :  { %v2346_v56 = vmul.f32 %v2344_v50, %v2330_v54 }
0x16e9   :  { %v2345_v55 = vmul.f32 %v2343_v53, %v2329_v52 }
0x16eb   :  { %5455 = vmatprep.mubr.msk.f32.mxu1 %vm2362_vm3, %v2345_v55 }
0x16ec   :  { %5456 = vmatmul.mubr.msk.f32.vlgmr.msra.gmra.mrb[28].mxu1 %vm2362_vm3, %v2346_v56 }
0x16ed   :  { %5476 = vmatprep.mubr.msk.f32.mxu1 %vm5911_vm1, %v5910_v36 }
0x17bf   :  { %v5457_v17 = vpop.f32.mrb[28].mxu1 }
0x17c0   :  { %v2441_v58 = vadd.f32 %v5457_v17, %v5064_v57  ;;  %v2435_v59 = vpop.f32.mrb[29].mxu1 }
0x17c1   :  { %v2436_v60 = vadd.f32 %v5064_v57, %v2435_v59 }
0x17c2   :  { %v2445_v61 = vadd.f32 %v2441_v58, %v2236_v16 }
0x17c3   :  { %v2444_v62 = vadd.f32 %v2436_v60, %v6349_v2  ;;  %v2491_v2 = vld [vmem:[#allocation2 + $0x20] sm:$0xff] }
0x17c4   :  { %v2451_v63 = vsel %vm110_vm0, %v2445_v61, 0.0  ;;  %v5673_v11 = vpack.c.bf16 %v2492_v10, %v2491_v2 }
0x17c5   :  { %2452 = vadd.xlane.f32.xlu0 %v2451_v63  ;;  %v2448_v35 = vsel %vm110_vm0, %v2444_v62, 0.0 }
0x17c6   :  { %2449 = vadd.xlane.f32.xlu1 %v2448_v35  ;;  %5674 = vmatprep.subr.bf16.mxu0 %v5673_v11  ;;  %v6464_v35 = vld [vmem:[%s6726_s6 + $0x28] sm:$0xff] }
0x17c7   :  { %5676 = vmatpush3.bf16.msra.mxu0 %v5673_v11 }
0x17c8   :  { %5678 = vmatprep.subr.bf16.mxu0 %v5677_v15 }
0x17cb   :  { %5680 = vmatpush3.bf16.msra.mxu0 %v5677_v15 }
0x17cc   :  { %5469 = vmatprep.subr.mxu0 %v5910_v36 }
0x1852   :  { %v2453_v0 = vpop.xlane.xlu0 %2452 }
0x1853   :  { %v2455_v1 = vmul.f32 0.03125, %v2453_v0  ;;  %v2450_v41 = vpop.xlane.xlu1 %2449 }
0x1854   :  { %v2454_v51 = vmul.f32 0.03125, %v2450_v41 }
0x1855   :  { %v2457_v3 = vsub.f32 %v2445_v61, %v2455_v1 }
0x1856   :  { %v2456_v4 = vsub.f32 %v2444_v62, %v2454_v51 }
0x1857   :  { %v2459_v7 = vmul.f32 %v2457_v3, %v2457_v3 }
0x1858   :  { %v2458_v5 = vmul.f32 %v2456_v4, %v2456_v4 }
0x1859   :  { %v2463_v8 = vsel %vm110_vm0, %v2459_v7, 0.0  ;;  %v6479_v7 = vld [vmem:[%s6726_s6 + $0x20] sm:$0xff] }
0x185a   :  { %v2460_v6 = vsel %vm110_vm0, %v2458_v5, 0.0 }
0x185b   :  { %2461 = vadd.xlane.f32.xlu1 %v2460_v6 }
0x185f   :  { %2464 = vadd.xlane.f32.xlu1 %v2463_v8 }
0x18e8   :  { %v2462_v16 = vpop.xlane.xlu1 %2461 }
0x18e9   :  { %v2466_v18 = vmul.f32 0.03125, %v2462_v16 }
0x18eb   :  { %v2468_v19 = vadd.f32 1e-12, %v2466_v18 }
0x18ec   :  { %v2465_v20 = vpop.xlane.xlu1 %2464 }
0x18ed   :  { %5783 = vrsqrt.f32 %v2468_v19  ;;  %v2467_v21 = vmul.f32 0.03125, %v2465_v20 }
0x18ef   :  { %v2469_v44 = vadd.f32 1e-12, %v2467_v21 }
0x18f1   :  { %5785 = vrsqrt.f32 %v2469_v44 }
0x18f7   :  { %v5784_v9 = vpop.eup %5783 }
0x18f8   :  { %v2472_v23 = vmul.f32 %v5784_v9, %v2456_v4 }
0x18fa   :  { %v2480_v24 = vmul.f32 %v5067_v22, %v2472_v23 }
0x18fb   :  { %v5786_v25 = vpop.eup %5785 }
0x18fc   :  { %v2473_v26 = vmul.f32 %v5786_v25, %v2457_v3  ;;  %v6413_v27 = vadd.f32 %v5068_v46, %v2480_v24 }
0x18fe   :  { %v2481_v28 = vmul.f32 %v5067_v22, %v2473_v26  ;;  %5466 = vmatprep.mubr.msk.f32.mxu0 %vm110_vm0, %v6413_v27 }
0x1900   :  { %v6417_v29 = vadd.f32 %v5068_v46, %v2481_v28 }
0x1902   :  { %5467 = vmatmul.mubr.msk.f32.vlgmr.msra.gmra.mrb[24].mxu0 %vm110_vm0, %v6417_v29 }
0x1903   :  { %5471 = vmatprep.mubr.msk.f32.mxu0 %vm5911_vm1, %v5910_v36 }
0x19d5   :  { %v5468_v31 = vpop.f32.mrb[24].mxu0 }
0x19d6   :  { %v6426_v32 = vadd.f32 %v5468_v31, %v5070_v30  ;;  %v2575_v33 = vpop.f32.mrb[25].mxu0 }
0x19d7   :  { %v6428_v34 = vadd.f32 %v5070_v30, %v2575_v33 }
0x19d9   :  { %2755 = vrot.lane.b32.xlu0 %v6428_v34, %s5915_s21  ;;  %2590 = vrot.lane.b32.xlu1 %v6428_v34, %s5912_s4 }
0x19dd   :  { %2757 = vrot.lane.b32.xlu1 %v6428_v34, %s5913_s29 }
0x1a4b   :  { %v2591_v37 = vpop.permute.xlu1 %2590  ;;  %v2756_v40 = vpop.permute.xlu0 %2755 }
0x1a4c   :  { %5470 = vmatpush3.xpose.msk.msra.mxu0 %vm254_vm2, %v2591_v37 }
0x1a4d   :  { %5479 = vmatprep.subr.mxu0 %v5910_v36 }
0x1a4f   :  { %5472 = vmatmul.mubr.msk.f32.vlgmr.msra.gmra.mrb[26].mxu0 %vm254_vm2, %v6428_v34  ;;  %v2758_v38 = vpop.permute.xlu1 %2757 }
0x1a50   :  { %5480 = vmatpush3.xpose.msk.msra.mxu0 %vm254_vm2, %v2758_v38  ;;  %5481 = vmatprep.mubr.msk.f32.mxu0 %vm5911_vm1, %v5910_v36 }
0x1a51   :  { %5489 = vmatprep.subr.mxu0 %v5910_v36 }
0x1a53   :  { %5482 = vmatmul.mubr.msk.f32.vlgmr.msra.gmra.mrb[28].mxu0 %vm254_vm2, %v2756_v40 }
0x1a54   :  { %5491 = vmatprep.mubr.msk.f32.mxu0 %vm5911_vm1, %v5910_v36  ;;  %5490 = vmatpush3.msra.mxu0 %v6464_v35 }
0x1a55   :  { %5499 = vmatprep.subr.mxu0 %v5910_v36 }
0x1b22   :  { %v2662_v42 = vpop.f32.mrb[26].mxu0 }
0x1b23   :  { %v2666_v43 = vmul.f32 0.35355338, %v2662_v42  ;;  %v5473_v45 = vpop.f32.mrb[27].mxu0  ;;  %v6515_v42 = vld [vmem:[%s6726_s6 + $0x30] sm:$0xff] }
0x1b25   :  { %v2667_v48 = vadd.f32 %v2666_v43, %v6136_v47 }
0x1b26   :  { %v2829_v39 = vpop.f32.mrb[28].mxu0 }
0x1b27   :  { %v2833_v49 = vmul.f32 0.35355338, %v2829_v39  ;;  %v5483_v50 = vpop.f32.mrb[29].mxu0  ;;  %v2668_v52 = vsel %vm254_vm2, %v2667_v48, -inf }
0x1b28   :  { %2669 = vmax.xlane.f32.xlu1 %v2668_v52 }
0x1b29   :  { %v2834_v53 = vadd.f32 %v2833_v49, %v6136_v47 }
0x1b2b   :  { %v2835_v54 = vsel %vm254_vm2, %v2834_v53, -inf }
0x1b2c   :  { %2836 = vmax.xlane.f32.xlu0 %v2835_v54 }
0x1b42   :  { %2846 = vrot.lane.b32.xlu0 %v6428_v34, %s5916_s23 }
0x1bb5   :  { %v2670_v55 = vpop.xlane.xlu1 %2669 }
0x1bb6   :  { %v2671_v56 = vsub.f32 %v2667_v48, %v2670_v55 }
0x1bb8   :  { %v2672_v57 = vmul.f32 1.442695, %v2671_v56 }
0x1bb9   :  { %v2837_v17 = vpop.xlane.xlu0 %2836 }
0x1bba   :  { %5787 = vpow2.f32 %v2672_v57  ;;  %v2838_v58 = vsub.f32 %v2834_v53, %v2837_v17 }
0x1bbc   :  { %v2839_v59 = vmul.f32 1.442695, %v2838_v58 }
0x1bbd   :  { %v2847_v4 = vpop.permute.xlu0 %2846 }
0x1bbe   :  { %5789 = vpow2.f32 %v2839_v59 }
0x1bc4   :  { %v5788_v60 = vpop.eup %5787 }
0x1bc5   :  { %v2674_v61 = vsel %vm254_vm2, %v5788_v60, 0.0 }
0x1bc6   :  { %2675 = vadd.xlane.f32.xlu1 %v2674_v61 }
0x1bc8   :  { %v5790_v62 = vpop.eup %5789 }
0x1bc9   :  { %v2841_v63 = vsel %vm254_vm2, %v5790_v62, 0.0 }
0x1bca   :  { %2842 = vadd.xlane.f32.xlu1 %v2841_v63 }
0x1bdb   :  { %2679 = vrot.lane.b32.xlu1 %v6428_v34, %s5914_s22 }
0x1bdf   :  { %3070 = vrot.lane.b32.xlu1 %v6428_v34, %s5918_s18 }
0x1be3   :  { %3068 = vrot.lane.b32.xlu1 %v6428_v34, %s5917_s2 }
0x1c53   :  { %v2676_v0 = vpop.xlane.xlu1 %2675 }
0x1c54   :  { %5791 = vrcp.f32 %v2676_v0 }
0x1c57   :  { %v2843_v1 = vpop.xlane.xlu1 %2842 }
0x1c58   :  { %5793 = vrcp.f32 %v2843_v1  ;;  %v6553_v1 = vld [vmem:[%s6726_s6 + $0x38] sm:$0xff] }
0x1c5b   :  { %v2680_v41 = vpop.permute.xlu1 %2679 }
0x1c5c   :  { %5475 = vmatpush3.msra.mxu1 %v2680_v41 }
0x1c5d   :  { %5484 = vmatprep.subr.mxu1 %v5910_v36 }
0x1c5e   :  { %v5792_v51 = vpop.eup %5791 }
0x1c5f   :  { %v2678_v3 = vmul.f32 %v5792_v51, %v5788_v60  ;;  %v3071_v10 = vpop.permute.xlu1 %3070 }
0x1c61   :  { %5477 = vmatmul.mubr.msk.f32.vlgmr.msra.gmra.mrb[30].mxu1 %vm254_vm2, %v2678_v3 }
0x1c62   :  { %v5794_v5 = vpop.eup %5793  ;;  %5485 = vmatpush3.msra.mxu1 %v2847_v4  ;;  %5486 = vmatprep.mubr.msk.f32.mxu1 %vm5911_vm1, %v5910_v36 }
0x1c63   :  { %v2845_v6 = vmul.f32 %v5794_v5, %v5790_v62  ;;  %5494 = vmatprep.subr.mxu1 %v5910_v36  ;;  %v3069_v14 = vpop.permute.xlu1 %3068 }
0x1c65   :  { %5487 = vmatmul.mubr.msk.f32.vlgmr.msra.gmra.mrb[32].mxu1 %vm254_vm2, %v2845_v6 }
0x1c66   :  { %5496 = vmatprep.mubr.msk.f32.mxu1 %vm5911_vm1, %v5910_v36  ;;  %5495 = vmatpush3.msra.mxu1 %v6479_v7 }
0x1c67   :  { %5504 = vmatprep.subr.mxu1 %v5910_v36 }
0x1d34   :  { %v2751_v8 = vpop.f32.mrb[30].mxu1 }
0x1d35   :  { %v5478_v2 = vpop.f32.mrb[31].mxu1  ;;  %5497 = vmatmul.mubr.msk.f32.vlgmr.msra.gmra.mrb[34].mxu1 %vm254_vm2, %v2751_v8 }
0x1d36   :  { %5506 = vmatprep.mubr.msk.f32.mxu1 %vm5911_vm1, %v5910_v36 }
0x1d38   :  { %v2918_v11 = vpop.f32.mrb[32].mxu1 }
0x1d39   :  { %v5488_v12 = vpop.f32.mrb[33].mxu1  ;;  %5492 = vmatmul.mubr.msk.f32.vlgmr.msra.gmra.mrb[30].mxu0 %vm254_vm2, %v2918_v11 }
0x1d3a   :  { %5500 = vmatpush3.xpose.msk.msra.mxu0 %vm254_vm2, %v3071_v10  ;;  %5501 = vmatprep.mubr.msk.f32.mxu0 %vm5911_vm1, %v5910_v36 }
0x1d3b   :  { %5509 = vmatprep.subr.mxu0 %v5910_v36 }
0x1d3d   :  { %5502 = vmatmul.mubr.msk.f32.vlgmr.msra.gmra.mrb[32].mxu0 %vm254_vm2, %v3069_v14 }
0x1d3e   :  { %5511 = vmatprep.mubr.msk.f32.mxu0 %vm5911_vm1, %v5910_v36  ;;  %5510 = vmatpush3.msra.mxu0 %v6515_v42 }
0x1d3f   :  { %5519 = vmatprep.subr.mxu0 %v5910_v36 }
0x1e08   :  { %v3064_v15 = vpop.f32.mrb[34].mxu1 }
0x1e09   :  { %v5498_v16 = vpop.f32.mrb[35].mxu1 }
0x1e0c   :  { %v2991_v18 = vpop.f32.mrb[30].mxu0 }
0x1e0d   :  { %v3065_v19 = vadd.f32 %v3064_v15, %v2991_v18  ;;  %v5493_v20 = vpop.f32.mrb[31].mxu0 }
0x1e10   :  { %v3142_v21 = vpop.f32.mrb[32].mxu0 }
0x1e11   :  { %v3146_v44 = vmul.f32 0.35355338, %v3142_v21  ;;  %v5503_v9 = vpop.f32.mrb[33].mxu0 }
0x1e13   :  { %v3147_v22 = vadd.f32 %v3146_v44, %v6136_v47 }
0x1e15   :  { %v3148_v23 = vsel %vm254_vm2, %v3147_v22, -inf }
0x1e16   :  { %3149 = vmax.xlane.f32.xlu1 %v3148_v23 }
0x1e27   :  { %3159 = vrot.lane.b32.xlu1 %v6428_v34, %s6761_s0 }
0x1e2b   :  { %3309 = vrot.lane.b32.xlu1 %v6428_v34, %s6762_s26 }
0x1ea3   :  { %v3150_v46 = vpop.xlane.xlu1 %3149 }
0x1ea4   :  { %v3151_v24 = vsub.f32 %v3147_v22, %v3150_v46 }
0x1ea6   :  { %v3152_v25 = vmul.f32 1.442695, %v3151_v24 }
0x1ea7   :  { %v3160_v26 = vpop.permute.xlu1 %3159 }
0x1ea8   :  { %5795 = vpow2.f32 %v3152_v25  ;;  %5505 = vmatpush3.msra.mxu1 %v3160_v26 }
0x1ea9   :  { %5514 = vmatprep.subr.mxu1 %v5910_v36 }
0x1eab   :  { %v3310_v40 = vpop.permute.xlu1 %3309 }
0x1eb2   :  { %v5796_v28 = vpop.eup %5795 }
0x1eb3   :  { %v3154_v30 = vsel %vm254_vm2, %v5796_v28, 0.0 }
0x1eb4   :  { %3155 = vadd.xlane.f32.xlu0 %v3154_v30 }
0x1eca   :  { %3311 = vrot.lane.b32.xlu0 %v6428_v34, %s6763_s16 }
0x1f41   :  { %v3156_v31 = vpop.xlane.xlu0 %3155 }
0x1f42   :  { %5797 = vrcp.f32 %v3156_v31 }
0x1f45   :  { %v3312_v38 = vpop.permute.xlu0 %3311 }
0x1f4c   :  { %v5798_v33 = vpop.eup %5797 }
0x1f4d   :  { %v3158_v37 = vmul.f32 %v5798_v33, %v5796_v28 }
0x1f4f   :  { %5507 = vmatmul.mubr.msk.f32.vlgmr.msra.gmra.mrb[36].mxu1 %vm254_vm2, %v3158_v37 }
0x1f50   :  { %5515 = vmatpush3.xpose.msk.msra.mxu1 %vm254_vm2, %v3312_v38  ;;  %5516 = vmatprep.mubr.msk.f32.mxu1 %vm5911_vm1, %v5910_v36 }
0x1f51   :  { %5524 = vmatprep.subr.mxu1 %v5910_v36 }
0x1f53   :  { %5517 = vmatmul.mubr.msk.f32.vlgmr.msra.gmra.mrb[38].mxu1 %vm254_vm2, %v3310_v40 }
0x1f54   :  { %5526 = vmatprep.mubr.msk.f32.mxu1 %vm5911_vm1, %v5910_v36  ;;  %5525 = vmatpush3.msra.mxu1 %v6553_v1 }
0x1f55   :  { %5534 = vmatprep.subr.mxu1 %v5910_v36 }
0x2022   :  { %v3231_v43 = vpop.f32.mrb[36].mxu1 }
0x2023   :  { %v5508_v45 = vpop.f32.mrb[37].mxu1  ;;  %5512 = vmatmul.mubr.msk.f32.vlgmr.msra.gmra.mrb[34].mxu0 %vm254_vm2, %v3231_v43 }
0x2024   :  { %5521 = vmatprep.mubr.msk.f32.mxu0 %vm5911_vm1, %v5910_v36 }
0x2026   :  { %v3383_v48 = vpop.f32.mrb[38].mxu1 }
0x2027   :  { %v3387_v39 = vmul.f32 0.35355338, %v3383_v48  ;;  %v5518_v49 = vpop.f32.mrb[39].mxu1 }
0x2029   :  { %v3388_v50 = vadd.f32 %v3387_v39, %v6136_v47 }
0x202b   :  { %v3389_v52 = vsel %vm254_vm2, %v3388_v50, -inf }
0x202c   :  { %3390 = vmax.xlane.f32.xlu1 %v3389_v52 }
0x203d   :  { %3551 = vrot.lane.b32.xlu1 %v6426_v32, %s5912_s4 }
0x2041   :  { %3718 = vrot.lane.b32.xlu1 %v6426_v32, %s5913_s29 }
0x20b9   :  { %v3391_v53 = vpop.xlane.xlu1 %3390 }
0x20ba   :  { %v3392_v54 = vsub.f32 %v3388_v50, %v3391_v53 }
0x20bc   :  { %v3393_v55 = vmul.f32 1.442695, %v3392_v54 }
0x20bd   :  { %v3552_v62 = vpop.permute.xlu1 %3551 }
0x20be   :  { %5799 = vpow2.f32 %v3393_v55 }
0x20c8   :  { %v5800_v56 = vpop.eup %5799 }
0x20c9   :  { %v3395_v57 = vsel %vm254_vm2, %v5800_v56, 0.0 }
0x20ca   :  { %3396 = vadd.xlane.f32.xlu0 %v3395_v57 }
0x20e0   :  { %3400 = vrot.lane.b32.xlu0 %v6428_v34, %s6764_s24  ;;  %v3719_v34 = vpop.permute.xlu1 %3718 }
0x20e4   :  { %3716 = vrot.lane.b32.xlu0 %v6426_v32, %s5915_s21 }
0x20f6   :  { %v3304_v47 = vpop.f32.mrb[34].mxu0 }
0x20f7   :  { %v3308_v17 = vadd.f32 %v3304_v47, %v3065_v19  ;;  %v5513_v58 = vpop.f32.mrb[35].mxu0 }
0x2157   :  { %v3397_v59 = vpop.xlane.xlu0 %3396 }
0x2158   :  { %5801 = vrcp.f32 %v3397_v59 }
0x215b   :  { %v3401_v60 = vpop.permute.xlu0 %3400 }
0x215c   :  { %5520 = vmatpush3.msra.mxu0 %v3401_v60 }
0x215d   :  { %5529 = vmatprep.subr.mxu0 %v5910_v36 }
0x215f   :  { %v3717_v0 = vpop.permute.xlu0 %3716 }
0x2162   :  { %v5802_v61 = vpop.eup %5801 }
0x2163   :  { %v3399_v63 = vmul.f32 %v5802_v61, %v5800_v56 }
0x2165   :  { %5522 = vmatmul.mubr.msk.f32.vlgmr.msra.gmra.mrb[36].mxu0 %vm254_vm2, %v3399_v63 }
0x2166   :  { %5530 = vmatpush3.xpose.msk.msra.mxu0 %vm254_vm2, %v3552_v62  ;;  %5531 = vmatprep.mubr.msk.f32.mxu0 %vm5911_vm1, %v5910_v36 }
0x2167   :  { %5539 = vmatprep.subr.mxu0 %v5910_v36 }
0x2169   :  { %5532 = vmatmul.mubr.msk.f32.vlgmr.msra.gmra.mrb[38].mxu0 %vm254_vm2, %v6426_v32 }
0x216a   :  { %5540 = vmatpush3.xpose.msk.msra.mxu0 %vm254_vm2, %v3719_v34  ;;  %5541 = vmatprep.mubr.msk.f32.mxu0 %vm5911_vm1, %v5910_v36 }
0x216b   :  { %5549 = vmatprep.subr.mxu0 %v5910_v36 }
0x216d   :  { %5542 = vmatmul.mubr.msk.f32.vlgmr.msra.gmra.mrb[40].mxu0 %vm254_vm2, %v3717_v0 }
0x216e   :  { %5550 = vmatpush3.msra.mxu0 %v6464_v35  ;;  %5551 = vmatprep.mubr.msk.f32.mxu0 %vm5911_vm1, %v5910_v36 }
0x216f   :  { %5559 = vmatprep.subr.mxu0 %v5910_v36 }
0x2238   :  { %v3472_v41 = vpop.f32.mrb[36].mxu0 }
0x2239   :  { %v5523_v51 = vpop.f32.mrb[37].mxu0  ;;  %5527 = vmatmul.mubr.msk.f32.vlgmr.msra.gmra.mrb[40].mxu1 %vm254_vm2, %v3472_v41 }
0x223a   :  { %5536 = vmatprep.mubr.msk.f32.mxu1 %vm5911_vm1, %v5910_v36 }
0x223c   :  { %v3623_v35 = vpop.f32.mrb[38].mxu0 }
0x223d   :  { %v3627_v3 = vmul.f32 0.35355338, %v3623_v35  ;;  %v5533_v4 = vpop.f32.mrb[39].mxu0 }
0x223f   :  { %v3628_v5 = vadd.f32 %v3627_v3, %v6263_v13 }
0x2240   :  { %v3790_v6 = vpop.f32.mrb[40].mxu0 }
0x2241   :  { %v3794_v8 = vmul.f32 0.35355338, %v3790_v6  ;;  %v5543_v2 = vpop.f32.mrb[41].mxu0  ;;  %v3629_v10 = vsel %vm254_vm2, %v3628_v5, -inf }
0x2242   :  { %3630 = vmax.xlane.f32.xlu1 %v3629_v10 }
0x2243   :  { %v3795_v11 = vadd.f32 %v3794_v8, %v6263_v13 }
0x2245   :  { %v3796_v12 = vsel %vm254_vm2, %v3795_v11, -inf }
0x2246   :  { %3797 = vmax.xlane.f32.xlu0 %v3796_v12 }
0x22cf   :  { %v3631_v14 = vpop.xlane.xlu1 %3630 }
0x22d0   :  { %v3632_v15 = vsub.f32 %v3628_v5, %v3631_v14 }
0x22d2   :  { %v3633_v16 = vmul.f32 1.442695, %v3632_v15 }
0x22d3   :  { %v3798_v18 = vpop.xlane.xlu0 %3797 }
0x22d4   :  { %5803 = vpow2.f32 %v3633_v16  ;;  %v3799_v19 = vsub.f32 %v3795_v11, %v3798_v18 }
0x22d6   :  { %v3800_v20 = vmul.f32 1.442695, %v3799_v19 }
0x22d8   :  { %5805 = vpow2.f32 %v3800_v20 }
0x22de   :  { %v5804_v21 = vpop.eup %5803 }
0x22df   :  { %v3635_v44 = vsel %vm254_vm2, %v5804_v21, 0.0 }
0x22e0   :  { %3636 = vadd.xlane.f32.xlu0 %v3635_v44 }
0x22e2   :  { %v5806_v9 = vpop.eup %5805 }
0x22e3   :  { %v3802_v22 = vsel %vm254_vm2, %v5806_v9, 0.0 }
0x22e4   :  { %3803 = vadd.xlane.f32.xlu1 %v3802_v22 }
0x22f5   :  { %3807 = vrot.lane.b32.xlu1 %v6426_v32, %s5916_s23 }
0x22f6   :  { %3640 = vrot.lane.b32.xlu0 %v6426_v32, %s5914_s22 }
0x22f9   :  { %4031 = vrot.lane.b32.xlu1 %v6426_v32, %s5918_s18 }
0x22fa   :  { %4029 = vrot.lane.b32.xlu0 %v6426_v32, %s5917_s2 }
0x230c   :  { %v3545_v23 = vpop.f32.mrb[40].mxu1 }
0x230d   :  { %v6574_v46 = vadd.f32 %v3545_v23, %v3308_v17  ;;  %v5528_v24 = vpop.f32.mrb[41].mxu1 }
0x236d   :  { %v3637_v25 = vpop.xlane.xlu0 %3636 }
0x236e   :  { %5807 = vrcp.f32 %v3637_v25 }
0x2371   :  { %v3804_v26 = vpop.xlane.xlu1 %3803  ;;  %v3641_v28 = vpop.permute.xlu0 %3640 }
0x2372   :  { %5809 = vrcp.f32 %v3804_v26  ;;  %5535 = vmatpush3.msra.mxu1 %v3641_v28 }
0x2373   :  { %5544 = vmatprep.subr.mxu1 %v5910_v36 }
0x2375   :  { %v3808_v33 = vpop.permute.xlu1 %3807 }
0x2378   :  { %v5808_v30 = vpop.eup %5807 }
0x2379   :  { %v3639_v31 = vmul.f32 %v5808_v30, %v5804_v21  ;;  %v4032_v48 = vpop.permute.xlu1 %4031 }
0x237b   :  { %5537 = vmatmul.mubr.msk.f32.vlgmr.msra.gmra.mrb[42].mxu1 %vm254_vm2, %v3639_v31 }
0x237c   :  { %v5810_v37 = vpop.eup %5809  ;;  %5545 = vmatpush3.msra.mxu1 %v3808_v33  ;;  %5546 = vmatprep.mubr.msk.f32.mxu1 %vm5911_vm1, %v5910_v36 }
0x237d   :  { %v3806_v38 = vmul.f32 %v5810_v37, %v5806_v9  ;;  %5554 = vmatprep.subr.mxu1 %v5910_v36 }
0x237f   :  { %5547 = vmatmul.mubr.msk.f32.vlgmr.msra.gmra.mrb[44].mxu1 %vm254_vm2, %v3806_v38 }
0x2380   :  { %5555 = vmatpush3.msra.mxu1 %v6479_v7  ;;  %5556 = vmatprep.mubr.msk.f32.mxu1 %vm5911_vm1, %v5910_v36  ;;  %v4030_v7 = vpop.permute.xlu0 %4029 }
0x2381   :  { %5564 = vmatprep.subr.mxu1 %v5910_v36 }
0x244e   :  { %v3712_v40 = vpop.f32.mrb[42].mxu1 }
0x244f   :  { %v5538_v43 = vpop.f32.mrb[43].mxu1  ;;  %5557 = vmatmul.mubr.msk.f32.vlgmr.msra.gmra.mrb[46].mxu1 %vm254_vm2, %v3712_v40 }
0x2450   :  { %5566 = vmatprep.mubr.msk.f32.mxu1 %vm5911_vm1, %v5910_v36 }
0x2452   :  { %v3879_v45 = vpop.f32.mrb[44].mxu1 }
0x2453   :  { %v5548_v39 = vpop.f32.mrb[45].mxu1  ;;  %5552 = vmatmul.mubr.msk.f32.vlgmr.msra.gmra.mrb[42].mxu0 %vm254_vm2, %v3879_v45 }
0x2454   :  { %5560 = vmatpush3.xpose.msk.msra.mxu0 %vm254_vm2, %v4032_v48  ;;  %5561 = vmatprep.mubr.msk.f32.mxu0 %vm5911_vm1, %v5910_v36 }
0x2455   :  { %5569 = vmatprep.subr.mxu0 %v5910_v36 }
0x2457   :  { %5562 = vmatmul.mubr.msk.f32.vlgmr.msra.gmra.mrb[44].mxu0 %vm254_vm2, %v4030_v7 }
0x2458   :  { %5570 = vmatpush3.msra.mxu0 %v6515_v42  ;;  %5571 = vmatprep.mubr.msk.f32.mxu0 %vm5911_vm1, %v5910_v36 }
0x2459   :  { %5579 = vmatprep.subr.mxu0 %v5910_v36 }
0x2522   :  { %v4025_v49 = vpop.f32.mrb[46].mxu1 }
0x2523   :  { %v5558_v50 = vpop.f32.mrb[47].mxu1 }
0x2526   :  { %v3952_v52 = vpop.f32.mrb[42].mxu0 }
0x2527   :  { %v4026_v53 = vadd.f32 %v4025_v49, %v3952_v52  ;;  %v5553_v54 = vpop.f32.mrb[43].mxu0 }
0x2528   :  { %v5114_v54 = vld [vmem:[%s6729_s9 + $0x1] ss:$0 sm:$0xff] }
0x252a   :  { %v4103_v55 = vpop.f32.mrb[44].mxu0 }
0x252b   :  { %v4107_v56 = vmul.f32 0.35355338, %v4103_v55  ;;  %v5563_v57 = vpop.f32.mrb[45].mxu0 }
0x252c   :  { %v5115_v57 = vld [vmem:[%s6730_s10 + $0x20] sm:$0xff] }
0x252d   :  { %v4108_v47 = vadd.f32 %v4107_v56, %v6263_v13 }
0x252f   :  { %v4109_v17 = vsel %vm254_vm2, %v4108_v47, -inf }
0x2530   :  { %4110 = vmax.xlane.f32.xlu1 %v4109_v17 }
0x2541   :  { %4272 = vrot.lane.b32.xlu1 %v6426_v32, %s6763_s16 }
0x2545   :  { %4270 = vrot.lane.b32.xlu1 %v6426_v32, %s6762_s26 }
0x25bd   :  { %v4111_v42 = vpop.xlane.xlu1 %4110 }
0x25be   :  { %v4112_v58 = vsub.f32 %v4108_v47, %v4111_v42  ;;  %v5116_v47 = vld [vmem:[%s6730_s10 + $0x28] sm:$0xff]  ;;  %v5117_v42 = vld [vmem:[%s6730_s10 + $0x30] sm:$0xff] }
0x25bf   :  { %v5681_v17 = vpack.c.bf16 %v5116_v47, %v5115_v57 }
0x25c0   :  { %v4113_v59 = vmul.f32 1.442695, %v4112_v58  ;;  %v5118_v58 = vld [vmem:[%s6730_s10 + $0x38] sm:$0xff] }
0x25c1   :  { %v4273_v0 = vpop.permute.xlu1 %4272 }
0x25c2   :  { %5811 = vpow2.f32 %v4113_v59  ;;  %v5685_v59 = vpack.c.bf16 %v5118_v58, %v5117_v42  ;;  %v4828_v58 = vld [vmem:[#allocation4 + $0x8] sm:$0xff] }
0x25c5   :  { %v4271_v51 = vpop.permute.xlu1 %4270 }
0x25cc   :  { %v5812_v60 = vpop.eup %5811 }
0x25cd   :  { %v4115_v61 = vsel %vm254_vm2, %v5812_v60, 0.0 }
0x25ce   :  { %4116 = vadd.xlane.f32.xlu0 %v4115_v61 }
0x25e4   :  { %4120 = vrot.lane.b32.xlu0 %v6426_v32, %s6761_s0 }
0x265b   :  { %v4117_v62 = vpop.xlane.xlu0 %4116 }
0x265c   :  { %5813 = vrcp.f32 %v4117_v62 }
0x265f   :  { %v4121_v63 = vpop.permute.xlu0 %4120 }
0x2660   :  { %5565 = vmatpush3.msra.mxu1 %v4121_v63 }
0x2661   :  { %5574 = vmatprep.subr.mxu1 %v5910_v36 }
0x2666   :  { %v5814_v34 = vpop.eup %5813 }
0x2667   :  { %v4119_v41 = vmul.f32 %v5814_v34, %v5812_v60 }
0x2669   :  { %5567 = vmatmul.mubr.msk.f32.vlgmr.msra.gmra.mrb[48].mxu1 %vm254_vm2, %v4119_v41 }
0x266a   :  { %5575 = vmatpush3.xpose.msk.msra.mxu1 %vm254_vm2, %v4273_v0  ;;  %5576 = vmatprep.mubr.msk.f32.mxu1 %vm5911_vm1, %v5910_v36 }
0x266b   :  { %5584 = vmatprep.subr.mxu1 %v5910_v36 }
0x266d   :  { %5577 = vmatmul.mubr.msk.f32.vlgmr.msra.gmra.mrb[50].mxu1 %vm254_vm2, %v4271_v51  ;;  %v5123_v51 = vld [vmem:[%s6732_s12 + $0x40] sm:$0xff] }
0x266e   :  { %5585 = vmatpush3.msra.mxu1 %v6553_v1  ;;  %5586 = vmatprep.mubr.msk.f32.mxu1 %vm5911_vm1, %v5910_v36 }
0x273c   :  { %v4192_v35 = vpop.f32.mrb[48].mxu1 }
0x273d   :  { %v5568_v3 = vpop.f32.mrb[49].mxu1  ;;  %5572 = vmatmul.mubr.msk.f32.vlgmr.msra.gmra.mrb[46].mxu0 %vm254_vm2, %v4192_v35  ;;  %v5124_v35 = vld [vmem:[%s6732_s12 + $0x48] sm:$0xff] }
0x273e   :  { %5581 = vmatprep.mubr.msk.f32.mxu0 %vm5911_vm1, %v5910_v36  ;;  %v5110_v36 = vld [vmem:[%s6727_s7 + $0x1] ss:$0 sm:$0xff]  ;;  %v5689_v3 = vpack.c.bf16 %v5124_v35, %v5123_v51 }
0x273f   :  { %v4519_v14 = vadd.f32 %v5110_v36, %v6574_v46 }
0x2740   :  { %v4344_v4 = vpop.f32.mrb[50].mxu1  ;;  %5690 = vmatprep.subr.bf16.mxu1 %v5689_v3 }
0x2741   :  { %v4348_v5 = vmul.f32 0.35355338, %v4344_v4  ;;  %v5578_v6 = vpop.f32.mrb[51].mxu1  ;;  %v4521_v16 = vadd.f32 %v4519_v14, %v6413_v27  ;;  %v5125_v4 = vld [vmem:[%s6732_s12 + $0x50] sm:$0xff] }
0x2743   :  { %v4349_v8 = vadd.f32 %v4348_v5, %v6263_v13  ;;  %v5126_v5 = vld [vmem:[%s6732_s12 + $0x58] sm:$0xff] }
0x2744   :  { %v5693_v6 = vpack.c.bf16 %v5126_v5, %v5125_v4  ;;  %v5137_v4 = vld [vmem:[%s6734_s14 + $0x1] ss:$0 sm:$0xff] }
0x2745   :  { %v4350_v2 = vsel %vm254_vm2, %v4349_v8, -inf }
0x2746   :  { %4351 = vmax.xlane.f32.xlu0 %v4350_v2  ;;  %v5128_v2 = vld [vmem:[%s6732_s12 + $0x68] sm:$0xff] }
0x275c   :  { %4361 = vrot.lane.b32.xlu0 %v6426_v32, %s6764_s24  ;;  %v4527_v32 = vsel %vm110_vm0, %v4521_v16, 0.0 }
0x27d3   :  { %v4352_v1 = vpop.xlane.xlu0 %4351 }
0x27d4   :  { %v4353_v10 = vsub.f32 %v4349_v8, %v4352_v1  ;;  %v5127_v8 = vld [vmem:[%s6732_s12 + $0x60] sm:$0xff] }
0x27d5   :  { %v5697_v1 = vpack.c.bf16 %v5128_v2, %v5127_v8 }
0x27d6   :  { %v4354_v11 = vmul.f32 1.442695, %v4353_v10  ;;  %v5129_v10 = vld [vmem:[%s6732_s12 + $0x70] sm:$0xff] }
0x27d7   :  { %v4362_v12 = vpop.permute.xlu0 %4361 }
0x27d8   :  { %5815 = vpow2.f32 %v4354_v11  ;;  %5580 = vmatpush3.msra.mxu0 %v4362_v12  ;;  %v5130_v11 = vld [vmem:[%s6732_s12 + $0x78] sm:$0xff] }
0x27d9   :  { %5682 = vmatprep.subr.bf16.mxu0 %v5681_v17  ;;  %v5701_v12 = vpack.c.bf16 %v5130_v11, %v5129_v10 }
0x27e2   :  { %v5816_v15 = vpop.eup %5815 }
0x27e3   :  { %v4356_v13 = vsel %vm254_vm2, %v5816_v15, 0.0 }
0x27e4   :  { %4357 = vadd.xlane.f32.xlu1 %v4356_v13 }
0x27e8   :  { %4528 = vadd.xlane.f32.xlu1 %v4527_v32 }
0x2810   :  { %v4265_v18 = vpop.f32.mrb[46].mxu0 }
0x2811   :  { %v4269_v19 = vadd.f32 %v4265_v18, %v4026_v53  ;;  %v5573_v20 = vpop.f32.mrb[47].mxu0 }
0x2871   :  { %v4358_v21 = vpop.xlane.xlu1 %4357 }
0x2872   :  { %5817 = vrcp.f32 %v4358_v21 }
0x2875   :  { %v4529_v46 = vpop.xlane.xlu1 %4528 }
0x2876   :  { %v4533_v24 = vmul.f32 0.03125, %v4529_v46 }
0x2878   :  { %v4535_v28 = vsub.f32 %v4521_v16, %v4533_v24 }
0x287a   :  { %v4537_v37 = vmul.f32 %v4535_v28, %v4535_v28 }
0x287c   :  { %v5818_v44 = vpop.eup %5817  ;;  %v4539_v38 = vsel %vm110_vm0, %v4537_v37, 0.0  ;;  %v5132_v37 = vld [vmem:[%s6733_s13 + $0x1] ss:$0 sm:$0xff] }
0x287d   :  { %v4360_v9 = vmul.f32 %v5818_v44, %v5816_v15 }
0x287f   :  { %5582 = vmatmul.mubr.msk.f32.vlgmr.msra.gmra.mrb[48].mxu0 %vm254_vm2, %v4360_v9 }
0x2880   :  { %5684 = vmatpush3.bf16.msra.mxu0 %v5681_v17 }
0x2881   :  { %5686 = vmatprep.subr.bf16.mxu0 %v5685_v59 }
0x2884   :  { %5688 = vmatpush3.bf16.msra.mxu0 %v5685_v59 }
0x2952   :  { %v4433_v22 = vpop.f32.mrb[48].mxu0 }
0x2953   :  { %v5583_v23 = vpop.f32.mrb[49].mxu0  ;;  %5587 = vmatmul.mubr.msk.f32.vlgmr.msra.gmra.mrb[52].mxu1 %vm254_vm2, %v4433_v22 }
0x2954   :  { %5692 = vmatpush3.bf16.msra.mxu1 %v5689_v3 }
0x2955   :  { %5694 = vmatprep.subr.bf16.mxu1 %v5693_v6 }
0x2958   :  { %5696 = vmatpush3.bf16.msra.mxu1 %v5693_v6  ;;  %v5138_v6 = vld [vmem:[%s6735_s15 + $0x1] ss:$0 sm:$0xff] }
0x2959   :  { %5698 = vmatprep.subr.bf16.mxu1 %v5697_v1 }
0x295c   :  { %5700 = vmatpush3.bf16.msra.mxu1 %v5697_v1 }
0x295d   :  { %5702 = vmatprep.subr.bf16.mxu1 %v5701_v12 }
0x2960   :  { %5704 = vmatpush3.bf16.msra.mxu1 %v5701_v12 }
0x2a26   :  { %v4506_v27 = vpop.f32.mrb[52].mxu1 }
0x2a27   :  { %v4510_v25 = vadd.f32 %v4506_v27, %v4269_v19  ;;  %v5588_v26 = vpop.f32.mrb[53].mxu1 }
0x2a29   :  { %v4520_v30 = vadd.f32 %v5110_v36, %v4510_v25  ;;  %v5120_v36 = vld [vmem:[%s6731_s11 + $0x1] ss:$0 sm:$0xff] }
0x2a2b   :  { %v4522_v31 = vadd.f32 %v4520_v30, %v6417_v29  ;;  %v5113_v29 = vld [vmem:[%s6728_s8 + $0x1] ss:$0 sm:$0xff] }
0x2a2d   :  { %v4530_v33 = vsel %vm110_vm0, %v4522_v31, 0.0 }
0x2a2e   :  { %4531 = vadd.xlane.f32.xlu1 %v4530_v33 }
0x2a32   :  { %4540 = vadd.xlane.f32.xlu1 %v4539_v38 }
0x2abb   :  { %v4532_v40 = vpop.xlane.xlu1 %4531 }
0x2abc   :  { %v4534_v43 = vmul.f32 0.03125, %v4532_v40 }
0x2abe   :  { %v4536_v45 = vsub.f32 %v4522_v31, %v4534_v43 }
0x2abf   :  { %v4541_v48 = vpop.xlane.xlu1 %4540 }
0x2ac0   :  { %v4545_v39 = vmul.f32 0.03125, %v4541_v48  ;;  %v4538_v7 = vmul.f32 %v4536_v45, %v4536_v45 }
0x2ac2   :  { %v4547_v49 = vadd.f32 1e-12, %v4545_v39  ;;  %v4542_v50 = vsel %vm110_vm0, %v4538_v7, 0.0 }
0x2ac3   :  { %4543 = vadd.xlane.f32.xlu1 %v4542_v50 }
0x2ac4   :  { %5819 = vrsqrt.f32 %v4547_v49 }
0x2ace   :  { %v5820_v52 = vpop.eup %5819 }
0x2acf   :  { %v4551_v53 = vmul.f32 %v5820_v52, %v4535_v28 }
0x2ad1   :  { %v4559_v55 = vmul.f32 %v5113_v29, %v4551_v53 }
0x2ad3   :  { %v6644_v56 = vadd.f32 %v5114_v54, %v4559_v55 }
0x2ad5   :  { %5597 = vmatprep.mubr.msk.f32.mxu0 %vm110_vm0, %v6644_v56 }
0x2b50   :  { %v4544_v60 = vpop.xlane.xlu1 %4543 }
0x2b51   :  { %v4546_v61 = vmul.f32 0.03125, %v4544_v60  ;;  %v4829_v60 = vld [vmem:[#allocation4 + $0x10] sm:$0xff] }
0x2b53   :  { %v4548_v62 = vadd.f32 1e-12, %v4546_v61  ;;  %v4830_v61 = vld [vmem:[#allocation4 + $0x18] sm:$0xff] }
0x2b55   :  { %5821 = vrsqrt.f32 %v4548_v62  ;;  %v5709_v62 = vpack.c.bf16 %v4830_v61, %v4829_v60 }
0x2b5f   :  { %v5822_v63 = vpop.eup %5821 }
0x2b60   :  { %v4552_v34 = vmul.f32 %v5822_v63, %v4536_v45 }
0x2b62   :  { %v4560_v0 = vmul.f32 %v5113_v29, %v4552_v34 }
0x2b64   :  { %v4568_v41 = vadd.f32 %v5114_v54, %v4560_v0 }
0x2b66   :  { %5598 = vmatmul.mubr.msk.f32.vlgmr.msra.gmra.mrb[50].mxu0 %vm110_vm0, %v4568_v41 }
0x2c39   :  { %v5599_v14 = vpop.f32.mrb[50].mxu0 }
0x2c3a   :  { %v4660_v15 = vadd.f32 %v5599_v14, %v5120_v36  ;;  %v4654_v13 = vpop.f32.mrb[51].mxu0  ;;  %v4922_v14 = vld [vmem:[#allocation6 + $0x8] sm:$0xff] }
0x2c3b   :  { %v4655_v16 = vadd.f32 %v5120_v36, %v4654_v13  ;;  %v4921_v36 = vld [vmem:[#allocation6] sm:$0xff] }
0x2c3c   :  { %v4666_v32 = vmul.f32 0.044715, %v4660_v15  ;;  %v4664_v30 = vmul.f32 0.5, %v4660_v15  ;;  %v5713_v13 = vpack.c.bf16 %v4922_v14, %v4921_v36 }
0x2c3d   :  { %v4665_v18 = vmul.f32 0.044715, %v4655_v16  ;;  %v4663_v26 = vmul.f32 0.5, %v4655_v16 }
0x2c3e   :  { %v4668_v19 = vmul.f32 %v4666_v32, %v4660_v15 }
0x2c3f   :  { %v4667_v20 = vmul.f32 %v4665_v18, %v4655_v16  ;;  %v5139_v18 = vld [vmem:[%s6737_s17] ss:$0 sm:$0xff] }
0x2c40   :  { %v4670_v21 = vmul.f32 %v4668_v19, %v4660_v15 }
0x2c41   :  { %v4669_v44 = vmul.f32 %v4667_v20, %v4655_v16 }
0x2c42   :  { %v4672_v9 = vadd.f32 %v4670_v21, %v4660_v15  ;;  %v4923_v15 = vld [vmem:[#allocation6 + $0x10] sm:$0xff] }
0x2c43   :  { %v4671_v22 = vadd.f32 %v4669_v44, %v4655_v16  ;;  %v4924_v16 = vld [vmem:[#allocation6 + $0x18] sm:$0xff] }
0x2c44   :  { %v4674_v23 = vmul.f32 0.7978846, %v4672_v9  ;;  %v5717_v32 = vpack.c.bf16 %v4924_v16, %v4923_v15 }
0x2c45   :  { %v4673_v46 = vmul.f32 0.7978846, %v4671_v22 }
0x2c46   :  { %5823 = vtanh.f32 %v4674_v23  ;;  %v5142_v23 = vld [vmem:[%s6739_s19] ss:$0 sm:$0xff] }
0x2c47   :  { %5825 = vtanh.f32 %v4673_v46 }
0x2c50   :  { %v5824_v24 = vpop.eup %5823 }
0x2c51   :  { %v5826_v27 = vpop.eup %5825  ;;  %v4678_v25 = vadd.f32 1.0, %v5824_v24 }
0x2c52   :  { %v4677_v28 = vadd.f32 1.0, %v5826_v27 }
0x2c53   :  { %v4680_v33 = vmul.f32 %v4678_v25, %v4664_v30 }
0x2c54   :  { %v4679_v31 = vmul.f32 %v4677_v28, %v4663_v26 }
0x2c56   :  { %5616 = vmatprep.mubr.msk.f32.mxu1 %vm2362_vm3, %v4679_v31 }
0x2c57   :  { %5617 = vmatmul.mubr.msk.f32.vlgmr.msra.gmra.mrb[54].mxu1 %vm2362_vm3, %v4680_v33 }
0x2d2a   :  { %v5618_v38 = vpop.f32.mrb[54].mxu1 }
0x2d2b   :  { %v4776_v40 = vadd.f32 %v5618_v38, %v5132_v37  ;;  %v4770_v43 = vpop.f32.mrb[55].mxu1 }
0x2d2c   :  { %v4771_v45 = vadd.f32 %v5132_v37, %v4770_v43 }
0x2d2d   :  { %v4780_v48 = vadd.f32 %v4776_v40, %v4568_v41 }
0x2d2e   :  { %v4779_v39 = vadd.f32 %v4771_v45, %v6644_v56  ;;  %v4827_v56 = vld [vmem:[#allocation4] sm:$0xff] }
0x2d2f   :  { %v4788_v7 = vsel %vm110_vm0, %v4780_v48, 0.0  ;;  %v5705_v59 = vpack.c.bf16 %v4828_v58, %v4827_v56 }
0x2d30   :  { %4789 = vadd.xlane.f32.xlu1 %v4788_v7  ;;  %v4785_v49 = vsel %vm110_vm0, %v4779_v39, 0.0 }
0x2d31   :  { %4786 = vadd.xlane.f32.xlu0 %v4785_v49  ;;  %5706 = vmatprep.subr.bf16.mxu0 %v5705_v59 }
0x2d32   :  { %5708 = vmatpush3.bf16.msra.mxu0 %v5705_v59 }
0x2d33   :  { %5710 = vmatprep.subr.bf16.mxu0 %v5709_v62 }
0x2d36   :  { %5712 = vmatpush3.bf16.msra.mxu0 %v5709_v62 }
0x2d37   :  { %5714 = vmatprep.subr.bf16.mxu0 %v5713_v13 }
0x2dbd   :  { %v4790_v50 = vpop.xlane.xlu1 %4789 }
0x2dbe   :  { %v4792_v52 = vmul.f32 0.03125, %v4790_v50  ;;  %v4787_v29 = vpop.xlane.xlu0 %4786 }
0x2dbf   :  { %v4791_v53 = vmul.f32 0.03125, %v4787_v29 }
0x2dc0   :  { %v4794_v54 = vsub.f32 %v4780_v48, %v4792_v52 }
0x2dc1   :  { %v4793_v55 = vsub.f32 %v4779_v39, %v4791_v53 }
0x2dc2   :  { %v4796_v17 = vmul.f32 %v4794_v54, %v4794_v54 }
0x2dc3   :  { %v4795_v57 = vmul.f32 %v4793_v55, %v4793_v55 }
0x2dc4   :  { %v4800_v42 = vsel %vm110_vm0, %v4796_v17, 0.0 }
0x2dc5   :  { %v4797_v47 = vsel %vm110_vm0, %v4795_v57, 0.0 }
0x2dc6   :  { %4798 = vadd.xlane.f32.xlu1 %v4797_v47 }
0x2dca   :  { %4801 = vadd.xlane.f32.xlu1 %v4800_v42 }
0x2e53   :  { %v4799_v63 = vpop.xlane.xlu1 %4798 }
0x2e54   :  { %v4803_v34 = vmul.f32 0.03125, %v4799_v63 }
0x2e56   :  { %v4805_v0 = vadd.f32 1e-12, %v4803_v34 }
0x2e57   :  { %v4802_v41 = vpop.xlane.xlu1 %4801 }
0x2e58   :  { %5827 = vrsqrt.f32 %v4805_v0  ;;  %v4804_v51 = vmul.f32 0.03125, %v4802_v41 }
0x2e5a   :  { %v4806_v35 = vadd.f32 1e-12, %v4804_v51 }
0x2e5c   :  { %5829 = vrsqrt.f32 %v4806_v35 }
0x2e62   :  { %v5828_v3 = vpop.eup %5827 }
0x2e63   :  { %v4809_v5 = vmul.f32 %v5828_v3, %v4793_v55 }
0x2e65   :  { %v4817_v8 = vmul.f32 %v5137_v4, %v4809_v5 }
0x2e66   :  { %v5830_v2 = vpop.eup %5829 }
0x2e67   :  { %v4810_v1 = vmul.f32 %v5830_v2, %v4794_v54  ;;  %v4825_v10 = vadd.f32 %v5138_v6, %v4817_v8 }
0x2e69   :  { %v4818_v11 = vmul.f32 %v5137_v4, %v4810_v1  ;;  %5627 = vmatprep.mubr.msk.f32.mxu0 %vm110_vm0, %v4825_v10 }
0x2e6b   :  { %v4826_v12 = vadd.f32 %v5138_v6, %v4818_v11 }
0x2e6d   :  { %5628 = vmatmul.mubr.msk.f32.vlgmr.msra.gmra.mrb[52].mxu0 %vm110_vm0, %v4826_v12 }
0x2e6e   :  { %5716 = vmatpush3.bf16.msra.mxu0 %v5713_v13 }
0x2e6f   :  { %5718 = vmatprep.subr.bf16.mxu0 %v5717_v32 }
0x2e72   :  { %5720 = vmatpush3.bf16.msra.mxu0 %v5717_v32 }
0x2f40   :  { %v5629_v19 = vpop.f32.mrb[52].mxu0 }
0x2f41   :  { %v4916_v20 = vadd.f32 %v5629_v19, %v5139_v18  ;;  %v4910_v21 = vpop.f32.mrb[53].mxu0 }
0x2f42   :  { %v4911_v44 = vadd.f32 %v5139_v18, %v4910_v21 }
0x2f44   :  { %5831 = vtanh.f32 %v4911_v44 }
0x2f45   :  { %5833 = vtanh.f32 %v4916_v20 }
0x2f4e   :  { %v5832_v9 = vpop.eup %5831 }
0x2f4f   :  { %v5834_v22 = vpop.eup %5833  ;;  %5638 = vmatprep.mubr.msk.f32.mxu0 %vm110_vm0, %v5832_v9 }
0x2f50   :  { %5639 = vmatmul.mubr.msk.f32.vlgmr.msra.gmra.mrb[54].mxu0 %vm110_vm0, %v5834_v22 }
0x3023   :  { %v5640_v46 = vpop.f32.mrb[54].mxu0 }
0x3024   :  { %v5010_v24 = vadd.f32 %v5640_v46, %v5142_v23  ;;  %v5004_v27 = vpop.f32.mrb[55].mxu0 }
0x3025   :  { %v5005_v25 = vadd.f32 %v5142_v23, %v5004_v27 }
0x3026   :  { %5014 = vst [vmem:[%s6740_s20 + $0x8] sm:$0xff] %v5010_v24 }
0x3027   :  { %5013 = vst [vmem:[%s6740_s20] sm:$0xff] %v5005_v25 }
0x3028   :  { %5019 = vsyncpa [#allocation3], 1 }
0x3029   :  { %5020 = vsyncpa [#allocation5], 1 }

</bundles_post_ra>
